<compile_context>
chip_gen: v7x
topology: tpu7x:2x2x1
jax: 0.10.0
libtpu: 0.0.40
codegen_flags: <defaults>
</compile_context>

<pallas_src>
import collections
import functools

import jax
import jax.numpy as jnp
from jax import lax
from jax.experimental import pallas as pl
from jax.experimental.pallas import tpu as pltpu

NUM_LATENT_LAYERS = 6              # params_dict['num_latent_layers']
ASPECT_REDUCTION = 2.0             # params_dict['aspect_ration_reduction_factor']
ORIG_ROAD_IMG_DIMS = (3, 16, 16)   # (C, H, W)
NETWORK_OUT_H = int(round(ORIG_ROAD_IMG_DIMS[1] / ASPECT_REDUCTION))  # 8
NETWORK_OUT_W = int(round(ORIG_ROAD_IMG_DIMS[2] / ASPECT_REDUCTION))  # 8

CONV1_K = 3 * 3 * ORIG_ROAD_IMG_DIMS[0]   # 27
CONV1_K_PAD = 32                          # pad contraction dim to a multiple of 8
ENC1_C = 8
ENC2_C = 16
SC_HIDDEN = 16
SC_C = 8
DEC_C = 16
PRED_C = 16


# ----------------------------------------------------------------------------
# Fused Pallas kernel
# ----------------------------------------------------------------------------
def _maadnet_fused_kernel(
    # inputs
    patches_ref, gaze_ref, mask_ref, avg_ref, sel_ref,
    gaze_w_ref, gaze_b_ref,
    enc1_w_ref, enc1_b_ref,
    enc2_w_ref, enc2_b_ref,
    sc1_w_ref, sc1_b_ref,
    sc2_w_ref, sc2_b_ref,
    dec_wh_ref, dec_wsc_ref, dec_b_ref,
    pred_w_ref, pred_b_ref,
    head_wg_ref, head_bg_ref, head_wa_ref, head_ba_ref,
    # outputs
    heads_ref, road_ref, sc_ref,
    # scratch (zero-padded activation buffers for shift-and-matmul convs)
    pad_a_ref, pad_b_ref,
    *, B, Ho, Wo, L):
  f32 = jnp.float32
  S = Ho * Wo
  M = B * S
  nt_dims = (((1,), (1,)), ((), ()))   # A @ B^T

  # ---- GazeTransform (identity affine), gated by should_train_input_gaze ----
  g = gaze_ref[...]                                                     # (B*T, 2)
  t = jnp.dot(g, gaze_w_ref[...], preferred_element_type=f32) + gaze_b_ref[...]
  tg = jnp.where(mask_ref[...] > 0.5, t, g)

  # ---- driver_facing side channel: mean-pooled gaze -> 2-layer MLP ---------
  gsum = jnp.dot(avg_ref[...], tg, preferred_element_type=f32)          # (B, 2)
  sc_h = jnp.maximum(
      jnp.dot(gsum, sc1_w_ref[...], preferred_element_type=f32) + sc1_b_ref[...],
      0.0)
  sc = jnp.dot(sc_h, sc2_w_ref[...], preferred_element_type=f32) + sc2_b_ref[...]
  sc_ref[...] = sc                                                      # (B, SC_C)

  # ---- road_facing encoder conv1 (3x3, stride 2): im2col patches @ W -------
  h1 = jnp.maximum(
      jnp.dot(patches_ref[...], enc1_w_ref[...], preferred_element_type=f32)
      + enc1_b_ref[...], 0.0)                                           # (M, ENC1_C)

  # ---- encoder conv2 (3x3, pad 1, stride 1) via shift-and-matmul -----------
  pad_a_ref[...] = jnp.zeros_like(pad_a_ref)
  pad_a_ref[:, 1:Ho + 1, 1:Wo + 1, :] = h1.reshape(B, Ho, Wo, ENC1_C)
  acc = jnp.zeros((M, ENC2_C), f32)
  for tap in range(9):
    di, dj = tap // 3, tap % 3
    x_tap = pad_a_ref[:, di:di + Ho, dj:dj + Wo, :].reshape(M, ENC1_C)
    acc = acc + jnp.dot(x_tap, enc2_w_ref[tap], preferred_element_type=f32)
  h2 = jnp.maximum(acc + enc2_b_ref[...], 0.0)                          # (M, ENC2_C)

  # ---- decoder conv (3x3) over encoder features + additive side channel ----
  # The spatially-constant side-channel embedding is folded in as a per-batch
  # bias (dec_wsc = side-channel weight rows pre-summed over taps), so no
  # broadcast_to + concatenate is ever materialized.
  pad_b_ref[...] = jnp.zeros_like(pad_b_ref)
  pad_b_ref[:, 1:Ho + 1, 1:Wo + 1, :] = h2.reshape(B, Ho, Wo, ENC2_C)
  acc = jnp.zeros((M, DEC_C), f32)
  for tap in range(9):
    di, dj = tap // 3, tap % 3
    x_tap = pad_b_ref[:, di:di + Ho, dj:dj + Wo, :].reshape(M, ENC2_C)
    acc = acc + jnp.dot(x_tap, dec_wh_ref[tap], preferred_element_type=f32)
  sc_bias = jnp.dot(sc, dec_wsc_ref[...], preferred_element_type=f32)       # (B, DEC_C)
  sc_bias_rows = jnp.dot(sel_ref[...], sc_bias, preferred_element_type=f32)  # (M, DEC_C)
  road = jnp.maximum(acc + dec_b_ref[...] + sc_bias_rows, 0.0)          # (M, DEC_C)
  road_ref[...] = road

  # ---- MaadPredictor conv (3x3); reuse padded buffer (border stays zero) ---
  pad_b_ref[:, 1:Ho + 1, 1:Wo + 1, :] = road.reshape(B, Ho, Wo, DEC_C)
  acc = jnp.zeros((M, PRED_C), f32)
  for tap in range(9):
    di, dj = tap // 3, tap % 3
    x_tap = pad_b_ref[:, di:di + Ho, dj:dj + Wo, :].reshape(M, DEC_C)
    acc = acc + jnp.dot(x_tap, pred_w_ref[tap], preferred_element_type=f32)
  p = jnp.maximum(acc + pred_b_ref[...], 0.0)                           # (M, PRED_C)

  # ---- 1x1 head -> log-softmax (gaze density) + sigmoid (awareness) --------
  # Heads computed as W @ p_b^T so the spatial axis (softmax axis) lies on
  # lanes; packed output row = [log_gaze(0:S) | awareness(S:2S)] = 2*S lanes.
  head_wg = head_wg_ref[...]     # (L, PRED_C)
  head_bg = head_bg_ref[...]     # (L, 1)
  head_wa = head_wa_ref[...]     # (L, PRED_C)
  head_ba = head_ba_ref[...]     # (L, 1)
  for b in range(B):
    p_b = p[b * S:(b + 1) * S, :]                                       # (S, PRED_C)
    gz = lax.dot_general(head_wg, p_b, dimension_numbers=nt_dims,
                         preferred_element_type=f32) + head_bg          # (L, S)
    aw = lax.dot_general(head_wa, p_b, dimension_numbers=nt_dims,
                         preferred_element_type=f32) + head_ba          # (L, S)
    m = jnp.max(gz, axis=-1, keepdims=True)
    z = gz - m
    lse = jnp.log(jnp.sum(jnp.exp(z), axis=-1, keepdims=True))
    heads_ref[b * L:(b + 1) * L, 0:S] = z - lse
    heads_ref[b * L:(b + 1) * L, S:2 * S] = 1.0 / (1.0 + jnp.exp(-aw))


# ----------------------------------------------------------------------------
# Wrapper-side glue
# ----------------------------------------------------------------------------
def _im2col(x, kh, kw, stride, pad):
  """NHWC im2col (used only for the stride-2 first conv)."""
  B, H, W, C = x.shape
  xp = jnp.pad(x, ((0, 0), (pad, pad), (pad, pad), (0, 0)))
  Hp, Wp = H + 2 * pad, W + 2 * pad
  Ho = (Hp - kh) // stride + 1
  Wo = (Wp - kw) // stride + 1
  cols = []
  for i in range(kh):
    for j in range(kw):
      cols.append(xp[:, i:i + (Ho - 1) * stride + 1:stride,
                     j:j + (Wo - 1) * stride + 1:stride, :])
  patches = jnp.concatenate(cols, axis=-1)            # (B, Ho, Wo, kh*kw*C)
  return patches.reshape(B * Ho * Wo, kh * kw * C), (Ho, Wo)


def init_params(key):
  """Deterministic synthetic weights (no checkpoint available)."""
  ks = jax.random.split(key, 10)

  def w_init(k, shape, fan_in):
    return jax.random.normal(k, shape, jnp.float32) / jnp.sqrt(jnp.float32(fan_in))

  p = {}
  # FusionNet road_facing encoder: 16x16 -> 8x8 (aspect reduction 2.0)
  enc1 = w_init(ks[0], (CONV1_K, ENC1_C), CONV1_K)
  p["enc1_w"] = jnp.pad(enc1, ((0, CONV1_K_PAD - CONV1_K), (0, 0)))   # K 27 -> 32
  p["enc1_b"] = jnp.zeros((1, ENC1_C), jnp.float32)
  p["enc2_w"] = w_init(ks[1], (9, ENC1_C, ENC2_C), 9 * ENC1_C)        # per-tap slabs
  p["enc2_b"] = jnp.zeros((1, ENC2_C), jnp.float32)
  # driver_facing side-channel MLP on gaze
  p["sc_fc1_w"] = w_init(ks[2], (2, SC_HIDDEN), 2)
  p["sc_fc1_b"] = jnp.zeros((1, SC_HIDDEN), jnp.float32)
  p["sc_fc2_w"] = w_init(ks[3], (SC_HIDDEN, SC_C), SC_HIDDEN)
  p["sc_fc2_b"] = jnp.zeros((1, SC_C), jnp.float32)
  # decoder: 3x3 conv over encoder features + additive side-channel fusion
  p["dec_wh"] = w_init(ks[4], (9, ENC2_C, DEC_C), 9 * ENC2_C)
  p["dec_wsc"] = w_init(ks[5], (SC_C, DEC_C), SC_C)
  p["dec_b"] = jnp.zeros((1, DEC_C), jnp.float32)
  # MaadPredictor
  p["pred_w"] = w_init(ks[6], (9, DEC_C, PRED_C), 9 * DEC_C)
  p["pred_b"] = jnp.zeros((1, PRED_C), jnp.float32)
  p["head_wg"] = w_init(ks[7], (NUM_LATENT_LAYERS, PRED_C), PRED_C)    # gaze head
  p["head_bg"] = jnp.zeros((NUM_LATENT_LAYERS, 1), jnp.float32)
  p["head_wa"] = w_init(ks[8], (NUM_LATENT_LAYERS, PRED_C), PRED_C)    # awareness head
  p["head_ba"] = jnp.zeros((NUM_LATENT_LAYERS, 1), jnp.float32)
  # GazeTransform: identity affine, scale_factor = 1.0
  p["gaze_w"] = jnp.eye(2, dtype=jnp.float32)
  p["gaze_b"] = jnp.zeros((1, 2), jnp.float32)
  return p


def maadnet_forward(params, batch_input,
                    should_drop_indices_dict=None,
                    should_drop_entire_channel_dict=None):
  # road image normalization (NCHW input, PyTorch convention)
  road_image = batch_input["road_image"].astype(jnp.float32) / 255.0
  road_nhwc = jnp.transpose(road_image, (0, 2, 3, 1))                  # -> NHWC
  B = road_nhwc.shape[0]

  gaze = batch_input["normalized_input_gaze"].astype(jnp.float32)      # (B, T, 2)
  should_train = batch_input["should_train_input_gaze"].astype(jnp.float32)
  T = gaze.shape[1]

  # stride-2 first conv: wrapper-side im2col (raw image comes from HBM anyway)
  patches, (Ho, Wo) = _im2col(road_nhwc, 3, 3, 2, 1)                   # (B*Ho*Wo, 27)
  patches = jnp.pad(patches, ((0, 0), (0, CONV1_K_PAD - CONV1_K)))     # K -> 32

  L = NUM_LATENT_LAYERS
  S = Ho * Wo
  M = B * S

  gaze_flat = gaze.reshape(B * T, 2)
  mask_flat = should_train.reshape(B * T, 1)
  avg_mat = jnp.kron(jnp.eye(B, dtype=jnp.float32),
                     jnp.full((1, T), 1.0 / T, jnp.float32))           # (B, B*T)
  sel_mat = jnp.repeat(jnp.eye(B, dtype=jnp.float32), S, axis=0)       # (M, B)

  kernel = functools.partial(_maadnet_fused_kernel, B=B, Ho=Ho, Wo=Wo, L=L)
  heads, road_flat, sc = pl.pallas_call(
      kernel,
      out_shape=(
          jax.ShapeDtypeStruct((B * L, 2 * S), jnp.float32),   # [log_gaze | awareness]
          jax.ShapeDtypeStruct((M, DEC_C), jnp.float32),       # road_facing features
          jax.ShapeDtypeStruct((B, SC_C), jnp.float32),        # side-channel embedding
      ),
      scratch_shapes=[
          pltpu.VMEM((B, Ho + 2, Wo + 2, ENC1_C), jnp.float32),
          pltpu.VMEM((B, Ho + 2, Wo + 2, ENC2_C), jnp.float32),
      ],
  )(patches, gaze_flat, mask_flat, avg_mat, sel_mat,
    params["gaze_w"], params["gaze_b"],
    params["enc1_w"], params["enc1_b"],
    params["enc2_w"], params["enc2_b"],
    params["sc_fc1_w"], params["sc_fc1_b"],
    params["sc_fc2_w"], params["sc_fc2_b"],
    params["dec_wh"], params["dec_wsc"], params["dec_b"],
    params["pred_w"], params["pred_b"],
    params["head_wg"], params["head_bg"], params["head_wa"], params["head_ba"])

  gaze_map = heads[:, :S].reshape(B, L, Ho, Wo)
  aware_map = heads[:, S:].reshape(B, L, Ho, Wo)
  road_facing = jnp.transpose(road_flat.reshape(B, Ho, Wo, DEC_C), (0, 3, 1, 2))

  maad_output = collections.OrderedDict(
      log_gaze_density_map=gaze_map,
      awareness_map=aware_map,
  )
  fusion_output = collections.OrderedDict(road_facing=road_facing)       # NCHW
  side_channel_output = collections.OrderedDict(driver_facing=sc)
  should_drop_dicts = (should_drop_indices_dict, should_drop_entire_channel_dict)
  # TODO(synk): NaN-check IPython.embed hooks, 'no_detach_gaze'/detach autograd
  # semantics and side-channel dropout (should_drop_* handling) are
  # debug/training-time behaviour and are not reproduced.
  return maad_output, fusion_output, side_channel_output, should_drop_dicts


# ----------------------------------------------------------------------------
if __name__ == "__main__":
  key = jax.random.PRNGKey(0)
  kp, k1, k2 = jax.random.split(key, 3)
  params = init_params(kp)

  B, T = 2, 4
  batch_input = {
      "road_image": jax.random.uniform(
          k1, (B,) + ORIG_ROAD_IMG_DIMS, jnp.float32, 0.0, 255.0),   # NCHW
      "normalized_input_gaze": jax.random.uniform(k2, (B, T, 2), jnp.float32),
      "should_train_input_gaze": jnp.ones((B, T, 1), jnp.float32),
  }

  maad_out, fusion_out, sc_out, drop_dicts = maadnet_forward(params, batch_input)

  gaze_map = jax.block_until_ready(maad_out["log_gaze_density_map"])
  aware_map = jax.block_until_ready(maad_out["awareness_map"])
  road_facing = jax.block_until_ready(fusion_out["road_facing"])
  sc = jax.block_until_ready(sc_out["driver_facing"])

  assert gaze_map.shape == (B, NUM_LATENT_LAYERS, NETWORK_OUT_H, NETWORK_OUT_W)
  assert aware_map.shape == (B, NUM_LATENT_LAYERS, NETWORK_OUT_H, NETWORK_OUT_W)
  assert road_facing.shape == (B, DEC_C, NETWORK_OUT_H, NETWORK_OUT_W)
  assert sc.shape == (B, SC_C)
  # sanity: log-softmax exponentiates-and-sums to 1 over space; sigmoid in [0,1]
  spatial_sums = jnp.exp(gaze_map).sum(axis=(-2, -1))
  assert bool(jnp.allclose(spatial_sums, 1.0, atol=1e-4))
  assert bool(jnp.all((aware_map >= 0.0) & (aware_map <= 1.0)))
  assert bool(jnp.all(jnp.isfinite(road_facing)))
  print("KERNEL_OK")
</pallas_src>

<mosaic_0001>
module attributes {stable_mosaic.version = 11 : i64} {
  func.func @_maadnet_fused_kernel(%arg0: memref<128x32xf32, #tpu.memory_space<vmem>>, %arg1: memref<8x2xf32, #tpu.memory_space<vmem>>, %arg2: memref<8x1xf32, #tpu.memory_space<vmem>>, %arg3: memref<2x8xf32, #tpu.memory_space<vmem>>, %arg4: memref<128x2xf32, #tpu.memory_space<vmem>>, %arg5: memref<2x2xf32, #tpu.memory_space<vmem>>, %arg6: memref<1x2xf32, #tpu.memory_space<vmem>>, %arg7: memref<32x8xf32, #tpu.memory_space<vmem>>, %arg8: memref<1x8xf32, #tpu.memory_space<vmem>>, %arg9: memref<9x8x16xf32, #tpu.memory_space<vmem>>, %arg10: memref<1x16xf32, #tpu.memory_space<vmem>>, %arg11: memref<2x16xf32, #tpu.memory_space<vmem>>, %arg12: memref<1x16xf32, #tpu.memory_space<vmem>>, %arg13: memref<16x8xf32, #tpu.memory_space<vmem>>, %arg14: memref<1x8xf32, #tpu.memory_space<vmem>>, %arg15: memref<9x16x16xf32, #tpu.memory_space<vmem>>, %arg16: memref<8x16xf32, #tpu.memory_space<vmem>>, %arg17: memref<1x16xf32, #tpu.memory_space<vmem>>, %arg18: memref<9x16x16xf32, #tpu.memory_space<vmem>>, %arg19: memref<1x16xf32, #tpu.memory_space<vmem>>, %arg20: memref<6x16xf32, #tpu.memory_space<vmem>>, %arg21: memref<6x1xf32, #tpu.memory_space<vmem>>, %arg22: memref<6x16xf32, #tpu.memory_space<vmem>>, %arg23: memref<6x1xf32, #tpu.memory_space<vmem>>, %arg24: memref<12x128xf32, #tpu.memory_space<vmem>>, %arg25: memref<128x16xf32, #tpu.memory_space<vmem>>, %arg26: memref<2x8xf32, #tpu.memory_space<vmem>>, %arg27: memref<2x10x10x8xf32, #tpu.memory_space<vmem>>, %arg28: memref<2x10x10x16xf32, #tpu.memory_space<vmem>>) attributes {dimension_semantics = [], scalar_prefetch = 0 : i64, scratch_operands = 2 : i64, tpu.core_type = #tpu.core_type<tc>} {
    %c0 = arith.constant 0 : index
    %c0_0 = arith.constant 0 : index
    %0 = vector.load %arg1[%c0, %c0_0] : memref<8x2xf32, #tpu.memory_space<vmem>>, vector<8x2xf32>
    %c0_1 = arith.constant 0 : index
    %c0_2 = arith.constant 0 : index
    %1 = vector.load %arg5[%c0_1, %c0_2] : memref<2x2xf32, #tpu.memory_space<vmem>>, vector<2x2xf32>
    %cst = arith.constant dense<0.000000e+00> : vector<8x2xf32>
    %2 = tpu.matmul %0, %1, %cst {dimension_numbers = #tpu.dot_dimension_numbers<[1], [0], [0], [1], [0, 0, 1, 1], [], []>} : vector<8x2xf32>, vector<2x2xf32>, vector<8x2xf32> -> vector<8x2xf32>
    %c0_3 = arith.constant 0 : index
    %c0_4 = arith.constant 0 : index
    %3 = vector.load %arg6[%c0_3, %c0_4] : memref<1x2xf32, #tpu.memory_space<vmem>>, vector<1x2xf32>
    %4 = vector.broadcast %3 : vector<1x2xf32> to vector<8x2xf32>
    %5 = arith.addf %2, %4 : vector<8x2xf32>
    %c0_5 = arith.constant 0 : index
    %c0_6 = arith.constant 0 : index
    %6 = vector.load %arg2[%c0_5, %c0_6] : memref<8x1xf32, #tpu.memory_space<vmem>>, vector<8x1xf32>
    %cst_7 = arith.constant 5.000000e-01 : f32
    %7 = vector.broadcast %cst_7 : f32 to vector<8x1xf32>
    %8 = arith.cmpf ogt, %6, %7 : vector<8x1xf32>
    %9 = vector.shape_cast %8 : vector<8x1xi1> to vector<8x1xi1>
    %10 = vector.broadcast %9 : vector<8x1xi1> to vector<8x2xi1>
    %11 = arith.select %10, %5, %0 : vector<8x2xi1>, vector<8x2xf32>
    %c0_8 = arith.constant 0 : index
    %c0_9 = arith.constant 0 : index
    %12 = vector.load %arg3[%c0_8, %c0_9] : memref<2x8xf32, #tpu.memory_space<vmem>>, vector<2x8xf32>
    %cst_10 = arith.constant dense<0.000000e+00> : vector<2x2xf32>
    %13 = tpu.matmul %12, %11, %cst_10 {dimension_numbers = #tpu.dot_dimension_numbers<[1], [0], [0], [1], [0, 0, 1, 1], [], []>} : vector<2x8xf32>, vector<8x2xf32>, vector<2x2xf32> -> vector<2x2xf32>
    %c0_11 = arith.constant 0 : index
    %c0_12 = arith.constant 0 : index
    %14 = vector.load %arg11[%c0_11, %c0_12] : memref<2x16xf32, #tpu.memory_space<vmem>>, vector<2x16xf32>
    %cst_13 = arith.constant dense<0.000000e+00> : vector<2x16xf32>
    %15 = tpu.matmul %13, %14, %cst_13 {dimension_numbers = #tpu.dot_dimension_numbers<[1], [0], [0], [1], [0, 0, 1, 1], [], []>} : vector<2x2xf32>, vector<2x16xf32>, vector<2x16xf32> -> vector<2x16xf32>
    %c0_14 = arith.constant 0 : index
    %c0_15 = arith.constant 0 : index
    %16 = vector.load %arg12[%c0_14, %c0_15] : memref<1x16xf32, #tpu.memory_space<vmem>>, vector<1x16xf32>
    %17 = vector.broadcast %16 : vector<1x16xf32> to vector<2x16xf32>
    %18 = arith.addf %15, %17 : vector<2x16xf32>
    %cst_16 = arith.constant 0.000000e+00 : f32
    %19 = vector.broadcast %cst_16 : f32 to vector<2x16xf32>
    %20 = arith.maximumf %18, %19 : vector<2x16xf32>
    %c0_17 = arith.constant 0 : index
    %c0_18 = arith.constant 0 : index
    %21 = vector.load %arg13[%c0_17, %c0_18] : memref<16x8xf32, #tpu.memory_space<vmem>>, vector<16x8xf32>
    %cst_19 = arith.constant dense<0.000000e+00> : vector<2x8xf32>
    %22 = tpu.matmul %20, %21, %cst_19 {dimension_numbers = #tpu.dot_dimension_numbers<[1], [0], [0], [1], [0, 0, 1, 1], [], []>} : vector<2x16xf32>, vector<16x8xf32>, vector<2x8xf32> -> vector<2x8xf32>
    %c0_20 = arith.constant 0 : index
    %c0_21 = arith.constant 0 : index
    %23 = vector.load %arg14[%c0_20, %c0_21] : memref<1x8xf32, #tpu.memory_space<vmem>>, vector<1x8xf32>
    %24 = vector.broadcast %23 : vector<1x8xf32> to vector<2x8xf32>
    %25 = arith.addf %22, %24 : vector<2x8xf32>
    %c0_22 = arith.constant 0 : index
    %c0_23 = arith.constant 0 : index
    %26 = vector.load %arg26[%c0_22, %c0_23] : memref<2x8xf32, #tpu.memory_space<vmem>>, vector<2x8xf32>
    tpu.vector_store %arg26[%c0_22, %c0_23], %25 {strides = array<i32>} : memref<2x8xf32, #tpu.memory_space<vmem>>, vector<2x8xf32>,
    %c0_24 = arith.constant 0 : index
    %c0_25 = arith.constant 0 : index
    %27 = vector.load %arg0[%c0_24, %c0_25] : memref<128x32xf32, #tpu.memory_space<vmem>>, vector<128x32xf32>
    %c0_26 = arith.constant 0 : index
    %c0_27 = arith.constant 0 : index
    %28 = vector.load %arg7[%c0_26, %c0_27] : memref<32x8xf32, #tpu.memory_space<vmem>>, vector<32x8xf32>
    %cst_28 = arith.constant dense<0.000000e+00> : vector<128x8xf32>
    %29 = tpu.matmul %27, %28, %cst_28 {dimension_numbers = #tpu.dot_dimension_numbers<[1], [0], [0], [1], [0, 0, 1, 1], [], []>} : vector<128x32xf32>, vector<32x8xf32>, vector<128x8xf32> -> vector<128x8xf32>
    %c0_29 = arith.constant 0 : index
    %c0_30 = arith.constant 0 : index
    %30 = vector.load %arg8[%c0_29, %c0_30] : memref<1x8xf32, #tpu.memory_space<vmem>>, vector<1x8xf32>
    %31 = vector.broadcast %30 : vector<1x8xf32> to vector<128x8xf32>
    %32 = arith.addf %29, %31 : vector<128x8xf32>
    %cst_31 = arith.constant 0.000000e+00 : f32
    %33 = vector.broadcast %cst_31 : f32 to vector<128x8xf32>
    %34 = arith.maximumf %32, %33 : vector<128x8xf32>
    %cst_32 = arith.constant 0.000000e+00 : f32
    %35 = vector.broadcast %cst_32 : f32 to vector<2x10x10x8xf32>
    %c0_33 = arith.constant 0 : index
    %c0_34 = arith.constant 0 : index
    %c0_35 = arith.constant 0 : index
    %c0_36 = arith.constant 0 : index
    %36 = vector.load %arg27[%c0_33, %c0_34, %c0_35, %c0_36] : memref<2x10x10x8xf32, #tpu.memory_space<vmem>>, vector<2x10x10x8xf32>
    tpu.vector_store %arg27[%c0_33, %c0_34, %c0_35, %c0_36], %35 {strides = array<i32>} : memref<2x10x10x8xf32, #tpu.memory_space<vmem>>, vector<2x10x10x8xf32>,
    %37 = vector.shape_cast %34 : vector<128x8xf32> to vector<2x8x8x8xf32>
    %c0_37 = arith.constant 0 : index
    %c1 = arith.constant 1 : index
    %c1_38 = arith.constant 1 : index
    %c0_39 = arith.constant 0 : index
    %38 = vector.load %arg27[%c0_37, %c1, %c1_38, %c0_39] : memref<2x10x10x8xf32, #tpu.memory_space<vmem>>, vector<2x8x8x8xf32>
    tpu.vector_store %arg27[%c0_37, %c1, %c1_38, %c0_39], %37 {strides = array<i32>} : memref<2x10x10x8xf32, #tpu.memory_space<vmem>>, vector<2x8x8x8xf32>,
    %cst_40 = arith.constant 0.000000e+00 : f32
    %39 = vector.broadcast %cst_40 : f32 to vector<128x16xf32>
    %c0_41 = arith.constant 0 : index
    %c0_42 = arith.constant 0 : index
    %c0_43 = arith.constant 0 : index
    %c0_44 = arith.constant 0 : index
    %40 = vector.load %arg27[%c0_41, %c0_42, %c0_43, %c0_44] : memref<2x10x10x8xf32, #tpu.memory_space<vmem>>, vector<2x8x8x8xf32>
    %41 = vector.shape_cast %40 : vector<2x8x8x8xf32> to vector<128x8xf32>
    %c0_45 = arith.constant 0 : index
    %c0_46 = arith.constant 0 : index
    %c0_47 = arith.constant 0 : index
    %42 = vector.load %arg9[%c0_45, %c0_46, %c0_47] : memref<9x8x16xf32, #tpu.memory_space<vmem>>, vector<1x8x16xf32>
    %43 = vector.shape_cast %42 : vector<1x8x16xf32> to vector<8x16xf32>
    %cst_48 = arith.constant dense<0.000000e+00> : vector<128x16xf32>
    %44 = tpu.matmul %41, %43, %cst_48 {dimension_numbers = #tpu.dot_dimension_numbers<[1], [0], [0], [1], [0, 0, 1, 1], [], []>} : vector<128x8xf32>, vector<8x16xf32>, vector<128x16xf32> -> vector<128x16xf32>
    %45 = arith.addf %39, %44 : vector<128x16xf32>
    %c0_49 = arith.constant 0 : index
    %c0_50 = arith.constant 0 : index
    %c1_51 = arith.constant 1 : index
    %c0_52 = arith.constant 0 : index
    %46 = vector.load %arg27[%c0_49, %c0_50, %c1_51, %c0_52] : memref<2x10x10x8xf32, #tpu.memory_space<vmem>>, vector<2x8x8x8xf32>
    %47 = vector.shape_cast %46 : vector<2x8x8x8xf32> to vector<128x8xf32>
    %c1_53 = arith.constant 1 : index
    %c0_54 = arith.constant 0 : index
    %c0_55 = arith.constant 0 : index
    %48 = vector.load %arg9[%c1_53, %c0_54, %c0_55] : memref<9x8x16xf32, #tpu.memory_space<vmem>>, vector<1x8x16xf32>
    %49 = vector.shape_cast %48 : vector<1x8x16xf32> to vector<8x16xf32>
    %cst_56 = arith.constant dense<0.000000e+00> : vector<128x16xf32>
    %50 = tpu.matmul %47, %49, %cst_56 {dimension_numbers = #tpu.dot_dimension_numbers<[1], [0], [0], [1], [0, 0, 1, 1], [], []>} : vector<128x8xf32>, vector<8x16xf32>, vector<128x16xf32> -> vector<128x16xf32>
    %51 = arith.addf %45, %50 : vector<128x16xf32>
    %c0_57 = arith.constant 0 : index
    %c0_58 = arith.constant 0 : index
    %c2 = arith.constant 2 : index
    %c0_59 = arith.constant 0 : index
    %52 = vector.load %arg27[%c0_57, %c0_58, %c2, %c0_59] : memref<2x10x10x8xf32, #tpu.memory_space<vmem>>, vector<2x8x8x8xf32>
    %53 = vector.shape_cast %52 : vector<2x8x8x8xf32> to vector<128x8xf32>
    %c2_60 = arith.constant 2 : index
    %c0_61 = arith.constant 0 : index
    %c0_62 = arith.constant 0 : index
    %54 = vector.load %arg9[%c2_60, %c0_61, %c0_62] : memref<9x8x16xf32, #tpu.memory_space<vmem>>, vector<1x8x16xf32>
    %55 = vector.shape_cast %54 : vector<1x8x16xf32> to vector<8x16xf32>
    %cst_63 = arith.constant dense<0.000000e+00> : vector<128x16xf32>
    %56 = tpu.matmul %53, %55, %cst_63 {dimension_numbers = #tpu.dot_dimension_numbers<[1], [0], [0], [1], [0, 0, 1, 1], [], []>} : vector<128x8xf32>, vector<8x16xf32>, vector<128x16xf32> -> vector<128x16xf32>
    %57 = arith.addf %51, %56 : vector<128x16xf32>
    %c0_64 = arith.constant 0 : index
    %c1_65 = arith.constant 1 : index
    %c0_66 = arith.constant 0 : index
    %c0_67 = arith.constant 0 : index
    %58 = vector.load %arg27[%c0_64, %c1_65, %c0_66, %c0_67] : memref<2x10x10x8xf32, #tpu.memory_space<vmem>>, vector<2x8x8x8xf32>
    %59 = vector.shape_cast %58 : vector<2x8x8x8xf32> to vector<128x8xf32>
    %c3 = arith.constant 3 : index
    %c0_68 = arith.constant 0 : index
    %c0_69 = arith.constant 0 : index
    %60 = vector.load %arg9[%c3, %c0_68, %c0_69] : memref<9x8x16xf32, #tpu.memory_space<vmem>>, vector<1x8x16xf32>
    %61 = vector.shape_cast %60 : vector<1x8x16xf32> to vector<8x16xf32>
    %cst_70 = arith.constant dense<0.000000e+00> : vector<128x16xf32>
    %62 = tpu.matmul %59, %61, %cst_70 {dimension_numbers = #tpu.dot_dimension_numbers<[1], [0], [0], [1], [0, 0, 1, 1], [], []>} : vector<128x8xf32>, vector<8x16xf32>, vector<128x16xf32> -> vector<128x16xf32>
    %63 = arith.addf %57, %62 : vector<128x16xf32>
    %c0_71 = arith.constant 0 : index
    %c1_72 = arith.constant 1 : index
    %c1_73 = arith.constant 1 : index
    %c0_74 = arith.constant 0 : index
    %64 = vector.load %arg27[%c0_71, %c1_72, %c1_73, %c0_74] : memref<2x10x10x8xf32, #tpu.memory_space<vmem>>, vector<2x8x8x8xf32>
    %65 = vector.shape_cast %64 : vector<2x8x8x8xf32> to vector<128x8xf32>
    %c4 = arith.constant 4 : index
    %c0_75 = arith.constant 0 : index
    %c0_76 = arith.constant 0 : index
    %66 = vector.load %arg9[%c4, %c0_75, %c0_76] : memref<9x8x16xf32, #tpu.memory_space<vmem>>, vector<1x8x16xf32>
    %67 = vector.shape_cast %66 : vector<1x8x16xf32> to vector<8x16xf32>
    %cst_77 = arith.constant dense<0.000000e+00> : vector<128x16xf32>
    %68 = tpu.matmul %65, %67, %cst_77 {dimension_numbers = #tpu.dot_dimension_numbers<[1], [0], [0], [1], [0, 0, 1, 1], [], []>} : vector<128x8xf32>, vector<8x16xf32>, vector<128x16xf32> -> vector<128x16xf32>
    %69 = arith.addf %63, %68 : vector<128x16xf32>
    %c0_78 = arith.constant 0 : index
    %c1_79 = arith.constant 1 : index
    %c2_80 = arith.constant 2 : index
    %c0_81 = arith.constant 0 : index
    %70 = vector.load %arg27[%c0_78, %c1_79, %c2_80, %c0_81] : memref<2x10x10x8xf32, #tpu.memory_space<vmem>>, vector<2x8x8x8xf32>
    %71 = vector.shape_cast %70 : vector<2x8x8x8xf32> to vector<128x8xf32>
    %c5 = arith.constant 5 : index
    %c0_82 = arith.constant 0 : index
    %c0_83 = arith.constant 0 : index
    %72 = vector.load %arg9[%c5, %c0_82, %c0_83] : memref<9x8x16xf32, #tpu.memory_space<vmem>>, vector<1x8x16xf32>
    %73 = vector.shape_cast %72 : vector<1x8x16xf32> to vector<8x16xf32>
    %cst_84 = arith.constant dense<0.000000e+00> : vector<128x16xf32>
    %74 = tpu.matmul %71, %73, %cst_84 {dimension_numbers = #tpu.dot_dimension_numbers<[1], [0], [0], [1], [0, 0, 1, 1], [], []>} : vector<128x8xf32>, vector<8x16xf32>, vector<128x16xf32> -> vector<128x16xf32>
    %75 = arith.addf %69, %74 : vector<128x16xf32>
    %c0_85 = arith.constant 0 : index
    %c2_86 = arith.constant 2 : index
    %c0_87 = arith.constant 0 : index
    %c0_88 = arith.constant 0 : index
    %76 = vector.load %arg27[%c0_85, %c2_86, %c0_87, %c0_88] : memref<2x10x10x8xf32, #tpu.memory_space<vmem>>, vector<2x8x8x8xf32>
    %77 = vector.shape_cast %76 : vector<2x8x8x8xf32> to vector<128x8xf32>
    %c6 = arith.constant 6 : index
    %c0_89 = arith.constant 0 : index
    %c0_90 = arith.constant 0 : index
    %78 = vector.load %arg9[%c6, %c0_89, %c0_90] : memref<9x8x16xf32, #tpu.memory_space<vmem>>, vector<1x8x16xf32>
    %79 = vector.shape_cast %78 : vector<1x8x16xf32> to vector<8x16xf32>
    %cst_91 = arith.constant dense<0.000000e+00> : vector<128x16xf32>
    %80 = tpu.matmul %77, %79, %cst_91 {dimension_numbers = #tpu.dot_dimension_numbers<[1], [0], [0], [1], [0, 0, 1, 1], [], []>} : vector<128x8xf32>, vector<8x16xf32>, vector<128x16xf32> -> vector<128x16xf32>
    %81 = arith.addf %75, %80 : vector<128x16xf32>
    %c0_92 = arith.constant 0 : index
    %c2_93 = arith.constant 2 : index
    %c1_94 = arith.constant 1 : index
    %c0_95 = arith.constant 0 : index
    %82 = vector.load %arg27[%c0_92, %c2_93, %c1_94, %c0_95] : memref<2x10x10x8xf32, #tpu.memory_space<vmem>>, vector<2x8x8x8xf32>
    %83 = vector.shape_cast %82 : vector<2x8x8x8xf32> to vector<128x8xf32>
    %c7 = arith.constant 7 : index
    %c0_96 = arith.constant 0 : index
    %c0_97 = arith.constant 0 : index
    %84 = vector.load %arg9[%c7, %c0_96, %c0_97] : memref<9x8x16xf32, #tpu.memory_space<vmem>>, vector<1x8x16xf32>
    %85 = vector.shape_cast %84 : vector<1x8x16xf32> to vector<8x16xf32>
    %cst_98 = arith.constant dense<0.000000e+00> : vector<128x16xf32>
    %86 = tpu.matmul %83, %85, %cst_98 {dimension_numbers = #tpu.dot_dimension_numbers<[1], [0], [0], [1], [0, 0, 1, 1], [], []>} : vector<128x8xf32>, vector<8x16xf32>, vector<128x16xf32> -> vector<128x16xf32>
    %87 = arith.addf %81, %86 : vector<128x16xf32>
    %c0_99 = arith.constant 0 : index
    %c2_100 = arith.constant 2 : index
    %c2_101 = arith.constant 2 : index
    %c0_102 = arith.constant 0 : index
    %88 = vector.load %arg27[%c0_99, %c2_100, %c2_101, %c0_102] : memref<2x10x10x8xf32, #tpu.memory_space<vmem>>, vector<2x8x8x8xf32>
    %89 = vector.shape_cast %88 : vector<2x8x8x8xf32> to vector<128x8xf32>
    %c8 = arith.constant 8 : index
    %c0_103 = arith.constant 0 : index
    %c0_104 = arith.constant 0 : index
    %90 = vector.load %arg9[%c8, %c0_103, %c0_104] : memref<9x8x16xf32, #tpu.memory_space<vmem>>, vector<1x8x16xf32>
    %91 = vector.shape_cast %90 : vector<1x8x16xf32> to vector<8x16xf32>
    %cst_105 = arith.constant dense<0.000000e+00> : vector<128x16xf32>
    %92 = tpu.matmul %89, %91, %cst_105 {dimension_numbers = #tpu.dot_dimension_numbers<[1], [0], [0], [1], [0, 0, 1, 1], [], []>} : vector<128x8xf32>, vector<8x16xf32>, vector<128x16xf32> -> vector<128x16xf32>
    %93 = arith.addf %87, %92 : vector<128x16xf32>
    %c0_106 = arith.constant 0 : index
    %c0_107 = arith.constant 0 : index
    %94 = vector.load %arg10[%c0_106, %c0_107] : memref<1x16xf32, #tpu.memory_space<vmem>>, vector<1x16xf32>
    %95 = vector.broadcast %94 : vector<1x16xf32> to vector<128x16xf32>
    %96 = arith.addf %93, %95 : vector<128x16xf32>
    %cst_108 = arith.constant 0.000000e+00 : f32
    %97 = vector.broadcast %cst_108 : f32 to vector<128x16xf32>
    %98 = arith.maximumf %96, %97 : vector<128x16xf32>
    %cst_109 = arith.constant 0.000000e+00 : f32
    %99 = vector.broadcast %cst_109 : f32 to vector<2x10x10x16xf32>
    %c0_110 = arith.constant 0 : index
    %c0_111 = arith.constant 0 : index
    %c0_112 = arith.constant 0 : index
    %c0_113 = arith.constant 0 : index
    %100 = vector.load %arg28[%c0_110, %c0_111, %c0_112, %c0_113] : memref<2x10x10x16xf32, #tpu.memory_space<vmem>>, vector<2x10x10x16xf32>
    tpu.vector_store %arg28[%c0_110, %c0_111, %c0_112, %c0_113], %99 {strides = array<i32>} : memref<2x10x10x16xf32, #tpu.memory_space<vmem>>, vector<2x10x10x16xf32>,
    %101 = vector.shape_cast %98 : vector<128x16xf32> to vector<2x8x8x16xf32>
    %c0_114 = arith.constant 0 : index
    %c1_115 = arith.constant 1 : index
    %c1_116 = arith.constant 1 : index
    %c0_117 = arith.constant 0 : index
    %102 = vector.load %arg28[%c0_114, %c1_115, %c1_116, %c0_117] : memref<2x10x10x16xf32, #tpu.memory_space<vmem>>, vector<2x8x8x16xf32>
    tpu.vector_store %arg28[%c0_114, %c1_115, %c1_116, %c0_117], %101 {strides = array<i32>} : memref<2x10x10x16xf32, #tpu.memory_space<vmem>>, vector<2x8x8x16xf32>,
    %cst_118 = arith.constant 0.000000e+00 : f32
    %103 = vector.broadcast %cst_118 : f32 to vector<128x16xf32>
    %c0_119 = arith.constant 0 : index
    %c0_120 = arith.constant 0 : index
    %c0_121 = arith.constant 0 : index
    %c0_122 = arith.constant 0 : index
    %104 = vector.load %arg28[%c0_119, %c0_120, %c0_121, %c0_122] : memref<2x10x10x16xf32, #tpu.memory_space<vmem>>, vector<2x8x8x16xf32>
    %105 = vector.shape_cast %104 : vector<2x8x8x16xf32> to vector<128x16xf32>
    %c0_123 = arith.constant 0 : index
    %c0_124 = arith.constant 0 : index
    %c0_125 = arith.constant 0 : index
    %106 = vector.load %arg15[%c0_123, %c0_124, %c0_125] : memref<9x16x16xf32, #tpu.memory_space<vmem>>, vector<1x16x16xf32>
    %107 = vector.shape_cast %106 : vector<1x16x16xf32> to vector<16x16xf32>
    %cst_126 = arith.constant dense<0.000000e+00> : vector<128x16xf32>
    %108 = tpu.matmul %105, %107, %cst_126 {dimension_numbers = #tpu.dot_dimension_numbers<[1], [0], [0], [1], [0, 0, 1, 1], [], []>} : vector<128x16xf32>, vector<16x16xf32>, vector<128x16xf32> -> vector<128x16xf32>
    %109 = arith.addf %103, %108 : vector<128x16xf32>
    %c0_127 = arith.constant 0 : index
    %c0_128 = arith.constant 0 : index
    %c1_129 = arith.constant 1 : index
    %c0_130 = arith.constant 0 : index
    %110 = vector.load %arg28[%c0_127, %c0_128, %c1_129, %c0_130] : memref<2x10x10x16xf32, #tpu.memory_space<vmem>>, vector<2x8x8x16xf32>
    %111 = vector.shape_cast %110 : vector<2x8x8x16xf32> to vector<128x16xf32>
    %c1_131 = arith.constant 1 : index
    %c0_132 = arith.constant 0 : index
    %c0_133 = arith.constant 0 : index
    %112 = vector.load %arg15[%c1_131, %c0_132, %c0_133] : memref<9x16x16xf32, #tpu.memory_space<vmem>>, vector<1x16x16xf32>
    %113 = vector.shape_cast %112 : vector<1x16x16xf32> to vector<16x16xf32>
    %cst_134 = arith.constant dense<0.000000e+00> : vector<128x16xf32>
    %114 = tpu.matmul %111, %113, %cst_134 {dimension_numbers = #tpu.dot_dimension_numbers<[1], [0], [0], [1], [0, 0, 1, 1], [], []>} : vector<128x16xf32>, vector<16x16xf32>, vector<128x16xf32> -> vector<128x16xf32>
    %115 = arith.addf %109, %114 : vector<128x16xf32>
    %c0_135 = arith.constant 0 : index
    %c0_136 = arith.constant 0 : index
    %c2_137 = arith.constant 2 : index
    %c0_138 = arith.constant 0 : index
    %116 = vector.load %arg28[%c0_135, %c0_136, %c2_137, %c0_138] : memref<2x10x10x16xf32, #tpu.memory_space<vmem>>, vector<2x8x8x16xf32>
    %117 = vector.shape_cast %116 : vector<2x8x8x16xf32> to vector<128x16xf32>
    %c2_139 = arith.constant 2 : index
    %c0_140 = arith.constant 0 : index
    %c0_141 = arith.constant 0 : index
    %118 = vector.load %arg15[%c2_139, %c0_140, %c0_141] : memref<9x16x16xf32, #tpu.memory_space<vmem>>, vector<1x16x16xf32>
    %119 = vector.shape_cast %118 : vector<1x16x16xf32> to vector<16x16xf32>
    %cst_142 = arith.constant dense<0.000000e+00> : vector<128x16xf32>
    %120 = tpu.matmul %117, %119, %cst_142 {dimension_numbers = #tpu.dot_dimension_numbers<[1], [0], [0], [1], [0, 0, 1, 1], [], []>} : vector<128x16xf32>, vector<16x16xf32>, vector<128x16xf32> -> vector<128x16xf32>
    %121 = arith.addf %115, %120 : vector<128x16xf32>
    %c0_143 = arith.constant 0 : index
    %c1_144 = arith.constant 1 : index
    %c0_145 = arith.constant 0 : index
    %c0_146 = arith.constant 0 : index
    %122 = vector.load %arg28[%c0_143, %c1_144, %c0_145, %c0_146] : memref<2x10x10x16xf32, #tpu.memory_space<vmem>>, vector<2x8x8x16xf32>
    %123 = vector.shape_cast %122 : vector<2x8x8x16xf32> to vector<128x16xf32>
    %c3_147 = arith.constant 3 : index
    %c0_148 = arith.constant 0 : index
    %c0_149 = arith.constant 0 : index
    %124 = vector.load %arg15[%c3_147, %c0_148, %c0_149] : memref<9x16x16xf32, #tpu.memory_space<vmem>>, vector<1x16x16xf32>
    %125 = vector.shape_cast %124 : vector<1x16x16xf32> to vector<16x16xf32>
    %cst_150 = arith.constant dense<0.000000e+00> : vector<128x16xf32>
    %126 = tpu.matmul %123, %125, %cst_150 {dimension_numbers = #tpu.dot_dimension_numbers<[1], [0], [0], [1], [0, 0, 1, 1], [], []>} : vector<128x16xf32>, vector<16x16xf32>, vector<128x16xf32> -> vector<128x16xf32>
    %127 = arith.addf %121, %126 : vector<128x16xf32>
    %c0_151 = arith.constant 0 : index
    %c1_152 = arith.constant 1 : index
    %c1_153 = arith.constant 1 : index
    %c0_154 = arith.constant 0 : index
    %128 = vector.load %arg28[%c0_151, %c1_152, %c1_153, %c0_154] : memref<2x10x10x16xf32, #tpu.memory_space<vmem>>, vector<2x8x8x16xf32>
    %129 = vector.shape_cast %128 : vector<2x8x8x16xf32> to vector<128x16xf32>
    %c4_155 = arith.constant 4 : index
    %c0_156 = arith.constant 0 : index
    %c0_157 = arith.constant 0 : index
    %130 = vector.load %arg15[%c4_155, %c0_156, %c0_157] : memref<9x16x16xf32, #tpu.memory_space<vmem>>, vector<1x16x16xf32>
    %131 = vector.shape_cast %130 : vector<1x16x16xf32> to vector<16x16xf32>
    %cst_158 = arith.constant dense<0.000000e+00> : vector<128x16xf32>
    %132 = tpu.matmul %129, %131, %cst_158 {dimension_numbers = #tpu.dot_dimension_numbers<[1], [0], [0], [1], [0, 0, 1, 1], [], []>} : vector<128x16xf32>, vector<16x16xf32>, vector<128x16xf32> -> vector<128x16xf32>
    %133 = arith.addf %127, %132 : vector<128x16xf32>
    %c0_159 = arith.constant 0 : index
    %c1_160 = arith.constant 1 : index
    %c2_161 = arith.constant 2 : index
    %c0_162 = arith.constant 0 : index
    %134 = vector.load %arg28[%c0_159, %c1_160, %c2_161, %c0_162] : memref<2x10x10x16xf32, #tpu.memory_space<vmem>>, vector<2x8x8x16xf32>
    %135 = vector.shape_cast %134 : vector<2x8x8x16xf32> to vector<128x16xf32>
    %c5_163 = arith.constant 5 : index
    %c0_164 = arith.constant 0 : index
    %c0_165 = arith.constant 0 : index
    %136 = vector.load %arg15[%c5_163, %c0_164, %c0_165] : memref<9x16x16xf32, #tpu.memory_space<vmem>>, vector<1x16x16xf32>
    %137 = vector.shape_cast %136 : vector<1x16x16xf32> to vector<16x16xf32>
    %cst_166 = arith.constant dense<0.000000e+00> : vector<128x16xf32>
    %138 = tpu.matmul %135, %137, %cst_166 {dimension_numbers = #tpu.dot_dimension_numbers<[1], [0], [0], [1], [0, 0, 1, 1], [], []>} : vector<128x16xf32>, vector<16x16xf32>, vector<128x16xf32> -> vector<128x16xf32>
    %139 = arith.addf %133, %138 : vector<128x16xf32>
    %c0_167 = arith.constant 0 : index
    %c2_168 = arith.constant 2 : index
    %c0_169 = arith.constant 0 : index
    %c0_170 = arith.constant 0 : index
    %140 = vector.load %arg28[%c0_167, %c2_168, %c0_169, %c0_170] : memref<2x10x10x16xf32, #tpu.memory_space<vmem>>, vector<2x8x8x16xf32>
    %141 = vector.shape_cast %140 : vector<2x8x8x16xf32> to vector<128x16xf32>
    %c6_171 = arith.constant 6 : index
    %c0_172 = arith.constant 0 : index
    %c0_173 = arith.constant 0 : index
    %142 = vector.load %arg15[%c6_171, %c0_172, %c0_173] : memref<9x16x16xf32, #tpu.memory_space<vmem>>, vector<1x16x16xf32>
    %143 = vector.shape_cast %142 : vector<1x16x16xf32> to vector<16x16xf32>
    %cst_174 = arith.constant dense<0.000000e+00> : vector<128x16xf32>
    %144 = tpu.matmul %141, %143, %cst_174 {dimension_numbers = #tpu.dot_dimension_numbers<[1], [0], [0], [1], [0, 0, 1, 1], [], []>} : vector<128x16xf32>, vector<16x16xf32>, vector<128x16xf32> -> vector<128x16xf32>
    %145 = arith.addf %139, %144 : vector<128x16xf32>
    %c0_175 = arith.constant 0 : index
    %c2_176 = arith.constant 2 : index
    %c1_177 = arith.constant 1 : index
    %c0_178 = arith.constant 0 : index
    %146 = vector.load %arg28[%c0_175, %c2_176, %c1_177, %c0_178] : memref<2x10x10x16xf32, #tpu.memory_space<vmem>>, vector<2x8x8x16xf32>
    %147 = vector.shape_cast %146 : vector<2x8x8x16xf32> to vector<128x16xf32>
    %c7_179 = arith.constant 7 : index
    %c0_180 = arith.constant 0 : index
    %c0_181 = arith.constant 0 : index
    %148 = vector.load %arg15[%c7_179, %c0_180, %c0_181] : memref<9x16x16xf32, #tpu.memory_space<vmem>>, vector<1x16x16xf32>
    %149 = vector.shape_cast %148 : vector<1x16x16xf32> to vector<16x16xf32>
    %cst_182 = arith.constant dense<0.000000e+00> : vector<128x16xf32>
    %150 = tpu.matmul %147, %149, %cst_182 {dimension_numbers = #tpu.dot_dimension_numbers<[1], [0], [0], [1], [0, 0, 1, 1], [], []>} : vector<128x16xf32>, vector<16x16xf32>, vector<128x16xf32> -> vector<128x16xf32>
    %151 = arith.addf %145, %150 : vector<128x16xf32>
    %c0_183 = arith.constant 0 : index
    %c2_184 = arith.constant 2 : index
    %c2_185 = arith.constant 2 : index
    %c0_186 = arith.constant 0 : index
    %152 = vector.load %arg28[%c0_183, %c2_184, %c2_185, %c0_186] : memref<2x10x10x16xf32, #tpu.memory_space<vmem>>, vector<2x8x8x16xf32>
    %153 = vector.shape_cast %152 : vector<2x8x8x16xf32> to vector<128x16xf32>
    %c8_187 = arith.constant 8 : index
    %c0_188 = arith.constant 0 : index
    %c0_189 = arith.constant 0 : index
    %154 = vector.load %arg15[%c8_187, %c0_188, %c0_189] : memref<9x16x16xf32, #tpu.memory_space<vmem>>, vector<1x16x16xf32>
    %155 = vector.shape_cast %154 : vector<1x16x16xf32> to vector<16x16xf32>
    %cst_190 = arith.constant dense<0.000000e+00> : vector<128x16xf32>
    %156 = tpu.matmul %153, %155, %cst_190 {dimension_numbers = #tpu.dot_dimension_numbers<[1], [0], [0], [1], [0, 0, 1, 1], [], []>} : vector<128x16xf32>, vector<16x16xf32>, vector<128x16xf32> -> vector<128x16xf32>
    %157 = arith.addf %151, %156 : vector<128x16xf32>
    %c0_191 = arith.constant 0 : index
    %c0_192 = arith.constant 0 : index
    %158 = vector.load %arg16[%c0_191, %c0_192] : memref<8x16xf32, #tpu.memory_space<vmem>>, vector<8x16xf32>
    %cst_193 = arith.constant dense<0.000000e+00> : vector<2x16xf32>
    %159 = tpu.matmul %25, %158, %cst_193 {dimension_numbers = #tpu.dot_dimension_numbers<[1], [0], [0], [1], [0, 0, 1, 1], [], []>} : vector<2x8xf32>, vector<8x16xf32>, vector<2x16xf32> -> vector<2x16xf32>
    %c0_194 = arith.constant 0 : index
    %c0_195 = arith.constant 0 : index
    %160 = vector.load %arg4[%c0_194, %c0_195] : memref<128x2xf32, #tpu.memory_space<vmem>>, vector<128x2xf32>
    %cst_196 = arith.constant dense<0.000000e+00> : vector<128x16xf32>
    %161 = tpu.matmul %160, %159, %cst_196 {dimension_numbers = #tpu.dot_dimension_numbers<[1], [0], [0], [1], [0, 0, 1, 1], [], []>} : vector<128x2xf32>, vector<2x16xf32>, vector<128x16xf32> -> vector<128x16xf32>
    %c0_197 = arith.constant 0 : index
    %c0_198 = arith.constant 0 : index
    %162 = vector.load %arg17[%c0_197, %c0_198] : memref<1x16xf32, #tpu.memory_space<vmem>>, vector<1x16xf32>
    %163 = vector.broadcast %162 : vector<1x16xf32> to vector<128x16xf32>
    %164 = arith.addf %157, %163 : vector<128x16xf32>
    %165 = arith.addf %164, %161 : vector<128x16xf32>
    %cst_199 = arith.constant 0.000000e+00 : f32
    %166 = vector.broadcast %cst_199 : f32 to vector<128x16xf32>
    %167 = arith.maximumf %165, %166 : vector<128x16xf32>
    %c0_200 = arith.constant 0 : index
    %c0_201 = arith.constant 0 : index
    %168 = vector.load %arg25[%c0_200, %c0_201] : memref<128x16xf32, #tpu.memory_space<vmem>>, vector<128x16xf32>
    tpu.vector_store %arg25[%c0_200, %c0_201], %167 {strides = array<i32>} : memref<128x16xf32, #tpu.memory_space<vmem>>, vector<128x16xf32>,
    %169 = vector.shape_cast %167 : vector<128x16xf32> to vector<2x8x8x16xf32>
    %c0_202 = arith.constant 0 : index
    %c1_203 = arith.constant 1 : index
    %c1_204 = arith.constant 1 : index
    %c0_205 = arith.constant 0 : index
    %170 = vector.load %arg28[%c0_202, %c1_203, %c1_204, %c0_205] : memref<2x10x10x16xf32, #tpu.memory_space<vmem>>, vector<2x8x8x16xf32>
    tpu.vector_store %arg28[%c0_202, %c1_203, %c1_204, %c0_205], %169 {strides = array<i32>} : memref<2x10x10x16xf32, #tpu.memory_space<vmem>>, vector<2x8x8x16xf32>,
    %cst_206 = arith.constant 0.000000e+00 : f32
    %171 = vector.broadcast %cst_206 : f32 to vector<128x16xf32>
    %c0_207 = arith.constant 0 : index
    %c0_208 = arith.constant 0 : index
    %c0_209 = arith.constant 0 : index
    %c0_210 = arith.constant 0 : index
    %172 = vector.load %arg28[%c0_207, %c0_208, %c0_209, %c0_210] : memref<2x10x10x16xf32, #tpu.memory_space<vmem>>, vector<2x8x8x16xf32>
    %173 = vector.shape_cast %172 : vector<2x8x8x16xf32> to vector<128x16xf32>
    %c0_211 = arith.constant 0 : index
    %c0_212 = arith.constant 0 : index
    %c0_213 = arith.constant 0 : index
    %174 = vector.load %arg18[%c0_211, %c0_212, %c0_213] : memref<9x16x16xf32, #tpu.memory_space<vmem>>, vector<1x16x16xf32>
    %175 = vector.shape_cast %174 : vector<1x16x16xf32> to vector<16x16xf32>
    %cst_214 = arith.constant dense<0.000000e+00> : vector<128x16xf32>
    %176 = tpu.matmul %173, %175, %cst_214 {dimension_numbers = #tpu.dot_dimension_numbers<[1], [0], [0], [1], [0, 0, 1, 1], [], []>} : vector<128x16xf32>, vector<16x16xf32>, vector<128x16xf32> -> vector<128x16xf32>
    %177 = arith.addf %171, %176 : vector<128x16xf32>
    %c0_215 = arith.constant 0 : index
    %c0_216 = arith.constant 0 : index
    %c1_217 = arith.constant 1 : index
    %c0_218 = arith.constant 0 : index
    %178 = vector.load %arg28[%c0_215, %c0_216, %c1_217, %c0_218] : memref<2x10x10x16xf32, #tpu.memory_space<vmem>>, vector<2x8x8x16xf32>
    %179 = vector.shape_cast %178 : vector<2x8x8x16xf32> to vector<128x16xf32>
    %c1_219 = arith.constant 1 : index
    %c0_220 = arith.constant 0 : index
    %c0_221 = arith.constant 0 : index
    %180 = vector.load %arg18[%c1_219, %c0_220, %c0_221] : memref<9x16x16xf32, #tpu.memory_space<vmem>>, vector<1x16x16xf32>
    %181 = vector.shape_cast %180 : vector<1x16x16xf32> to vector<16x16xf32>
    %cst_222 = arith.constant dense<0.000000e+00> : vector<128x16xf32>
    %182 = tpu.matmul %179, %181, %cst_222 {dimension_numbers = #tpu.dot_dimension_numbers<[1], [0], [0], [1], [0, 0, 1, 1], [], []>} : vector<128x16xf32>, vector<16x16xf32>, vector<128x16xf32> -> vector<128x16xf32>
    %183 = arith.addf %177, %182 : vector<128x16xf32>
    %c0_223 = arith.constant 0 : index
    %c0_224 = arith.constant 0 : index
    %c2_225 = arith.constant 2 : index
    %c0_226 = arith.constant 0 : index
    %184 = vector.load %arg28[%c0_223, %c0_224, %c2_225, %c0_226] : memref<2x10x10x16xf32, #tpu.memory_space<vmem>>, vector<2x8x8x16xf32>
    %185 = vector.shape_cast %184 : vector<2x8x8x16xf32> to vector<128x16xf32>
    %c2_227 = arith.constant 2 : index
    %c0_228 = arith.constant 0 : index
    %c0_229 = arith.constant 0 : index
    %186 = vector.load %arg18[%c2_227, %c0_228, %c0_229] : memref<9x16x16xf32, #tpu.memory_space<vmem>>, vector<1x16x16xf32>
    %187 = vector.shape_cast %186 : vector<1x16x16xf32> to vector<16x16xf32>
    %cst_230 = arith.constant dense<0.000000e+00> : vector<128x16xf32>
    %188 = tpu.matmul %185, %187, %cst_230 {dimension_numbers = #tpu.dot_dimension_numbers<[1], [0], [0], [1], [0, 0, 1, 1], [], []>} : vector<128x16xf32>, vector<16x16xf32>, vector<128x16xf32> -> vector<128x16xf32>
    %189 = arith.addf %183, %188 : vector<128x16xf32>
    %c0_231 = arith.constant 0 : index
    %c1_232 = arith.constant 1 : index
    %c0_233 = arith.constant 0 : index
    %c0_234 = arith.constant 0 : index
    %190 = vector.load %arg28[%c0_231, %c1_232, %c0_233, %c0_234] : memref<2x10x10x16xf32, #tpu.memory_space<vmem>>, vector<2x8x8x16xf32>
    %191 = vector.shape_cast %190 : vector<2x8x8x16xf32> to vector<128x16xf32>
    %c3_235 = arith.constant 3 : index
    %c0_236 = arith.constant 0 : index
    %c0_237 = arith.constant 0 : index
    %192 = vector.load %arg18[%c3_235, %c0_236, %c0_237] : memref<9x16x16xf32, #tpu.memory_space<vmem>>, vector<1x16x16xf32>
    %193 = vector.shape_cast %192 : vector<1x16x16xf32> to vector<16x16xf32>
    %cst_238 = arith.constant dense<0.000000e+00> : vector<128x16xf32>
    %194 = tpu.matmul %191, %193, %cst_238 {dimension_numbers = #tpu.dot_dimension_numbers<[1], [0], [0], [1], [0, 0, 1, 1], [], []>} : vector<128x16xf32>, vector<16x16xf32>, vector<128x16xf32> -> vector<128x16xf32>
    %195 = arith.addf %189, %194 : vector<128x16xf32>
    %c0_239 = arith.constant 0 : index
    %c1_240 = arith.constant 1 : index
    %c1_241 = arith.constant 1 : index
    %c0_242 = arith.constant 0 : index
    %196 = vector.load %arg28[%c0_239, %c1_240, %c1_241, %c0_242] : memref<2x10x10x16xf32, #tpu.memory_space<vmem>>, vector<2x8x8x16xf32>
    %197 = vector.shape_cast %196 : vector<2x8x8x16xf32> to vector<128x16xf32>
    %c4_243 = arith.constant 4 : index
    %c0_244 = arith.constant 0 : index
    %c0_245 = arith.constant 0 : index
    %198 = vector.load %arg18[%c4_243, %c0_244, %c0_245] : memref<9x16x16xf32, #tpu.memory_space<vmem>>, vector<1x16x16xf32>
    %199 = vector.shape_cast %198 : vector<1x16x16xf32> to vector<16x16xf32>
    %cst_246 = arith.constant dense<0.000000e+00> : vector<128x16xf32>
    %200 = tpu.matmul %197, %199, %cst_246 {dimension_numbers = #tpu.dot_dimension_numbers<[1], [0], [0], [1], [0, 0, 1, 1], [], []>} : vector<128x16xf32>, vector<16x16xf32>, vector<128x16xf32> -> vector<128x16xf32>
    %201 = arith.addf %195, %200 : vector<128x16xf32>
    %c0_247 = arith.constant 0 : index
    %c1_248 = arith.constant 1 : index
    %c2_249 = arith.constant 2 : index
    %c0_250 = arith.constant 0 : index
    %202 = vector.load %arg28[%c0_247, %c1_248, %c2_249, %c0_250] : memref<2x10x10x16xf32, #tpu.memory_space<vmem>>, vector<2x8x8x16xf32>
    %203 = vector.shape_cast %202 : vector<2x8x8x16xf32> to vector<128x16xf32>
    %c5_251 = arith.constant 5 : index
    %c0_252 = arith.constant 0 : index
    %c0_253 = arith.constant 0 : index
    %204 = vector.load %arg18[%c5_251, %c0_252, %c0_253] : memref<9x16x16xf32, #tpu.memory_space<vmem>>, vector<1x16x16xf32>
    %205 = vector.shape_cast %204 : vector<1x16x16xf32> to vector<16x16xf32>
    %cst_254 = arith.constant dense<0.000000e+00> : vector<128x16xf32>
    %206 = tpu.matmul %203, %205, %cst_254 {dimension_numbers = #tpu.dot_dimension_numbers<[1], [0], [0], [1], [0, 0, 1, 1], [], []>} : vector<128x16xf32>, vector<16x16xf32>, vector<128x16xf32> -> vector<128x16xf32>
    %207 = arith.addf %201, %206 : vector<128x16xf32>
    %c0_255 = arith.constant 0 : index
    %c2_256 = arith.constant 2 : index
    %c0_257 = arith.constant 0 : index
    %c0_258 = arith.constant 0 : index
    %208 = vector.load %arg28[%c0_255, %c2_256, %c0_257, %c0_258] : memref<2x10x10x16xf32, #tpu.memory_space<vmem>>, vector<2x8x8x16xf32>
    %209 = vector.shape_cast %208 : vector<2x8x8x16xf32> to vector<128x16xf32>
    %c6_259 = arith.constant 6 : index
    %c0_260 = arith.constant 0 : index
    %c0_261 = arith.constant 0 : index
    %210 = vector.load %arg18[%c6_259, %c0_260, %c0_261] : memref<9x16x16xf32, #tpu.memory_space<vmem>>, vector<1x16x16xf32>
    %211 = vector.shape_cast %210 : vector<1x16x16xf32> to vector<16x16xf32>
    %cst_262 = arith.constant dense<0.000000e+00> : vector<128x16xf32>
    %212 = tpu.matmul %209, %211, %cst_262 {dimension_numbers = #tpu.dot_dimension_numbers<[1], [0], [0], [1], [0, 0, 1, 1], [], []>} : vector<128x16xf32>, vector<16x16xf32>, vector<128x16xf32> -> vector<128x16xf32>
    %213 = arith.addf %207, %212 : vector<128x16xf32>
    %c0_263 = arith.constant 0 : index
    %c2_264 = arith.constant 2 : index
    %c1_265 = arith.constant 1 : index
    %c0_266 = arith.constant 0 : index
    %214 = vector.load %arg28[%c0_263, %c2_264, %c1_265, %c0_266] : memref<2x10x10x16xf32, #tpu.memory_space<vmem>>, vector<2x8x8x16xf32>
    %215 = vector.shape_cast %214 : vector<2x8x8x16xf32> to vector<128x16xf32>
    %c7_267 = arith.constant 7 : index
    %c0_268 = arith.constant 0 : index
    %c0_269 = arith.constant 0 : index
    %216 = vector.load %arg18[%c7_267, %c0_268, %c0_269] : memref<9x16x16xf32, #tpu.memory_space<vmem>>, vector<1x16x16xf32>
    %217 = vector.shape_cast %216 : vector<1x16x16xf32> to vector<16x16xf32>
    %cst_270 = arith.constant dense<0.000000e+00> : vector<128x16xf32>
    %218 = tpu.matmul %215, %217, %cst_270 {dimension_numbers = #tpu.dot_dimension_numbers<[1], [0], [0], [1], [0, 0, 1, 1], [], []>} : vector<128x16xf32>, vector<16x16xf32>, vector<128x16xf32> -> vector<128x16xf32>
    %219 = arith.addf %213, %218 : vector<128x16xf32>
    %c0_271 = arith.constant 0 : index
    %c2_272 = arith.constant 2 : index
    %c2_273 = arith.constant 2 : index
    %c0_274 = arith.constant 0 : index
    %220 = vector.load %arg28[%c0_271, %c2_272, %c2_273, %c0_274] : memref<2x10x10x16xf32, #tpu.memory_space<vmem>>, vector<2x8x8x16xf32>
    %221 = vector.shape_cast %220 : vector<2x8x8x16xf32> to vector<128x16xf32>
    %c8_275 = arith.constant 8 : index
    %c0_276 = arith.constant 0 : index
    %c0_277 = arith.constant 0 : index
    %222 = vector.load %arg18[%c8_275, %c0_276, %c0_277] : memref<9x16x16xf32, #tpu.memory_space<vmem>>, vector<1x16x16xf32>
    %223 = vector.shape_cast %222 : vector<1x16x16xf32> to vector<16x16xf32>
    %cst_278 = arith.constant dense<0.000000e+00> : vector<128x16xf32>
    %224 = tpu.matmul %221, %223, %cst_278 {dimension_numbers = #tpu.dot_dimension_numbers<[1], [0], [0], [1], [0, 0, 1, 1], [], []>} : vector<128x16xf32>, vector<16x16xf32>, vector<128x16xf32> -> vector<128x16xf32>
    %225 = arith.addf %219, %224 : vector<128x16xf32>
    %c0_279 = arith.constant 0 : index
    %c0_280 = arith.constant 0 : index
    %226 = vector.load %arg19[%c0_279, %c0_280] : memref<1x16xf32, #tpu.memory_space<vmem>>, vector<1x16xf32>
    %227 = vector.broadcast %226 : vector<1x16xf32> to vector<128x16xf32>
    %228 = arith.addf %225, %227 : vector<128x16xf32>
    %cst_281 = arith.constant 0.000000e+00 : f32
    %229 = vector.broadcast %cst_281 : f32 to vector<128x16xf32>
    %230 = arith.maximumf %228, %229 : vector<128x16xf32>
    %c0_282 = arith.constant 0 : index
    %c0_283 = arith.constant 0 : index
    %231 = vector.load %arg20[%c0_282, %c0_283] : memref<6x16xf32, #tpu.memory_space<vmem>>, vector<6x16xf32>
    %c0_284 = arith.constant 0 : index
    %c0_285 = arith.constant 0 : index
    %232 = vector.load %arg21[%c0_284, %c0_285] : memref<6x1xf32, #tpu.memory_space<vmem>>, vector<6x1xf32>
    %c0_286 = arith.constant 0 : index
    %c0_287 = arith.constant 0 : index
    %233 = vector.load %arg22[%c0_286, %c0_287] : memref<6x16xf32, #tpu.memory_space<vmem>>, vector<6x16xf32>
    %c0_288 = arith.constant 0 : index
    %c0_289 = arith.constant 0 : index
    %234 = vector.load %arg23[%c0_288, %c0_289] : memref<6x1xf32, #tpu.memory_space<vmem>>, vector<6x1xf32>
    %235 = vector.extract_strided_slice %230 {offsets = [0, 0], sizes = [64, 16], strides = [1, 1]} : vector<128x16xf32> to vector<64x16xf32>
    %cst_290 = arith.constant dense<0.000000e+00> : vector<6x64xf32>
    %236 = tpu.matmul %231, %235, %cst_290 {dimension_numbers = #tpu.dot_dimension_numbers<[1], [1], [0], [0], [0, 0, 1, 0], [], []>} : vector<6x16xf32>, vector<64x16xf32>, vector<6x64xf32> -> vector<6x64xf32>
    %237 = vector.broadcast %232 : vector<6x1xf32> to vector<6x64xf32>
    %238 = arith.addf %236, %237 : vector<6x64xf32>
    %cst_291 = arith.constant dense<0.000000e+00> : vector<6x64xf32>
    %239 = tpu.matmul %233, %235, %cst_291 {dimension_numbers = #tpu.dot_dimension_numbers<[1], [1], [0], [0], [0, 0, 1, 0], [], []>} : vector<6x16xf32>, vector<64x16xf32>, vector<6x64xf32> -> vector<6x64xf32>
    %240 = vector.broadcast %234 : vector<6x1xf32> to vector<6x64xf32>
    %241 = arith.addf %239, %240 : vector<6x64xf32>
    %cst_292 = arith.constant dense<0xFF800000> : vector<6xf32>
    %242 = vector.multi_reduction <maximumf>, %238, %cst_292 [1] : vector<6x64xf32> to vector<6xf32>
    %243 = vector.shape_cast %242 : vector<6xf32> to vector<6x1xf32>
    %244 = vector.broadcast %243 : vector<6x1xf32> to vector<6x64xf32>
    %245 = arith.subf %238, %244 : vector<6x64xf32>
    %246 = math.exp %245 : vector<6x64xf32>
    %cst_293 = arith.constant dense<0.000000e+00> : vector<6xf32>
    %247 = vector.multi_reduction <add>, %246, %cst_293 [1] : vector<6x64xf32> to vector<6xf32>
    %248 = vector.shape_cast %247 : vector<6xf32> to vector<6x1xf32>
    %249 = math.log %248 : vector<6x1xf32>
    %250 = vector.broadcast %249 : vector<6x1xf32> to vector<6x64xf32>
    %251 = arith.subf %245, %250 : vector<6x64xf32>
    %c0_294 = arith.constant 0 : index
    %c0_295 = arith.constant 0 : index
    %252 = vector.load %arg24[%c0_294, %c0_295] : memref<12x128xf32, #tpu.memory_space<vmem>>, vector<6x64xf32>
    tpu.vector_store %arg24[%c0_294, %c0_295], %251 {strides = array<i32>} : memref<12x128xf32, #tpu.memory_space<vmem>>, vector<6x64xf32>,
    %cst_296 = arith.constant 0.000000e+00 : f32
    %253 = vector.broadcast %cst_296 : f32 to vector<6x64xf32>
    %254 = arith.subf %253, %241 : vector<6x64xf32>
    %255 = math.exp %254 : vector<6x64xf32>
    %cst_297 = arith.constant 1.000000e+00 : f32
    %256 = vector.broadcast %cst_297 : f32 to vector<6x64xf32>
    %257 = arith.addf %256, %255 : vector<6x64xf32>
    %cst_298 = arith.constant 1.000000e+00 : f32
    %258 = vector.broadcast %cst_298 : f32 to vector<6x64xf32>
    %259 = arith.divf %258, %257 : vector<6x64xf32>
    %c0_299 = arith.constant 0 : index
    %c64 = arith.constant 64 : index
    %260 = vector.load %arg24[%c0_299, %c64] : memref<12x128xf32, #tpu.memory_space<vmem>>, vector<6x64xf32>
    tpu.vector_store %arg24[%c0_299, %c64], %259 {strides = array<i32>} : memref<12x128xf32, #tpu.memory_space<vmem>>, vector<6x64xf32>,
    %261 = vector.extract_strided_slice %230 {offsets = [64, 0], sizes = [64, 16], strides = [1, 1]} : vector<128x16xf32> to vector<64x16xf32>
    %cst_300 = arith.constant dense<0.000000e+00> : vector<6x64xf32>
    %262 = tpu.matmul %231, %261, %cst_300 {dimension_numbers = #tpu.dot_dimension_numbers<[1], [1], [0], [0], [0, 0, 1, 0], [], []>} : vector<6x16xf32>, vector<64x16xf32>, vector<6x64xf32> -> vector<6x64xf32>
    %263 = vector.broadcast %232 : vector<6x1xf32> to vector<6x64xf32>
    %264 = arith.addf %262, %263 : vector<6x64xf32>
    %cst_301 = arith.constant dense<0.000000e+00> : vector<6x64xf32>
    %265 = tpu.matmul %233, %261, %cst_301 {dimension_numbers = #tpu.dot_dimension_numbers<[1], [1], [0], [0], [0, 0, 1, 0], [], []>} : vector<6x16xf32>, vector<64x16xf32>, vector<6x64xf32> -> vector<6x64xf32>
    %266 = vector.broadcast %234 : vector<6x1xf32> to vector<6x64xf32>
    %267 = arith.addf %265, %266 : vector<6x64xf32>
    %cst_302 = arith.constant dense<0xFF800000> : vector<6xf32>
    %268 = vector.multi_reduction <maximumf>, %264, %cst_302 [1] : vector<6x64xf32> to vector<6xf32>
    %269 = vector.shape_cast %268 : vector<6xf32> to vector<6x1xf32>
    %270 = vector.broadcast %269 : vector<6x1xf32> to vector<6x64xf32>
    %271 = arith.subf %264, %270 : vector<6x64xf32>
    %272 = math.exp %271 : vector<6x64xf32>
    %cst_303 = arith.constant dense<0.000000e+00> : vector<6xf32>
    %273 = vector.multi_reduction <add>, %272, %cst_303 [1] : vector<6x64xf32> to vector<6xf32>
    %274 = vector.shape_cast %273 : vector<6xf32> to vector<6x1xf32>
    %275 = math.log %274 : vector<6x1xf32>
    %276 = vector.broadcast %275 : vector<6x1xf32> to vector<6x64xf32>
    %277 = arith.subf %271, %276 : vector<6x64xf32>
    %c6_304 = arith.constant 6 : index
    %c0_305 = arith.constant 0 : index
    %278 = vector.load %arg24[%c6_304, %c0_305] : memref<12x128xf32, #tpu.memory_space<vmem>>, vector<6x64xf32>
    tpu.vector_store %arg24[%c6_304, %c0_305], %277 {strides = array<i32>} : memref<12x128xf32, #tpu.memory_space<vmem>>, vector<6x64xf32>,
    %cst_306 = arith.constant 0.000000e+00 : f32
    %279 = vector.broadcast %cst_306 : f32 to vector<6x64xf32>
    %280 = arith.subf %279, %267 : vector<6x64xf32>
    %281 = math.exp %280 : vector<6x64xf32>
    %cst_307 = arith.constant 1.000000e+00 : f32
    %282 = vector.broadcast %cst_307 : f32 to vector<6x64xf32>
    %283 = arith.addf %282, %281 : vector<6x64xf32>
    %cst_308 = arith.constant 1.000000e+00 : f32
    %284 = vector.broadcast %cst_308 : f32 to vector<6x64xf32>
    %285 = arith.divf %284, %283 : vector<6x64xf32>
    %c6_309 = arith.constant 6 : index
    %c64_310 = arith.constant 64 : index
    %286 = vector.load %arg24[%c6_309, %c64_310] : memref<12x128xf32, #tpu.memory_space<vmem>>, vector<6x64xf32>
    tpu.vector_store %arg24[%c6_309, %c64_310], %285 {strides = array<i32>} : memref<12x128xf32, #tpu.memory_space<vmem>>, vector<6x64xf32>,
    return
  }
}

</mosaic_0001>

<bundles_post_ra>
// kernel: tpu_custom_call.1
= control target key start
LH: loop header
LB: loop body
LE: loop exit
PB: predicated region body
PF: predicated region fallthrough
CT: control target
= control target key end

     0   :  { %s12504_s0 = inlined_call_operand.vmem [shape: f32[128,32], index: 0, kind: input, shape index: {}]   ;;  %s12505_s1 = inlined_call_operand.vmem [shape: f32[8,2], index: 1, kind: input, shape index: {}]   ;;  %s12506_s2 = inlined_call_operand.vmem [shape: f32[8,1], index: 2, kind: input, shape index: {}]   ;;  %s12507_s3 = inlined_call_operand.hbm [shape: f32[2,8], index: 3, kind: input, shape index: {}]   ;;  %s12508_s4 = inlined_call_operand.vmem [shape: f32[128,2], index: 4, kind: input, shape index: {}]   ;;  %s12509_s5 = inlined_call_operand.vmem [shape: f32[2,2], index: 5, kind: input, shape index: {}]   ;;  %s12510_s6 = inlined_call_operand.vmem [shape: f32[1,2], index: 6, kind: input, shape index: {}]   ;;  %s12511_s7 = inlined_call_operand.vmem [shape: f32[32,8], index: 7, kind: input, shape index: {}]   ;;  %s12512_s8 = inlined_call_operand.vmem [shape: f32[1,8], index: 8, kind: input, shape index: {}]   ;;  %s12513_s9 = inlined_call_operand.vmem [shape: f32[9,8,16], index: 9, kind: input, shape index: {}]   ;;  %s12514_s10 = inlined_call_operand.vmem [shape: f32[1,16], index: 10, kind: input, shape index: {}]   ;;  %s12515_s11 = inlined_call_operand.vmem [shape: f32[2,16], index: 11, kind: input, shape index: {}]   ;;  %s12516_s12 = inlined_call_operand.vmem [shape: f32[1,16], index: 12, kind: input, shape index: {}]   ;;  %s12517_s13 = inlined_call_operand.vmem [shape: f32[16,8], index: 13, kind: input, shape index: {}]   ;;  %s12518_s14 = inlined_call_operand.vmem [shape: f32[1,8], index: 14, kind: input, shape index: {}]   ;;  %s12519_s15 = inlined_call_operand.vmem [shape: f32[9,16,16], index: 15, kind: input, shape index: {}]   ;;  %s12520_s16 = inlined_call_operand.vmem [shape: f32[8,16], index: 16, kind: input, shape index: {}]   ;;  %s12521_s17 = inlined_call_operand.vmem [shape: f32[1,16], index: 17, kind: input, shape index: {}]   ;;  %s12522_s18 = inlined_call_operand.vmem [shape: f32[9,16,16], index: 18, kind: input, shape index: {}]   ;;  %s12523_s19 = inlined_call_operand.vmem [shape: f32[1,16], index: 19, kind: input, shape index: {}]   ;;  %s12524_s20 = inlined_call_operand.vmem [shape: f32[6,16], index: 20, kind: input, shape index: {}]   ;;  %s12525_s21 = inlined_call_operand.vmem [shape: f32[6,1], index: 21, kind: input, shape index: {}]   ;;  %s12526_s22 = inlined_call_operand.vmem [shape: f32[6,16], index: 22, kind: input, shape index: {}]   ;;  %s12527_s23 = inlined_call_operand.vmem [shape: f32[6,1], index: 23, kind: input, shape index: {}]   ;;  %s12528_s24 = inlined_call_operand.hbm [shape: f32[12,128], index: 24, kind: output, shape index: {0}]   ;;  %s12529_s25 = inlined_call_operand.vmem [shape: f32[128,16], index: 25, kind: output, shape index: {1}]   ;;  %s12530_s26 = inlined_call_operand.hbm [shape: f32[2,8], index: 26, kind: output, shape index: {2}]  }
   0x1   :  { %12536 = sst [smem:[#allocation13_spill]] %s12504_s0 }
   0x2   :  { %12537 = sst [smem:[#allocation14_spill]] %s12505_s1 }
   0x3   :  { %12538 = sst [smem:[#allocation15_spill]] %s12506_s2 }
   0x4   :  { %12539 = sst [smem:[#allocation16_spill]] %s12507_s3 }
   0x5   :  { %12540 = sst [smem:[#allocation17_spill]] %s12508_s4 }
   0x6   :  { %12541 = sst [smem:[#allocation18_spill]] %s12509_s5 }
   0x7   :  { %12542 = sst [smem:[#allocation19_spill]] %s12510_s6 }
   0x8   :  { %12543 = sst [smem:[#allocation20_spill]] %s12511_s7 }
   0x9   :  { %12544 = sst [smem:[#allocation21_spill]] %s12512_s8 }
   0xa   :  { %12545 = sst [smem:[#allocation22_spill]] %s12513_s9 }
   0xb   :  { %12546 = sst [smem:[#allocation23_spill]] %s12514_s10 }
   0xc   :  { %32 = vsyncpa [#allocation5], 0 }
   0xd   :  { %33 = vsyncpa [#allocation6], 0 }
   0xe   :  { %34 = vsyncpa [#allocation9], 0  ;;  %s10397_s27 = smov [#allocation4]   ;;  %s12547_s8 = sld [smem:[#allocation16_spill]] }
   0xf   :  { %s47_s3 = sshll.u32 %s10397_s27, 4  ;;  %s48_s3 = int_to_ptr.vmem [resolvable:$true] %s47_s3 }
  0x14   :  { %s10325_s4 = scalar_lea.hbm %s12547_s8, 32 }
  0x15   :  { %p10326_p0 = scmp.ne.s32.totalorder %s12547_s8, %s10325_s4  ;;  %p10329_p1 = scmp.lt.u32.totalorder %s10325_s4, %s12547_s8 }
  0x17   :  { %p10331_p2 = pnand %p10329_p1, %p10326_p0 }
  0x19   :  { %10334 = shalt.err (!%p10331_p2)
}
  0x1a   :  { %s10335_s2 = scalar_lea.vmem %s48_s3, 32  ;;  %p10340_p4 = scmp.lt.s32.totalorder %s48_s3, %s48_s3 }
  0x1b   :  { %p10336_p3 = scmp.ne.s32.totalorder %s48_s3, %s10335_s2  ;;  %p10341_p5 = scmp.lt.s32.totalorder %s10335_s2, %s10335_s2 }
  0x1d   :  { %p10342_p6 = por %p10341_p5, %p10340_p4 }
  0x1f   :  { %p10343_p7 = pnand %p10342_p6, %p10336_p3 }
  0x21   :  { %10346 = shalt.err (!%p10343_p7)
}
  0x22   :  { %50 = dma.hbm_to_vmem [thread:$0]  %s12547_s8, 32, %s48_s3, [#allocation5]  }
  0x23   :  { %10391 = dma.done.wait [#allocation5], 32  }
  0x24   :  { %10392 = vsyncadd [#allocation5], 4294967264  ;;  %v10398_v0 = vmov 0.0   ;;  %vm10399_vm0 = vmmov 0   ;;  %v10400_v1 = vmov 0   ;;  %vm107_vm1 = vcmask 1041408  }
  0x25   :  { %8836 = vmatprep.subr.mxu0 %v10398_v0  ;;  %8838 = vmatprep.mubr.msk.f32.mxu0 %vm10399_vm0, %v10398_v0  ;;  %vm103_vm2 = vcmask 15360   ;;  %s12548_s27 = sld [smem:[#allocation18_spill]]  ;;  %s12549_s28 = sld [smem:[#allocation14_spill]]  ;;  %v7288_v6 = vld [vmem:[%s12525_s21] sm:$0x3f]  ;;  %vm190_vm4 = vcmask 64512  }
  0x26   :  { %10308 = vset.pattern.permute.xlu0 %v10400_v1  ;;  %8841 = vmatprep.subr.mxu1 %v10398_v0  ;;  %s12550_s29 = sld [smem:[#allocation15_spill]]  ;;  %v7290_v7 = vld [vmem:[%s12527_s23] sm:$0x3f]  ;;  %671 = vst.msk [vmem:[#allocation2] sm:$0xff] %vm190_vm4, %v10398_v0  ;;  %673 = vst.msk [vmem:[#allocation2 + $0x10] sm:$0xff] %vm190_vm4, %v10398_v0  ;;  %s12551_s6 = sld [smem:[#allocation19_spill]] }
  0x27   :  { %8843 = vmatprep.mubr.msk.f32.mxu1 %vm10399_vm0, %v10398_v0  ;;  %675 = vst.msk [vmem:[#allocation2 + $0x20] sm:$0xff] %vm190_vm4, %v10398_v0  ;;  %677 = vst.msk [vmem:[#allocation2 + $0x30] sm:$0xff] %vm190_vm4, %v10398_v0  ;;  %v264_v8 = vld [vmem:[%s12515_s11] sm:$0x3]  ;;  %s12553_s30 = sld [smem:[#allocation13_spill]]  ;;  %vm461_vm6 = vcmask 261120  }
  0x28   :  { %679 = vst.msk [vmem:[#allocation2 + $0x40] sm:$0xff] %vm190_vm4, %v10398_v0  ;;  %681 = vst.msk [vmem:[#allocation2 + $0x50] sm:$0xff] %vm190_vm4, %v10398_v0  ;;  %v189_v14 = vld [vmem:[#allocation4] sm:$0x3]  ;;  %v350_v41 = vld [vmem:[%s12517_s13 + $0x8] sm:$0xff]  ;;  %v10401_v43 = vmov 0.0|0.0  }
  0x29   :  { %683 = vst.msk [vmem:[#allocation2 + $0x60] sm:$0xff] %vm190_vm4, %v10398_v0  ;;  %685 = vst.msk [vmem:[#allocation2 + $0x70] sm:$0xff] %vm190_vm4, %v10398_v0  ;;  %v349_v40 = vld [vmem:[%s12517_s13] sm:$0xff]  ;;  %vm358_vm7 = vcmask 130048   ;;  %vm432_vm8 = vcmask 58368   ;;  %s12554_s2 = sld [smem:[#allocation22_spill]] }
  0x2a   :  { %687 = vst.msk [vmem:[#allocation2 + $0x80] sm:$0xff] %vm190_vm4, %v10398_v0  ;;  %689 = vst.msk [vmem:[#allocation2 + $0x90] sm:$0xff] %vm190_vm4, %v10398_v0  ;;  %v9736_v42 = vpack.c.bf16 %v350_v41, %v349_v40  ;;  %v7724_v48 = vld [vmem:[%s12516_s12] ss:$0 sm:$0xff]  ;;  %vm2779_vm9 = vcmask 123904   ;;  %s12556_s4 = sld [smem:[#allocation23_spill]] }
  0x2b   :  { %v95_v2 = vld [vmem:[%s12548_s27] sm:$0x3]  ;;  %691 = vst.msk [vmem:[#allocation2 + $0xa0] sm:$0xff] %vm190_vm4, %v10398_v0  ;;  %693 = vst.msk [vmem:[#allocation2 + $0xb0] sm:$0xff] %vm190_vm4, %v10398_v0  ;;  %s12552_s27 = sld [smem:[#allocation20_spill]]  ;;  %vm7471_vm11 = vcmask 521216  }
  0x2c   :  { %v94_v3 = vld [vmem:[%s12549_s28] sm:$0xff]  ;;  %8837 = vmatpush3.msk.msra.mxu0 %vm107_vm1, %v95_v2  ;;  %695 = vst.msk [vmem:[#allocation2 + $0xc0] sm:$0xff] %vm190_vm4, %v10398_v0  ;;  %697 = vst.msk [vmem:[#allocation2 + $0xd0] sm:$0xff] %vm190_vm4, %v10398_v0  ;;  %s12555_s28 = sld [smem:[#allocation21_spill]] }
  0x2d   :  { %v181_v4 = vld [vmem:[%s12550_s29] sm:$0xff]  ;;  %8839 = vmatmul.mubr.msk.f32.vlgmr.msra.gmra.mrb[0].mxu0 %vm103_vm2, %v94_v3  ;;  %8846 = vmatprep.subr.mxu0 %v10398_v0  ;;  %699 = vst.msk [vmem:[#allocation2 + $0xe0] sm:$0xff] %vm190_vm4, %v10398_v0  ;;  %701 = vst.msk [vmem:[#allocation2 + $0xf0] sm:$0xff] %vm190_vm4, %v10398_v0  ;;  %v435_v25 = vld [vmem:[%s12553_s30 + $0x8] sm:$0xff] }
  0x2e   :  { %vm182_vm3 = vcmp.gt.f32.partialorder %v181_v4, 0.5  ;;  %8848 = vmatprep.mubr.msk.f32.mxu0 %vm10399_vm0, %v10398_v0  ;;  %703 = vst.msk [vmem:[#allocation2 + $0x100] sm:$0xff] %vm190_vm4, %v10398_v0  ;;  %705 = vst.msk [vmem:[#allocation2 + $0x110] sm:$0xff] %vm190_vm4, %v10398_v0  ;;  %8847 = vmatpush3.msk.msra.mxu0 %vm107_vm1, %v264_v8  ;;  %v7720_v9 = vld [vmem:[%s12551_s6] ss:$0 sm:$0xff]  ;;  %v436_v26 = vld [vmem:[%s12553_s30 + $0x10] sm:$0xff] }
  0x2f   :  { %v183_v5 = vsel %vm182_vm3, 1, %v10400_v1  ;;  %707 = vst.msk [vmem:[#allocation2 + $0x120] sm:$0xff] %vm190_vm4, %v10398_v0  ;;  %709 = vst.msk [vmem:[#allocation2 + $0x130] sm:$0xff] %vm190_vm4, %v10398_v0  ;;  %v434_v22 = vld [vmem:[%s12553_s30] sm:$0xff]  ;;  %v437_v27 = vld [vmem:[%s12553_s30 + $0x18] sm:$0xff] }
  0x30   :  { %185 = vperm.xlu0 %10308, %v183_v5   ;;  %v438_v28 = vld [vmem:[%s12553_s30 + $0x20] sm:$0xff]  ;;  %v439_v29 = vld [vmem:[%s12553_s30 + $0x28] sm:$0xff]  ;;  %v440_v30 = vld [vmem:[%s12553_s30 + $0x30] sm:$0xff]  ;;  %2778 = vst.msk [vmem:[#allocation3] sm:$0xff] %vm358_vm7, %v10398_v0 }
  0x31   :  { %v450_v16 = vld [vmem:[%s12552_s27] sm:$0xff]  ;;  %v451_v17 = vld [vmem:[%s12552_s27 + $0x8] sm:$0xff]  ;;  %v452_v19 = vld [vmem:[%s12552_s27 + $0x10] sm:$0xff]  ;;  %2781 = vst.msk [vmem:[#allocation3 + $0x10] sm:$0xff] %vm358_vm7, %v10398_v0 }
  0x32   :  { %v9738_v18 = vpack.c.bf16 %v451_v17, %v450_v16  ;;  %v453_v20 = vld [vmem:[%s12552_s27 + $0x18] sm:$0xff]  ;;  %v442_v32 = vld [vmem:[%s12553_s30 + $0x40] sm:$0xff]  ;;  %v443_v33 = vld [vmem:[%s12553_s30 + $0x48] sm:$0xff]  ;;  %2783 = vst.msk [vmem:[#allocation3 + $0x20] sm:$0xff] %vm358_vm7, %v10398_v0 }
  0x33   :  { %v9742_v21 = vpack.c.bf16 %v453_v20, %v452_v19  ;;  %v441_v31 = vld [vmem:[%s12553_s30 + $0x38] sm:$0xff]  ;;  %v444_v34 = vld [vmem:[%s12553_s30 + $0x50] sm:$0xff]  ;;  %v446_v36 = vld [vmem:[%s12553_s30 + $0x60] sm:$0xff]  ;;  %2785 = vst.msk [vmem:[#allocation3 + $0x30] sm:$0xff] %vm358_vm7, %v10398_v0 }
  0x34   :  { %7293 = vperm.xlu0 %10308, %v7288_v6   ;;  %9739 = vmatprep.subr.bf16.mxu0 %v9738_v18  ;;  %v445_v35 = vld [vmem:[%s12553_s30 + $0x58] sm:$0xff]  ;;  %v447_v37 = vld [vmem:[%s12553_s30 + $0x68] sm:$0xff]  ;;  %v448_v38 = vld [vmem:[%s12553_s30 + $0x70] sm:$0xff]  ;;  %2787 = vst.msk [vmem:[#allocation3 + $0x40] sm:$0xff] %vm358_vm7, %v10398_v0 }
  0x35   :  { %v449_v39 = vld [vmem:[%s12553_s30 + $0x78] sm:$0xff]  ;;  %2789 = vst.msk [vmem:[#allocation3 + $0x50] sm:$0xff] %vm358_vm7, %v10398_v0  ;;  %2791 = vst.msk [vmem:[#allocation3 + $0x60] sm:$0xff] %vm358_vm7, %v10398_v0  ;;  %v7779_v44 = vld [vmem:[%s12554_s2 + $0x10] sm:$0xff] }
  0x36   :  { %2793 = vst.msk [vmem:[#allocation3 + $0x70] sm:$0xff] %vm358_vm7, %v10398_v0  ;;  %2795 = vst.msk [vmem:[#allocation3 + $0x80] sm:$0xff] %vm358_vm7, %v10398_v0  ;;  %v7746_v45 = vld [vmem:[%s12554_s2 + $0x8] sm:$0xff]  ;;  %v744_v47 = vld [vmem:[%s12554_s2] sm:$0xff] }
  0x37   :  { %2797 = vst.msk [vmem:[#allocation3 + $0x90] sm:$0xff] %vm358_vm7, %v10398_v0  ;;  %2799 = vst.msk [vmem:[#allocation3 + $0xa0] sm:$0xff] %vm358_vm7, %v10398_v0  ;;  %v7796_v54 = vld [vmem:[%s12554_s2 + $0x18] sm:$0xff]  ;;  %v10814_v55 = vld [vmem:[%s12555_s28] ss:$0 sm:$0xff] }
  0x38   :  { %7395 = vperm.xlu0 %10308, %v7290_v7   ;;  %2801 = vst.msk [vmem:[#allocation3 + $0xb0] sm:$0xff] %vm358_vm7, %v10398_v0  ;;  %2803 = vst.msk [vmem:[#allocation3 + $0xc0] sm:$0xff] %vm358_vm7, %v10398_v0 }
  0x39   :  { %2805 = vst.msk [vmem:[#allocation3 + $0xd0] sm:$0xff] %vm358_vm7, %v10398_v0  ;;  %2807 = vst.msk [vmem:[#allocation3 + $0xe0] sm:$0xff] %vm358_vm7, %v10398_v0 }
  0x3a   :  { %2809 = vst.msk [vmem:[#allocation3 + $0xf0] sm:$0xff] %vm358_vm7, %v10398_v0  ;;  %2811 = vst.msk [vmem:[#allocation3 + $0x100] sm:$0xff] %vm358_vm7, %v10398_v0 }
  0x3b   :  { %2813 = vst.msk [vmem:[#allocation3 + $0x110] sm:$0xff] %vm358_vm7, %v10398_v0  ;;  %2815 = vst.msk [vmem:[#allocation3 + $0x120] sm:$0xff] %vm358_vm7, %v10398_v0 }
  0x3c   :  { %2817 = vst.msk [vmem:[#allocation3 + $0x130] sm:$0xff] %vm358_vm7, %v10398_v0  ;;  %vm12407_vm10 = vmpackc.low %vm358_vm7, %vm358_vm7 }
  0x3d   :  { %676 = vst.msk [vmem:[#allocation2 + $0x28] sm:$0x3] %vm432_vm8, %v10398_v0  ;;  %672 = vst.msk [vmem:[#allocation2 + $0x8] sm:$0x3] %vm432_vm8, %v10398_v0 }
  0x3e   :  { %674 = vst.msk [vmem:[#allocation2 + $0x18] sm:$0x3] %vm432_vm8, %v10398_v0  ;;  %678 = vst.msk [vmem:[#allocation2 + $0x38] sm:$0x3] %vm432_vm8, %v10398_v0 }
  0x3f   :  { %680 = vst.msk [vmem:[#allocation2 + $0x48] sm:$0x3] %vm432_vm8, %v10398_v0  ;;  %682 = vst.msk [vmem:[#allocation2 + $0x58] sm:$0x3] %vm432_vm8, %v10398_v0 }
  0x40   :  { %684 = vst.msk [vmem:[#allocation2 + $0x68] sm:$0x3] %vm432_vm8, %v10398_v0  ;;  %686 = vst.msk [vmem:[#allocation2 + $0x78] sm:$0x3] %vm432_vm8, %v10398_v0 }
  0x41   :  { %688 = vst.msk [vmem:[#allocation2 + $0x88] sm:$0x3] %vm432_vm8, %v10398_v0  ;;  %690 = vst.msk [vmem:[#allocation2 + $0x98] sm:$0x3] %vm432_vm8, %v10398_v0 }
  0x42   :  { %692 = vst.msk [vmem:[#allocation2 + $0xa8] sm:$0x3] %vm432_vm8, %v10398_v0  ;;  %694 = vst.msk [vmem:[#allocation2 + $0xb8] sm:$0x3] %vm432_vm8, %v10398_v0 }
  0x43   :  { %696 = vst.msk [vmem:[#allocation2 + $0xc8] sm:$0x3] %vm432_vm8, %v10398_v0  ;;  %698 = vst.msk [vmem:[#allocation2 + $0xd8] sm:$0x3] %vm432_vm8, %v10398_v0 }
  0x44   :  { %700 = vst.msk [vmem:[#allocation2 + $0xe8] sm:$0x3] %vm432_vm8, %v10398_v0  ;;  %702 = vst.msk [vmem:[#allocation2 + $0xf8] sm:$0x3] %vm432_vm8, %v10398_v0  ;;  %v745_v46 = vld [vmem:[#allocation2 + $0x1] sm:$0xff] }
  0x45   :  { %704 = vst.msk [vmem:[#allocation2 + $0x108] sm:$0x3] %vm432_vm8, %v10398_v0  ;;  %706 = vst.msk [vmem:[#allocation2 + $0x118] sm:$0x3] %vm432_vm8, %v10398_v0  ;;  %v1149_v53 = vld [vmem:[#allocation2 + $0x2] sm:$0xff] }
  0x46   :  { %708 = vst.msk [vmem:[#allocation2 + $0x128] sm:$0x3] %vm432_vm8, %v10398_v0  ;;  %710 = vst.msk [vmem:[#allocation2 + $0x138] sm:$0x3] %vm432_vm8, %v10398_v0 }
  0x47   :  { %2784 = vst.msk [vmem:[#allocation3 + $0x28] sm:$0x3] %vm2779_vm9, %v10398_v0  ;;  %2780 = vst.msk [vmem:[#allocation3 + $0x8] sm:$0x3] %vm2779_vm9, %v10398_v0 }
  0x48   :  { %2782 = vst.msk [vmem:[#allocation3 + $0x18] sm:$0x3] %vm2779_vm9, %v10398_v0  ;;  %2786 = vst.msk [vmem:[#allocation3 + $0x38] sm:$0x3] %vm2779_vm9, %v10398_v0 }
  0x49   :  { %2788 = vst.msk [vmem:[#allocation3 + $0x48] sm:$0x3] %vm2779_vm9, %v10398_v0  ;;  %2790 = vst.msk [vmem:[#allocation3 + $0x58] sm:$0x3] %vm2779_vm9, %v10398_v0 }
  0x4a   :  { %2792 = vst.msk [vmem:[#allocation3 + $0x68] sm:$0x3] %vm2779_vm9, %v10398_v0  ;;  %2794 = vst.msk [vmem:[#allocation3 + $0x78] sm:$0x3] %vm2779_vm9, %v10398_v0 }
  0x4b   :  { %2796 = vst.msk [vmem:[#allocation3 + $0x88] sm:$0x3] %vm2779_vm9, %v10398_v0  ;;  %2798 = vst.msk [vmem:[#allocation3 + $0x98] sm:$0x3] %vm2779_vm9, %v10398_v0 }
  0x4c   :  { %2800 = vst.msk [vmem:[#allocation3 + $0xa8] sm:$0x3] %vm2779_vm9, %v10398_v0  ;;  %2802 = vst.msk [vmem:[#allocation3 + $0xb8] sm:$0x3] %vm2779_vm9, %v10398_v0 }
  0x4d   :  { %2804 = vst.msk [vmem:[#allocation3 + $0xc8] sm:$0x3] %vm2779_vm9, %v10398_v0  ;;  %2806 = vst.msk [vmem:[#allocation3 + $0xd8] sm:$0x3] %vm2779_vm9, %v10398_v0 }
  0x4e   :  { %2808 = vst.msk [vmem:[#allocation3 + $0xe8] sm:$0x3] %vm2779_vm9, %v10398_v0  ;;  %2810 = vst.msk [vmem:[#allocation3 + $0xf8] sm:$0x3] %vm2779_vm9, %v10398_v0 }
  0x4f   :  { %2812 = vst.msk [vmem:[#allocation3 + $0x108] sm:$0x3] %vm2779_vm9, %v10398_v0  ;;  %2814 = vst.msk [vmem:[#allocation3 + $0x118] sm:$0x3] %vm2779_vm9, %v10398_v0 }
  0x50   :  { %2816 = vst.msk [vmem:[#allocation3 + $0x128] sm:$0x3] %vm2779_vm9, %v10398_v0  ;;  %2818 = vst.msk [vmem:[#allocation3 + $0x138] sm:$0x3] %vm2779_vm9, %v10398_v0 }
  0xaf   :  { %v186_v10 = vpop.permute.xlu0 %185 }
  0xb0   :  { %vm187_vm5 = vcmp.eq.s32.totalorder %v186_v10, 1 }
 0x100   :  { %v177_v11 = vpop.f32.mrb[0].mxu0 }
 0x101   :  { %v178_v12 = vadd.f32 %v7720_v9, %v177_v11  ;;  %v8840_v13 = vpop.f32.mrb[1].mxu0 }
 0x103   :  { %v188_v15 = vsel %vm187_vm5, %v178_v12, %v94_v3 }
 0x104   :  { %8842 = vmatpush3.msra.mxu1 %v188_v15 }
 0x105   :  { %8844 = vmatmul.mubr.msk.f32.vlgmr.msra.gmra.mrb[0].mxu1 %vm190_vm4, %v189_v14  ;;  %9735 = vmatprep.subr.bf16.mxu1 %v10401_v43 }
 0x106   :  { %8855 = vmatprep.mubr.msk.f32.mxu1 %vm10399_vm0, %v10398_v0  ;;  %9737 = vmatpush3.bf16.msra.mxu1 %v9736_v42 }
 0x107   :  { %8942 = vmatprep.subr.mxu1 %v7779_v44 }
 0x1d8   :  { %v260_v23 = vpop.f32.mrb[0].mxu1 }
 0x1d9   :  { %v8845_v24 = vpop.f32.mrb[1].mxu1  ;;  %8849 = vmatmul.mubr.msk.f32.vlgmr.msra.gmra.mrb[2].mxu0 %vm103_vm2, %v260_v23 }
 0x1da   :  { %9741 = vmatpush3.bf16.msra.mxu0 %v9738_v18  ;;  %8866 = vmatprep.mubr.msk.f32.mxu0 %vm461_vm6, %v434_v22  ;;  %v10844_v18 = vld [vmem:[%s12554_s2 + $0x20] sm:$0xff] }
 0x1db   :  { %9743 = vmatprep.subr.bf16.mxu0 %v9742_v21 }
 0x1de   :  { %9745 = vmatpush3.bf16.msra.mxu0 %v9742_v21 }
 0x1df   :  { %8890 = vmatprep.subr.mxu0 %v7746_v45 }
 0x1e1   :  { %8867 = vmatmul.mubr.msk.f32.vlgmr.msra.gmra.mrb[4].mxu0 %vm461_vm6, %v435_v25 }
 0x1e2   :  { %8869 = vmatprep.mubr.msk.f32.mxu0 %vm461_vm6, %v436_v26  ;;  %8891 = vmatpush3.msra.mxu0 %v7746_v45  ;;  %v1157_v45 = vld [vmem:[#allocation2 + $0xa2] sm:$0xff] }
 0x1e3   :  { %8916 = vmatprep.subr.mxu0 %v744_v47 }
 0x1e5   :  { %8870 = vmatmul.mubr.msk.f32.gmra.mrb[6].mxu0 %vm461_vm6, %v437_v27 }
 0x1e6   :  { %8872 = vmatprep.mubr.msk.f32.mxu0 %vm461_vm6, %v438_v28 }
 0x1e9   :  { %8873 = vmatmul.mubr.msk.f32.gmra.mrb[8].mxu0 %vm461_vm6, %v439_v29 }
 0x1ea   :  { %8875 = vmatprep.mubr.msk.f32.mxu0 %vm461_vm6, %v440_v30 }
 0x1ed   :  { %8876 = vmatmul.mubr.msk.f32.gmra.mrb[10].mxu0 %vm461_vm6, %v441_v31 }
 0x1ee   :  { %8878 = vmatprep.mubr.msk.f32.mxu0 %vm461_vm6, %v442_v32 }
 0x1f1   :  { %8879 = vmatmul.mubr.msk.f32.gmra.mrb[12].mxu0 %vm461_vm6, %v443_v33 }
 0x1f2   :  { %8881 = vmatprep.mubr.msk.f32.mxu0 %vm461_vm6, %v444_v34 }
 0x1f5   :  { %8882 = vmatmul.mubr.msk.f32.gmra.mrb[14].mxu0 %vm461_vm6, %v445_v35 }
 0x1f6   :  { %8884 = vmatprep.mubr.msk.f32.mxu0 %vm461_vm6, %v446_v36 }
 0x1f9   :  { %8885 = vmatmul.mubr.msk.f32.gmra.mrb[16].mxu0 %vm461_vm6, %v447_v37 }
 0x1fa   :  { %8887 = vmatprep.mubr.msk.f32.mxu0 %vm461_vm6, %v448_v38 }
 0x1fd   :  { %8888 = vmatmul.mubr.msk.f32.gmra.mrb[18].mxu0 %vm461_vm6, %v449_v39 }
 0x1fe   :  { %8892 = vmatprep.mubr.msk.f32.mxu0 %vm190_vm4, %v745_v46 }
 0x2ac   :  { %v344_v49 = vpop.f32.mrb[2].mxu0 }
 0x2ad   :  { %v345_v50 = vadd.f32 %v7724_v48, %v344_v49  ;;  %v8850_v51 = vpop.f32.mrb[3].mxu0 }
 0x2af   :  { %v348_v52 = vmax.f32 %v345_v50, 0.0 }
 0x2b1   :  { %8856 = vmatmul.mubr.msk.f32.vlgmr.msra.gmra.mrb[2].mxu1 %vm358_vm7, %v348_v52 }
 0x2b2   :  { %8943 = vmatpush3.msra.mxu1 %v7779_v44  ;;  %8944 = vmatprep.mubr.msk.f32.mxu1 %vm190_vm4, %v1149_v53  ;;  %v753_v44 = vld [vmem:[#allocation2 + $0xa1] sm:$0xff] }
 0x2b3   :  { %8968 = vmatprep.subr.mxu1 %v7796_v54 }
 0x2b4   :  { %v8868_v56 = vpop.f32.mrb[4].mxu0 }
 0x2b5   :  { %v582_v57 = vadd.f32 %v8868_v56, %v10814_v55  ;;  %v576_v58 = vpop.f32.mrb[5].mxu0 }
 0x2b6   :  { %v577_v59 = vadd.f32 %v10814_v55, %v576_v58 }
 0x2b7   :  { %v656_v60 = vmax.f32 %v582_v57, 0.0 }
 0x2b8   :  { %v655_v61 = vmax.f32 %v577_v59, 0.0  ;;  %v8871_v62 = vpop.f32.mrb[6].mxu0 }
 0x2b9   :  { %713 = vst.msk [vmem:[#allocation2 + $0x21] sm:$0xff] %vm190_vm4, %v656_v60  ;;  %v592_v63 = vadd.f32 %v8871_v62, %v10814_v55  ;;  %v586_v1 = vpop.f32.mrb[7].mxu0 }
 0x2ba   :  { %712 = vst.msk [vmem:[#allocation2 + $0x11] sm:$0xff] %vm190_vm4, %v655_v61  ;;  %v587_v2 = vadd.f32 %v10814_v55, %v586_v1 }
 0x2bb   :  { %v658_v3 = vmax.f32 %v592_v63, 0.0 }
 0x2bc   :  { %v657_v4 = vmax.f32 %v587_v2, 0.0  ;;  %v8874_v5 = vpop.f32.mrb[8].mxu0 }
 0x2bd   :  { %715 = vst.msk [vmem:[#allocation2 + $0x41] sm:$0xff] %vm190_vm4, %v658_v3  ;;  %v602_v6 = vadd.f32 %v8874_v5, %v10814_v55  ;;  %v596_v7 = vpop.f32.mrb[9].mxu0 }
 0x2be   :  { %714 = vst.msk [vmem:[#allocation2 + $0x31] sm:$0xff] %vm190_vm4, %v657_v4  ;;  %v597_v8 = vadd.f32 %v10814_v55, %v596_v7 }
 0x2bf   :  { %v660_v9 = vmax.f32 %v602_v6, 0.0 }
 0x2c0   :  { %v659_v10 = vmax.f32 %v597_v8, 0.0  ;;  %v8877_v11 = vpop.f32.mrb[10].mxu0  ;;  %v10839_v17 = vld [vmem:[#allocation2 + $0x21] sm:$0xff] }
 0x2c1   :  { %717 = vst.msk [vmem:[#allocation2 + $0x61] sm:$0xff] %vm190_vm4, %v660_v9  ;;  %v612_v12 = vadd.f32 %v8877_v11, %v10814_v55  ;;  %v606_v13 = vpop.f32.mrb[11].mxu0  ;;  %v10829_v14 = vld [vmem:[#allocation2 + $0x11] sm:$0xff]  ;;  %v10848_v20 = vld [vmem:[#allocation2 + $0x22] sm:$0xff] }
 0x2c2   :  { %v10831_v15 = vld [vmem:[#allocation2 + $0x12] sm:$0xff]  ;;  %716 = vst.msk [vmem:[#allocation2 + $0x51] sm:$0xff] %vm190_vm4, %v659_v10  ;;  %v607_v16 = vadd.f32 %v10814_v55, %v606_v13  ;;  %8893 = vmatmul.mubr.msk.f32.vlgmr.msra.gmra.mrb[20].mxu0 %vm190_vm4, %v10829_v14  ;;  %v728_v8 = vld [vmem:[#allocation2] sm:$0xff]  ;;  %v7830_v13 = vld [vmem:[%s12554_s2 + $0x28] sm:$0xff] }
 0x2c3   :  { %8945 = vmatmul.mubr.msk.f32.vlgmr.msra.gmra.mrb[4].mxu1 %vm190_vm4, %v10831_v15  ;;  %v662_v19 = vmax.f32 %v612_v12, 0.0  ;;  %8895 = vmatprep.mubr.msk.f32.mxu0 %vm190_vm4, %v10839_v17  ;;  %v1376_v11 = vld [vmem:[#allocation2 + $0x10] sm:$0xff]  ;;  %v10971_v12 = vld [vmem:[#allocation2 + $0x20] sm:$0xff] }
 0x2c4   :  { %8969 = vmatpush3.msra.mxu1 %v7796_v54  ;;  %v661_v21 = vmax.f32 %v607_v16, 0.0  ;;  %8947 = vmatprep.mubr.msk.f32.mxu1 %vm190_vm4, %v10848_v20  ;;  %v8880_v22 = vpop.f32.mrb[12].mxu0  ;;  %v10865_v28 = vld [vmem:[#allocation2 + $0x41] sm:$0xff] }
 0x2c5   :  { %8917 = vmatpush3.msra.mxu0 %v744_v47  ;;  %719 = vst.msk [vmem:[#allocation2 + $0x81] sm:$0xff] %vm190_vm4, %v662_v19  ;;  %v622_v23 = vadd.f32 %v8880_v22, %v10814_v55  ;;  %v616_v24 = vpop.f32.mrb[13].mxu0  ;;  %v10854_v25 = vld [vmem:[#allocation2 + $0x31] sm:$0xff]  ;;  %8994 = vmatprep.subr.mxu1 %v10844_v18  ;;  %v10867_v29 = vld [vmem:[#allocation2 + $0x42] sm:$0xff] }
 0x2c6   :  { %v10856_v26 = vld [vmem:[#allocation2 + $0x32] sm:$0xff]  ;;  %718 = vst.msk [vmem:[#allocation2 + $0x71] sm:$0xff] %vm190_vm4, %v661_v21  ;;  %v617_v27 = vadd.f32 %v10814_v55, %v616_v24  ;;  %8896 = vmatmul.mubr.msk.f32.gmra.mrb[22].mxu0 %vm190_vm4, %v10854_v25  ;;  %v10986_v19 = vld [vmem:[#allocation2 + $0x40] sm:$0xff] }
 0x2c7   :  { %8948 = vmatmul.mubr.msk.f32.gmra.mrb[6].mxu1 %vm190_vm4, %v10856_v26  ;;  %v664_v30 = vmax.f32 %v622_v23, 0.0  ;;  %8898 = vmatprep.mubr.msk.f32.mxu0 %vm190_vm4, %v10865_v28  ;;  %v10982_v16 = vld [vmem:[#allocation2 + $0x30] sm:$0xff]  ;;  %v736_v23 = vld [vmem:[#allocation2 + $0xa0] sm:$0xff] }
 0x2c8   :  { %8950 = vmatprep.mubr.msk.f32.mxu1 %vm190_vm4, %v10867_v29  ;;  %v663_v31 = vmax.f32 %v617_v27, 0.0  ;;  %v8883_v32 = vpop.f32.mrb[14].mxu0  ;;  %v10885_v38 = vld [vmem:[#allocation2 + $0x61] sm:$0xff] }
 0x2c9   :  { %721 = vst.msk [vmem:[#allocation2 + $0xc1] sm:$0xff] %vm190_vm4, %v664_v30  ;;  %v632_v33 = vadd.f32 %v8883_v32, %v10814_v55  ;;  %v626_v34 = vpop.f32.mrb[15].mxu0  ;;  %v10875_v35 = vld [vmem:[#allocation2 + $0x51] sm:$0xff]  ;;  %v10887_v39 = vld [vmem:[#allocation2 + $0x62] sm:$0xff] }
 0x2ca   :  { %v10877_v36 = vld [vmem:[#allocation2 + $0x52] sm:$0xff]  ;;  %720 = vst.msk [vmem:[#allocation2 + $0xb1] sm:$0xff] %vm190_vm4, %v663_v31  ;;  %v627_v37 = vadd.f32 %v10814_v55, %v626_v34  ;;  %8899 = vmatmul.mubr.msk.f32.gmra.mrb[24].mxu0 %vm190_vm4, %v10875_v35 }
 0x2cb   :  { %8951 = vmatmul.mubr.msk.f32.gmra.mrb[8].mxu1 %vm190_vm4, %v10877_v36  ;;  %v666_v40 = vmax.f32 %v632_v33, 0.0  ;;  %8901 = vmatprep.mubr.msk.f32.mxu0 %vm190_vm4, %v10885_v38  ;;  %v10992_v21 = vld [vmem:[#allocation2 + $0x50] sm:$0xff] }
 0x2cc   :  { %8953 = vmatprep.mubr.msk.f32.mxu1 %vm190_vm4, %v10887_v39  ;;  %v665_v41 = vmax.f32 %v627_v37, 0.0  ;;  %v8886_v42 = vpop.f32.mrb[16].mxu0  ;;  %v11010_v24 = vld [vmem:[#allocation2 + $0x80] sm:$0xff] }
 0x2cd   :  { %723 = vst.msk [vmem:[#allocation2 + $0xe1] sm:$0xff] %vm190_vm4, %v666_v40  ;;  %v642_v46 = vadd.f32 %v8886_v42, %v10814_v55  ;;  %v636_v47 = vpop.f32.mrb[17].mxu0  ;;  %v10895_v48 = vld [vmem:[#allocation2 + $0x71] sm:$0xff] }
 0x2ce   :  { %v10897_v49 = vld [vmem:[#allocation2 + $0x72] sm:$0xff]  ;;  %722 = vst.msk [vmem:[#allocation2 + $0xd1] sm:$0xff] %vm190_vm4, %v665_v41  ;;  %v637_v50 = vadd.f32 %v10814_v55, %v636_v47  ;;  %8902 = vmatmul.mubr.msk.f32.gmra.mrb[26].mxu0 %vm190_vm4, %v10895_v48 }
 0x2cf   :  { %8954 = vmatmul.mubr.msk.f32.gmra.mrb[10].mxu1 %vm190_vm4, %v10897_v49  ;;  %v668_v51 = vmax.f32 %v642_v46, 0.0  ;;  %8904 = vmatprep.mubr.msk.f32.mxu0 %vm190_vm4, %v753_v44  ;;  %v11004_v22 = vld [vmem:[#allocation2 + $0x70] sm:$0xff]  ;;  %v7864_v44 = vld [vmem:[%s12554_s2 + $0x38] sm:$0xff]  ;;  %v7881_v46 = vld [vmem:[%s12554_s2 + $0x40] sm:$0xff] }
 0x2d0   :  { %8956 = vmatprep.mubr.msk.f32.mxu1 %vm190_vm4, %v1157_v45  ;;  %v667_v52 = vmax.f32 %v637_v50, 0.0  ;;  %v8889_v53 = vpop.f32.mrb[18].mxu0  ;;  %v10919_v60 = vld [vmem:[#allocation2 + $0xc1] sm:$0xff]  ;;  %v7847_v41 = vld [vmem:[%s12554_s2 + $0x30] sm:$0xff]  ;;  %s12557_s2 = sld [smem:[#allocation17_spill]] }
 0x2d1   :  { %725 = vst.msk [vmem:[#allocation2 + $0x101] sm:$0xff] %vm190_vm4, %v668_v51  ;;  %v652_v54 = vadd.f32 %v8889_v53, %v10814_v55  ;;  %v646_v56 = vpop.f32.mrb[19].mxu0  ;;  %v10909_v57 = vld [vmem:[#allocation2 + $0xb1] sm:$0xff]  ;;  %v10921_v61 = vld [vmem:[#allocation2 + $0xc2] sm:$0xff] }
 0x2d2   :  { %v10911_v58 = vld [vmem:[#allocation2 + $0xb2] sm:$0xff]  ;;  %724 = vst.msk [vmem:[#allocation2 + $0xf1] sm:$0xff] %vm190_vm4, %v667_v52  ;;  %v647_v59 = vadd.f32 %v10814_v55, %v646_v56  ;;  %8905 = vmatmul.mubr.msk.f32.gmra.mrb[28].mxu0 %vm190_vm4, %v10909_v57  ;;  %v11018_v30 = vld [vmem:[#allocation2 + $0xc0] sm:$0xff] }
 0x2d3   :  { %8957 = vmatmul.mubr.msk.f32.gmra.mrb[12].mxu1 %vm190_vm4, %v10911_v58  ;;  %v670_v62 = vmax.f32 %v652_v54, 0.0  ;;  %8907 = vmatprep.mubr.msk.f32.mxu0 %vm190_vm4, %v10919_v60  ;;  %v1384_v27 = vld [vmem:[#allocation2 + $0xb0] sm:$0xff]  ;;  %v7900_v51 = vld [vmem:[%s12519_s15 + $0x18] sm:$0xff] }
 0x2d4   :  { %8959 = vmatprep.mubr.msk.f32.mxu1 %vm190_vm4, %v10921_v61  ;;  %v669_v63 = vmax.f32 %v647_v59, 0.0  ;;  %v10937_v2 = vld [vmem:[#allocation2 + $0xe1] sm:$0xff]  ;;  %v2065_v47 = vld [vmem:[#allocation2 + $0x90] sm:$0xff] }
 0x2d5   :  { %727 = vst.msk [vmem:[#allocation2 + $0x121] sm:$0xff] %vm190_vm4, %v670_v62  ;;  %v10928_v55 = vld [vmem:[#allocation2 + $0xd1] sm:$0xff]  ;;  %v10939_v3 = vld [vmem:[#allocation2 + $0xe2] sm:$0xff] }
 0x2d6   :  { %v10930_v1 = vld [vmem:[#allocation2 + $0xd2] sm:$0xff]  ;;  %726 = vst.msk [vmem:[#allocation2 + $0x111] sm:$0xff] %vm190_vm4, %v669_v63  ;;  %8908 = vmatmul.mubr.msk.f32.gmra.mrb[30].mxu0 %vm190_vm4, %v10928_v55  ;;  %v11029_v32 = vld [vmem:[#allocation2 + $0xe0] sm:$0xff] }
 0x2d7   :  { %8960 = vmatmul.mubr.msk.f32.gmra.mrb[14].mxu1 %vm190_vm4, %v10930_v1  ;;  %8910 = vmatprep.mubr.msk.f32.mxu0 %vm190_vm4, %v10937_v2  ;;  %v11023_v31 = vld [vmem:[#allocation2 + $0xd0] sm:$0xff] }
 0x2d8   :  { %8962 = vmatprep.mubr.msk.f32.mxu1 %vm190_vm4, %v10939_v3  ;;  %v10953_v6 = vld [vmem:[#allocation2 + $0x101] sm:$0xff]  ;;  %v7899_v50 = vld [vmem:[%s12519_s15 + $0x10] sm:$0xff] }
 0x2d9   :  { %v10945_v4 = vld [vmem:[#allocation2 + $0xf1] sm:$0xff]  ;;  %v10955_v7 = vld [vmem:[#allocation2 + $0x102] sm:$0xff]  ;;  %v9746_v52 = vpack.c.bf16 %v7900_v51, %v7899_v50 }
 0x2da   :  { %v10947_v5 = vld [vmem:[#allocation2 + $0xf2] sm:$0xff]  ;;  %8911 = vmatmul.mubr.msk.f32.gmra.mrb[32].mxu0 %vm190_vm4, %v10945_v4  ;;  %v11041_v34 = vld [vmem:[#allocation2 + $0x100] sm:$0xff] }
 0x2db   :  { %8963 = vmatmul.mubr.msk.f32.gmra.mrb[16].mxu1 %vm190_vm4, %v10947_v5  ;;  %8913 = vmatprep.mubr.msk.f32.mxu0 %vm190_vm4, %v10953_v6  ;;  %v11035_v33 = vld [vmem:[#allocation2 + $0xf0] sm:$0xff] }
 0x2dc   :  { %8965 = vmatprep.mubr.msk.f32.mxu1 %vm190_vm4, %v10955_v7  ;;  %v11053_v40 = vld [vmem:[#allocation2 + $0x120] sm:$0xff]  ;;  %9747 = vmatprep.subr.bf16.mxu0 %v9746_v52  ;;  %v2073_v53 = vld [vmem:[#allocation2 + $0x130] sm:$0xff] }
 0x2dd   :  { %v10961_v9 = vld [vmem:[#allocation2 + $0x111] sm:$0xff]  ;;  %v11094_v42 = vld [vmem:[#allocation2 + $0x121] sm:$0xff] }
 0x2de   :  { %v10963_v10 = vld [vmem:[#allocation2 + $0x112] sm:$0xff]  ;;  %8914 = vmatmul.mubr.msk.f32.gmra.mrb[34].mxu0 %vm190_vm4, %v10961_v9  ;;  %v11133_v45 = vld [vmem:[#allocation2 + $0x122] sm:$0xff] }
 0x2df   :  { %8966 = vmatmul.mubr.msk.f32.gmra.mrb[18].mxu1 %vm190_vm4, %v10963_v10  ;;  %8918 = vmatprep.mubr.msk.f32.mxu0 %vm190_vm4, %v728_v8  ;;  %v11047_v37 = vld [vmem:[#allocation2 + $0x110] sm:$0xff] }
 0x2e0   :  { %8970 = vmatprep.mubr.msk.f32.mxu1 %vm190_vm4, %v1376_v11 }
 0x2e2   :  { %8919 = vmatmul.mubr.msk.f32.vlgmr.msra.gmra.mrb[20].mxu0 %vm190_vm4, %v1376_v11 }
 0x2e3   :  { %8971 = vmatmul.mubr.msk.f32.vlgmr.msra.gmra.mrb[4].mxu1 %vm190_vm4, %v10971_v12  ;;  %8921 = vmatprep.mubr.msk.f32.mxu0 %vm190_vm4, %v10971_v12 }
 0x2e4   :  { %8995 = vmatpush3.msra.mxu1 %v10844_v18  ;;  %8973 = vmatprep.mubr.msk.f32.mxu1 %vm190_vm4, %v10982_v16  ;;  %v10998_v18 = vld [vmem:[#allocation2 + $0x60] sm:$0xff] }
 0x2e5   :  { %9020 = vmatprep.subr.mxu1 %v7830_v13  ;;  %9749 = vmatpush3.bf16.msra.mxu0 %v9746_v52 }
 0x2e6   :  { %8922 = vmatmul.mubr.msk.f32.gmra.mrb[22].mxu0 %vm190_vm4, %v10982_v16 }
 0x2e7   :  { %8974 = vmatmul.mubr.msk.f32.gmra.mrb[6].mxu1 %vm190_vm4, %v10986_v19  ;;  %8924 = vmatprep.mubr.msk.f32.mxu0 %vm190_vm4, %v10986_v19 }
 0x2e8   :  { %8976 = vmatprep.mubr.msk.f32.mxu1 %vm190_vm4, %v10992_v21 }
 0x2ea   :  { %8925 = vmatmul.mubr.msk.f32.gmra.mrb[24].mxu0 %vm190_vm4, %v10992_v21 }
 0x2eb   :  { %8977 = vmatmul.mubr.msk.f32.gmra.mrb[8].mxu1 %vm190_vm4, %v10998_v18  ;;  %8927 = vmatprep.mubr.msk.f32.mxu0 %vm190_vm4, %v10998_v18 }
 0x2ec   :  { %8979 = vmatprep.mubr.msk.f32.mxu1 %vm190_vm4, %v11004_v22 }
 0x2ee   :  { %8928 = vmatmul.mubr.msk.f32.gmra.mrb[26].mxu0 %vm190_vm4, %v11004_v22 }
 0x2ef   :  { %8980 = vmatmul.mubr.msk.f32.gmra.mrb[10].mxu1 %vm190_vm4, %v11010_v24  ;;  %8930 = vmatprep.mubr.msk.f32.mxu0 %vm190_vm4, %v736_v23 }
 0x2f0   :  { %8982 = vmatprep.mubr.msk.f32.mxu1 %vm190_vm4, %v1384_v27 }
 0x2f2   :  { %8931 = vmatmul.mubr.msk.f32.gmra.mrb[28].mxu0 %vm190_vm4, %v1384_v27 }
 0x2f3   :  { %8983 = vmatmul.mubr.msk.f32.gmra.mrb[12].mxu1 %vm190_vm4, %v11018_v30  ;;  %8933 = vmatprep.mubr.msk.f32.mxu0 %vm190_vm4, %v11018_v30 }
 0x2f4   :  { %8985 = vmatprep.mubr.msk.f32.mxu1 %vm190_vm4, %v11023_v31 }
 0x2f6   :  { %8934 = vmatmul.mubr.msk.f32.gmra.mrb[30].mxu0 %vm190_vm4, %v11023_v31 }
 0x2f7   :  { %8986 = vmatmul.mubr.msk.f32.gmra.mrb[14].mxu1 %vm190_vm4, %v11029_v32  ;;  %8936 = vmatprep.mubr.msk.f32.mxu0 %vm190_vm4, %v11029_v32 }
 0x2f8   :  { %8988 = vmatprep.mubr.msk.f32.mxu1 %vm190_vm4, %v11035_v33 }
 0x2fa   :  { %8937 = vmatmul.mubr.msk.f32.gmra.mrb[32].mxu0 %vm190_vm4, %v11035_v33 }
 0x2fb   :  { %8989 = vmatmul.mubr.msk.f32.gmra.mrb[16].mxu1 %vm190_vm4, %v11041_v34  ;;  %8939 = vmatprep.mubr.msk.f32.mxu0 %vm190_vm4, %v11041_v34 }
 0x2fc   :  { %8991 = vmatprep.mubr.msk.f32.mxu1 %vm190_vm4, %v11047_v37 }
 0x2fe   :  { %8940 = vmatmul.mubr.msk.f32.gmra.mrb[34].mxu0 %vm190_vm4, %v11047_v37 }
 0x2ff   :  { %8992 = vmatmul.mubr.msk.f32.gmra.mrb[18].mxu1 %vm190_vm4, %v11053_v40 }
 0x300   :  { %8996 = vmatprep.mubr.msk.f32.mxu1 %vm190_vm4, %v10829_v14  ;;  %v11076_v14 = vld [vmem:[#allocation2 + $0x81] sm:$0xff] }
 0x303   :  { %8997 = vmatmul.mubr.msk.f32.vlgmr.msra.gmra.mrb[4].mxu1 %vm190_vm4, %v10839_v17 }
 0x304   :  { %9021 = vmatpush3.msra.mxu1 %v7830_v13  ;;  %8999 = vmatprep.mubr.msk.f32.mxu1 %vm190_vm4, %v10854_v25 }
 0x305   :  { %9046 = vmatprep.subr.mxu1 %v7847_v41 }
 0x307   :  { %9000 = vmatmul.mubr.msk.f32.gmra.mrb[6].mxu1 %vm190_vm4, %v10865_v28 }
 0x308   :  { %9002 = vmatprep.mubr.msk.f32.mxu1 %vm190_vm4, %v10875_v35 }
 0x30b   :  { %9003 = vmatmul.mubr.msk.f32.gmra.mrb[8].mxu1 %vm190_vm4, %v10885_v38 }
 0x30c   :  { %9005 = vmatprep.mubr.msk.f32.mxu1 %vm190_vm4, %v10895_v48 }
 0x30f   :  { %9006 = vmatmul.mubr.msk.f32.gmra.mrb[10].mxu1 %vm190_vm4, %v11076_v14 }
 0x310   :  { %9008 = vmatprep.mubr.msk.f32.mxu1 %vm190_vm4, %v10909_v57 }
 0x313   :  { %9009 = vmatmul.mubr.msk.f32.gmra.mrb[12].mxu1 %vm190_vm4, %v10919_v60 }
 0x314   :  { %9011 = vmatprep.mubr.msk.f32.mxu1 %vm190_vm4, %v10928_v55 }
 0x317   :  { %9012 = vmatmul.mubr.msk.f32.gmra.mrb[14].mxu1 %vm190_vm4, %v10937_v2 }
 0x318   :  { %9014 = vmatprep.mubr.msk.f32.mxu1 %vm190_vm4, %v10945_v4 }
 0x31b   :  { %9015 = vmatmul.mubr.msk.f32.gmra.mrb[16].mxu1 %vm190_vm4, %v10953_v6 }
 0x31c   :  { %9017 = vmatprep.mubr.msk.f32.mxu1 %vm190_vm4, %v10961_v9 }
 0x31f   :  { %9018 = vmatmul.mubr.msk.f32.gmra.mrb[18].mxu1 %vm190_vm4, %v11094_v42 }
 0x320   :  { %9022 = vmatprep.mubr.msk.f32.mxu1 %vm190_vm4, %v10831_v15  ;;  %v11115_v15 = vld [vmem:[#allocation2 + $0x82] sm:$0xff] }
 0x323   :  { %9023 = vmatmul.mubr.msk.f32.vlgmr.msra.gmra.mrb[4].mxu1 %vm190_vm4, %v10848_v20 }
 0x324   :  { %9047 = vmatpush3.msra.mxu1 %v7847_v41  ;;  %9025 = vmatprep.mubr.msk.f32.mxu1 %vm190_vm4, %v10856_v26 }
 0x325   :  { %9072 = vmatprep.subr.mxu1 %v7864_v44 }
 0x327   :  { %9026 = vmatmul.mubr.msk.f32.gmra.mrb[6].mxu1 %vm190_vm4, %v10867_v29 }
 0x328   :  { %9028 = vmatprep.mubr.msk.f32.mxu1 %vm190_vm4, %v10877_v36 }
 0x32b   :  { %9029 = vmatmul.mubr.msk.f32.gmra.mrb[8].mxu1 %vm190_vm4, %v10887_v39 }
 0x32c   :  { %9031 = vmatprep.mubr.msk.f32.mxu1 %vm190_vm4, %v10897_v49 }
 0x32f   :  { %9032 = vmatmul.mubr.msk.f32.gmra.mrb[10].mxu1 %vm190_vm4, %v11115_v15 }
 0x330   :  { %9034 = vmatprep.mubr.msk.f32.mxu1 %vm190_vm4, %v10911_v58 }
 0x333   :  { %9035 = vmatmul.mubr.msk.f32.gmra.mrb[12].mxu1 %vm190_vm4, %v10921_v61 }
 0x334   :  { %9037 = vmatprep.mubr.msk.f32.mxu1 %vm190_vm4, %v10930_v1 }
 0x337   :  { %9038 = vmatmul.mubr.msk.f32.gmra.mrb[14].mxu1 %vm190_vm4, %v10939_v3 }
 0x338   :  { %9040 = vmatprep.mubr.msk.f32.mxu1 %vm190_vm4, %v10947_v5 }
 0x33b   :  { %9041 = vmatmul.mubr.msk.f32.gmra.mrb[16].mxu1 %vm190_vm4, %v10955_v7 }
 0x33c   :  { %9043 = vmatprep.mubr.msk.f32.mxu1 %vm190_vm4, %v10963_v10 }
 0x33f   :  { %9044 = vmatmul.mubr.msk.f32.gmra.mrb[18].mxu1 %vm190_vm4, %v11133_v45 }
 0x340   :  { %9048 = vmatprep.mubr.msk.f32.mxu1 %vm190_vm4, %v10971_v12 }
 0x343   :  { %9049 = vmatmul.mubr.msk.f32.vlgmr.msra.gmra.mrb[4].mxu1 %vm190_vm4, %v10982_v16 }
 0x344   :  { %9073 = vmatpush3.msra.mxu1 %v7864_v44  ;;  %9051 = vmatprep.mubr.msk.f32.mxu1 %vm190_vm4, %v10986_v19 }
 0x345   :  { %9098 = vmatprep.subr.mxu1 %v7881_v46 }
 0x347   :  { %9052 = vmatmul.mubr.msk.f32.gmra.mrb[6].mxu1 %vm190_vm4, %v10992_v21 }
 0x348   :  { %9054 = vmatprep.mubr.msk.f32.mxu1 %vm190_vm4, %v10998_v18 }
 0x34b   :  { %9055 = vmatmul.mubr.msk.f32.gmra.mrb[8].mxu1 %vm190_vm4, %v11004_v22 }
 0x34c   :  { %9057 = vmatprep.mubr.msk.f32.mxu1 %vm190_vm4, %v11010_v24 }
 0x34f   :  { %9058 = vmatmul.mubr.msk.f32.gmra.mrb[10].mxu1 %vm190_vm4, %v2065_v47 }
 0x350   :  { %9060 = vmatprep.mubr.msk.f32.mxu1 %vm190_vm4, %v11018_v30 }
 0x353   :  { %9061 = vmatmul.mubr.msk.f32.gmra.mrb[12].mxu1 %vm190_vm4, %v11023_v31 }
 0x354   :  { %9063 = vmatprep.mubr.msk.f32.mxu1 %vm190_vm4, %v11029_v32 }
 0x357   :  { %9064 = vmatmul.mubr.msk.f32.gmra.mrb[14].mxu1 %vm190_vm4, %v11035_v33 }
 0x358   :  { %9066 = vmatprep.mubr.msk.f32.mxu1 %vm190_vm4, %v11041_v34 }
 0x35b   :  { %9067 = vmatmul.mubr.msk.f32.gmra.mrb[16].mxu1 %vm190_vm4, %v11047_v37 }
 0x35c   :  { %9069 = vmatprep.mubr.msk.f32.mxu1 %vm190_vm4, %v11053_v40 }
 0x35f   :  { %9070 = vmatmul.mubr.msk.f32.gmra.mrb[18].mxu1 %vm190_vm4, %v2073_v53 }
 0x360   :  { %9074 = vmatprep.mubr.msk.f32.mxu1 %vm190_vm4, %v10839_v17  ;;  %v2292_v17 = vld [vmem:[#allocation2 + $0x91] sm:$0xff] }
 0x363   :  { %9075 = vmatmul.mubr.msk.f32.vlgmr.msra.gmra.mrb[4].mxu1 %vm190_vm4, %v10854_v25  ;;  %v2300_v25 = vld [vmem:[#allocation2 + $0x131] sm:$0xff] }
 0x364   :  { %9099 = vmatpush3.msra.mxu1 %v7881_v46  ;;  %9077 = vmatprep.mubr.msk.f32.mxu1 %vm190_vm4, %v10865_v28  ;;  %v4856_v28 = vld [vmem:[%s12520_s16] sm:$0xff] }
 0x365   :  { %9376 = vmatprep.subr.mxu1 %v10398_v0 }
 0x367   :  { %9078 = vmatmul.mubr.msk.f32.gmra.mrb[6].mxu1 %vm190_vm4, %v10875_v35  ;;  %v7727_v35 = vld [vmem:[%s12518_s14] ss:$0 sm:$0xff]  ;;  %s10403_s14 = smov [#allocation8]  }
 0x368   :  { %9080 = vmatprep.mubr.msk.f32.mxu1 %vm190_vm4, %v10885_v38  ;;  %s7705_s16 = sshll.u32 %s10403_s14, 4  ;;  %s7706_s16 = int_to_ptr.vmem [resolvable:$true] %s7705_s16 }
 0x369   :  { %s10347_s7 = scalar_lea.vmem %s7706_s16, 32  ;;  %p10352_p9 = scmp.lt.s32.totalorder %s7706_s16, %s7706_s16 }
 0x36a   :  { %p10348_p8 = scmp.ne.s32.totalorder %s7706_s16, %s10347_s7  ;;  %p10353_p10 = scmp.lt.s32.totalorder %s10347_s7, %s10347_s7 }
 0x36b   :  { %9081 = vmatmul.mubr.msk.f32.gmra.mrb[8].mxu1 %vm190_vm4, %v10895_v48 }
 0x36c   :  { %9083 = vmatprep.mubr.msk.f32.mxu1 %vm190_vm4, %v11076_v14  ;;  %v7933_v14 = vld [vmem:[%s12519_s15 + $0x20] sm:$0xff]  ;;  %p10354_p11 = por %p10353_p10, %p10352_p9 }
 0x36e   :  { %p10355_p12 = pnand %p10354_p11, %p10348_p8 }
 0x36f   :  { %9084 = vmatmul.mubr.msk.f32.gmra.mrb[10].mxu1 %vm190_vm4, %v2292_v17 }
 0x370   :  { %9086 = vmatprep.mubr.msk.f32.mxu1 %vm190_vm4, %v10919_v60 }
 0x373   :  { %9087 = vmatmul.mubr.msk.f32.gmra.mrb[12].mxu1 %vm190_vm4, %v10928_v55 }
 0x374   :  { %9089 = vmatprep.mubr.msk.f32.mxu1 %vm190_vm4, %v10937_v2 }
 0x377   :  { %9090 = vmatmul.mubr.msk.f32.gmra.mrb[14].mxu1 %vm190_vm4, %v10945_v4  ;;  %v2854_v4 = vld [vmem:[#allocation3 + $0x1] sm:$0xff] }
 0x378   :  { %9092 = vmatprep.mubr.msk.f32.mxu1 %vm190_vm4, %v10953_v6  ;;  %9128 = vmatprep.mubr.msk.f32.mxu0 %vm358_vm7, %v2854_v4  ;;  %v2853_v6 = vld [vmem:[%s12519_s15 + $0x8] sm:$0xff] }
 0x37b   :  { %9093 = vmatmul.mubr.msk.f32.gmra.mrb[16].mxu1 %vm190_vm4, %v10961_v9  ;;  %v11318_v9 = vld [vmem:[%s12556_s4] ss:$0 sm:$0xff] }
 0x37c   :  { %9095 = vmatprep.mubr.msk.f32.mxu1 %vm190_vm4, %v11094_v42  ;;  %v7934_v42 = vld [vmem:[%s12519_s15 + $0x28] sm:$0xff] }
 0x37d   :  { %v11338_v52 = vpack.c.bf16 %v7934_v42, %v7933_v14  ;;  %v11429_v14 = vld [vmem:[#allocation3] sm:$0xff] }
 0x37f   :  { %9096 = vmatmul.mubr.msk.f32.gmra.mrb[18].mxu1 %vm190_vm4, %v2300_v25 }
 0x380   :  { %9100 = vmatprep.mubr.msk.f32.mxu1 %vm190_vm4, %v10848_v20  ;;  %v2519_v20 = vld [vmem:[#allocation2 + $0x92] sm:$0xff] }
 0x383   :  { %9101 = vmatmul.mubr.msk.f32.vlgmr.msra.gmra.mrb[4].mxu1 %vm190_vm4, %v10856_v26  ;;  %v2527_v26 = vld [vmem:[#allocation2 + $0x132] sm:$0xff] }
 0x384   :  { %9103 = vmatprep.mubr.msk.f32.mxu1 %vm190_vm4, %v10867_v29  ;;  %9377 = vmatpush3.msra.mxu1 %v4856_v28  ;;  %v428_v38 = vpop.f32.mrb[2].mxu1 }
 0x385   :  { %v429_v48 = vadd.f32 %v7727_v35, %v428_v38  ;;  %v8857_v54 = vpop.f32.mrb[3].mxu1 }
 0x387   :  { %9104 = vmatmul.mubr.msk.f32.gmra.mrb[6].mxu1 %vm190_vm4, %v10877_v36  ;;  %433 = vst.msk [vmem:[#allocation8] sm:$0x3] %vm432_vm8, %v429_v48 }
 0x388   :  { %9106 = vmatprep.mubr.msk.f32.mxu1 %vm190_vm4, %v10887_v39 }
 0x38b   :  { %9107 = vmatmul.mubr.msk.f32.gmra.mrb[8].mxu1 %vm190_vm4, %v10897_v49 }
 0x38c   :  { %9109 = vmatprep.mubr.msk.f32.mxu1 %vm190_vm4, %v11115_v15 }
 0x38f   :  { %9110 = vmatmul.mubr.msk.f32.gmra.mrb[10].mxu1 %vm190_vm4, %v2519_v20 }
 0x390   :  { %9112 = vmatprep.mubr.msk.f32.mxu1 %vm190_vm4, %v10921_v61 }
 0x393   :  { %9113 = vmatmul.mubr.msk.f32.gmra.mrb[12].mxu1 %vm190_vm4, %v10930_v1 }
 0x394   :  { %9115 = vmatprep.mubr.msk.f32.mxu1 %vm190_vm4, %v10939_v3 }
 0x397   :  { %9116 = vmatmul.mubr.msk.f32.gmra.mrb[14].mxu1 %vm190_vm4, %v10947_v5  ;;  %v2852_v5 = vld [vmem:[%s12519_s15] sm:$0xff] }
 0x398   :  { %9118 = vmatprep.mubr.msk.f32.mxu1 %vm190_vm4, %v10955_v7  ;;  %v9750_v7 = vpack.c.bf16 %v2853_v6, %v2852_v5 }
 0x39a   :  { %9751 = vmatprep.subr.bf16.mxu0 %v9750_v7 }
 0x39b   :  { %9119 = vmatmul.mubr.msk.f32.gmra.mrb[16].mxu1 %vm190_vm4, %v10963_v10 }
 0x39c   :  { %9121 = vmatprep.mubr.msk.f32.mxu1 %vm190_vm4, %v11133_v45 }
 0x39f   :  { %9122 = vmatmul.mubr.msk.f32.gmra.mrb[18].mxu1 %vm190_vm4, %v2527_v26 }
 0x3a0   :  { %9378 = vmatprep.mubr.msk.f32.mxu1 %vm10399_vm0, %v10398_v0 }
 0x3a3   :  { %9379 = vmatmul.mubr.msk.f32.vlgmr.msra.gmra.mrb[20].mxu1 %vm190_vm4, %v429_v48 }
 0x3a4   :  { %9411 = vmatprep.mubr.msk.f32.mxu1 %vm358_vm7, %v2854_v4 }
 0x3b5   :  { %v8920_v29 = vpop.f32.mrb[20].mxu0 }
 0x3b6   :  { %v1070_v36 = vpop.f32.mrb[21].mxu0 }
 0x3b9   :  { %v8923_v39 = vpop.f32.mrb[22].mxu0 }
 0x3ba   :  { %v1080_v49 = vpop.f32.mrb[23].mxu0 }
 0x3bd   :  { %v8926_v56 = vpop.f32.mrb[24].mxu0 }
 0x3be   :  { %v1090_v57 = vpop.f32.mrb[25].mxu0 }
 0x3c1   :  { %v11247_v58 = vpop.f32.mrb[26].mxu0 }
 0x3c2   :  { %v11249_v59 = vpop.f32.mrb[27].mxu0 }
 0x3c5   :  { %v11251_v60 = vpop.f32.mrb[28].mxu0 }
 0x3c6   :  { %v11253_v61 = vpop.f32.mrb[29].mxu0 }
 0x3c9   :  { %v11255_v62 = vpop.f32.mrb[30].mxu0 }
 0x3ca   :  { %v11257_v63 = vpop.f32.mrb[31].mxu0 }
 0x3cd   :  { %v11259_v55 = vpop.f32.mrb[32].mxu0 }
 0x3ce   :  { %v11261_v1 = vpop.f32.mrb[33].mxu0 }
 0x3d1   :  { %v11263_v2 = vpop.f32.mrb[34].mxu0 }
 0x3d2   :  { %v11265_v3 = vpop.f32.mrb[35].mxu0 }
 0x456   :  { %v9102_v8 = vpop.f32.mrb[4].mxu1 }
 0x457   :  { %v9882_v10 = vadd.f32 %v9102_v8, %v8920_v29  ;;  %v2644_v11 = vpop.f32.mrb[5].mxu1 }
 0x458   :  { %v9883_v12 = vadd.f32 %v2644_v11, %v1070_v36 }
 0x459   :  { %v2747_v13 = vadd.f32 %v9882_v10, %v11318_v9 }
 0x45a   :  { %v2746_v16 = vadd.f32 %v9883_v12, %v11318_v9  ;;  %v9105_v19 = vpop.f32.mrb[6].mxu1 }
 0x45b   :  { %v2763_v21 = vmax.f32 %v2747_v13, 0.0  ;;  %v9884_v18 = vadd.f32 %v9105_v19, %v8923_v39  ;;  %v2654_v22 = vpop.f32.mrb[7].mxu1  ;;  %v11383_v13 = vld [vmem:[#allocation3 + $0xa1] sm:$0xff] }
 0x45c   :  { %v2762_v23 = vmax.f32 %v2746_v16, 0.0  ;;  %v9885_v24 = vadd.f32 %v2654_v22, %v1080_v49 }
 0x45d   :  { %2821 = vst.msk [vmem:[#allocation3 + $0x21] sm:$0xff] %vm358_vm7, %v2763_v21  ;;  %v2749_v27 = vadd.f32 %v9884_v18, %v11318_v9 }
 0x45e   :  { %2820 = vst.msk [vmem:[#allocation3 + $0x11] sm:$0xff] %vm358_vm7, %v2762_v23  ;;  %v2748_v30 = vadd.f32 %v9885_v24, %v11318_v9  ;;  %v9108_v31 = vpop.f32.mrb[8].mxu1 }
 0x45f   :  { %v2765_v32 = vmax.f32 %v2749_v27, 0.0  ;;  %v9886_v33 = vadd.f32 %v9108_v31, %v8926_v56  ;;  %v2664_v34 = vpop.f32.mrb[9].mxu1 }
 0x460   :  { %v2764_v37 = vmax.f32 %v2748_v30, 0.0  ;;  %v9887_v40 = vadd.f32 %v2664_v34, %v1090_v57 }
 0x461   :  { %2823 = vst.msk [vmem:[#allocation3 + $0x41] sm:$0xff] %vm358_vm7, %v2765_v32  ;;  %v2751_v41 = vadd.f32 %v9886_v33, %v11318_v9 }
 0x462   :  { %2822 = vst.msk [vmem:[#allocation3 + $0x31] sm:$0xff] %vm358_vm7, %v2764_v37  ;;  %v2750_v44 = vadd.f32 %v9887_v40, %v11318_v9  ;;  %v9111_v15 = vpop.f32.mrb[10].mxu1 }
 0x463   :  { %v2767_v45 = vmax.f32 %v2751_v41, 0.0  ;;  %v9888_v46 = vadd.f32 %v9111_v15, %v11247_v58  ;;  %v2674_v47 = vpop.f32.mrb[11].mxu1  ;;  %v7952_v15 = vld [vmem:[%s12519_s15 + $0x38] sm:$0xff] }
 0x464   :  { %v2766_v50 = vmax.f32 %v2750_v44, 0.0  ;;  %v9889_v51 = vadd.f32 %v2674_v47, %v11249_v59  ;;  %v11348_v35 = vld [vmem:[#allocation3 + $0x21] sm:$0xff]  ;;  %v7951_v44 = vld [vmem:[%s12519_s15 + $0x30] sm:$0xff] }
 0x465   :  { %2825 = vst.msk [vmem:[#allocation3 + $0x61] sm:$0xff] %vm358_vm7, %v2767_v45  ;;  %v2753_v53 = vadd.f32 %v9888_v46, %v11318_v9  ;;  %v11342_v17 = vld [vmem:[#allocation3 + $0x11] sm:$0xff]  ;;  %v9758_v45 = vpack.c.bf16 %v7952_v15, %v7951_v44  ;;  %v11447_v47 = vld [vmem:[#allocation3 + $0x20] sm:$0xff] }
 0x466   :  { %2824 = vst.msk [vmem:[#allocation3 + $0x51] sm:$0xff] %vm358_vm7, %v2766_v50  ;;  %v2752_v25 = vadd.f32 %v9889_v51, %v11318_v9  ;;  %v9114_v28 = vpop.f32.mrb[12].mxu1  ;;  %9129 = vmatmul.mubr.msk.f32.vlgmr.msra.gmra.mrb[36].mxu0 %vm358_vm7, %v11342_v17  ;;  %v11443_v46 = vld [vmem:[#allocation3 + $0x10] sm:$0xff]  ;;  %v8024_v15 = vld [vmem:[%s12519_s15 + $0x78] sm:$0xff] }
 0x467   :  { %v2769_v38 = vmax.f32 %v2753_v53, 0.0  ;;  %v9890_v48 = vadd.f32 %v9114_v28, %v11251_v60  ;;  %9753 = vmatpush3.bf16.msra.mxu0 %v9750_v7  ;;  %v2684_v54 = vpop.f32.mrb[13].mxu1  ;;  %9131 = vmatprep.mubr.msk.f32.mxu0 %vm358_vm7, %v11348_v35 }
 0x468   :  { %v2768_v20 = vmax.f32 %v2752_v25, 0.0  ;;  %v9891_v26 = vadd.f32 %v2684_v54, %v11253_v61  ;;  %9755 = vmatprep.subr.bf16.mxu0 %v11338_v52  ;;  %v11363_v56 = vld [vmem:[#allocation3 + $0x41] sm:$0xff] }
 0x469   :  { %2827 = vst.msk [vmem:[#allocation3 + $0x81] sm:$0xff] %vm358_vm7, %v2769_v38  ;;  %v2755_v29 = vadd.f32 %v9890_v48, %v11318_v9  ;;  %v11357_v36 = vld [vmem:[#allocation3 + $0x31] sm:$0xff]  ;;  %v11456_v51 = vld [vmem:[#allocation3 + $0x40] sm:$0xff] }
 0x46a   :  { %2826 = vst.msk [vmem:[#allocation3 + $0x71] sm:$0xff] %vm358_vm7, %v2768_v20  ;;  %v2754_v39 = vadd.f32 %v9891_v26, %v11318_v9  ;;  %v9117_v49 = vpop.f32.mrb[14].mxu1  ;;  %9132 = vmatmul.mubr.msk.f32.gmra.mrb[38].mxu0 %vm358_vm7, %v11357_v36  ;;  %v11452_v50 = vld [vmem:[#allocation3 + $0x30] sm:$0xff]  ;;  %v11468_v25 = vld [vmem:[#allocation3 + $0xa0] sm:$0xff] }
 0x46b   :  { %v2771_v57 = vmax.f32 %v2755_v29, 0.0  ;;  %v9892_v58 = vadd.f32 %v9117_v49, %v11255_v62  ;;  %v2694_v59 = vpop.f32.mrb[15].mxu1  ;;  %9134 = vmatprep.mubr.msk.f32.mxu0 %vm358_vm7, %v11363_v56 }
 0x46c   :  { %v2770_v60 = vmax.f32 %v2754_v39, 0.0  ;;  %v9893_v61 = vadd.f32 %v2694_v59, %v11257_v63  ;;  %v11377_v62 = vld [vmem:[#allocation3 + $0x61] sm:$0xff] }
 0x46d   :  { %2829 = vst.msk [vmem:[#allocation3 + $0xc1] sm:$0xff] %vm358_vm7, %v2771_v57  ;;  %v2757_v4 = vadd.f32 %v9892_v58, %v11318_v9  ;;  %v11371_v5 = vld [vmem:[#allocation3 + $0x51] sm:$0xff]  ;;  %v11500_v39 = vld [vmem:[#allocation3 + $0x2] sm:$0xff] }
 0x46e   :  { %2828 = vst.msk [vmem:[#allocation3 + $0xb1] sm:$0xff] %vm358_vm7, %v2770_v60  ;;  %v2756_v6 = vadd.f32 %v9893_v61, %v11318_v9  ;;  %v9120_v7 = vpop.f32.mrb[16].mxu1  ;;  %9135 = vmatmul.mubr.msk.f32.gmra.mrb[40].mxu0 %vm358_vm7, %v11371_v5  ;;  %v11460_v53 = vld [vmem:[#allocation3 + $0x50] sm:$0xff]  ;;  %v7969_v57 = vld [vmem:[%s12519_s15 + $0x40] sm:$0xff]  ;;  %v7970_v58 = vld [vmem:[%s12519_s15 + $0x48] sm:$0xff] }
 0x46f   :  { %v2773_v8 = vmax.f32 %v2757_v4, 0.0  ;;  %v9894_v10 = vadd.f32 %v9120_v7, %v11259_v55  ;;  %v2704_v63 = vpop.f32.mrb[17].mxu1  ;;  %9137 = vmatprep.mubr.msk.f32.mxu0 %vm358_vm7, %v11377_v62  ;;  %v9762_v59 = vpack.c.bf16 %v7970_v58, %v7969_v57  ;;  %v11514_v60 = vld [vmem:[#allocation3 + $0x12] sm:$0xff]  ;;  %v11518_v61 = vld [vmem:[#allocation3 + $0x22] sm:$0xff] }
 0x470   :  { %v2772_v11 = vmax.f32 %v2756_v6, 0.0  ;;  %v9895_v12 = vadd.f32 %v2704_v63, %v11261_v1  ;;  %v11522_v4 = vld [vmem:[#allocation3 + $0x32] sm:$0xff]  ;;  %v11526_v6 = vld [vmem:[#allocation3 + $0x42] sm:$0xff] }
 0x471   :  { %2831 = vst.msk [vmem:[#allocation3 + $0xe1] sm:$0xff] %vm358_vm7, %v2773_v8  ;;  %v2759_v16 = vadd.f32 %v9894_v10, %v11318_v9  ;;  %v11387_v19 = vld [vmem:[#allocation3 + $0x71] sm:$0xff]  ;;  %v11534_v8 = vld [vmem:[#allocation3 + $0x62] sm:$0xff] }
 0x472   :  { %2830 = vst.msk [vmem:[#allocation3 + $0xd1] sm:$0xff] %vm358_vm7, %v2772_v11  ;;  %v2758_v21 = vadd.f32 %v9895_v12, %v11318_v9  ;;  %v9123_v55 = vpop.f32.mrb[18].mxu1  ;;  %9138 = vmatmul.mubr.msk.f32.gmra.mrb[42].mxu0 %vm358_vm7, %v11387_v19  ;;  %v11470_v28 = vld [vmem:[#allocation3 + $0x70] sm:$0xff]  ;;  %v11538_v10 = vld [vmem:[#allocation3 + $0xa2] sm:$0xff] }
 0x473   :  { %v2775_v18 = vmax.f32 %v2759_v16, 0.0  ;;  %v9896_v22 = vadd.f32 %v9123_v55, %v11263_v2  ;;  %v2714_v1 = vpop.f32.mrb[19].mxu1  ;;  %9140 = vmatprep.mubr.msk.f32.mxu0 %vm358_vm7, %v11383_v13  ;;  %v11530_v7 = vld [vmem:[#allocation3 + $0x52] sm:$0xff]  ;;  %v8041_v57 = vld [vmem:[%s12519_s15 + $0x80] sm:$0xff]  ;;  %v8042_v58 = vld [vmem:[%s12519_s15 + $0x88] sm:$0xff] }
 0x474   :  { %v2774_v23 = vmax.f32 %v2758_v21, 0.0  ;;  %v9897_v24 = vadd.f32 %v2714_v1, %v11265_v3  ;;  %v11407_v32 = vld [vmem:[#allocation3 + $0xc1] sm:$0xff]  ;;  %v11540_v63 = vld [vmem:[#allocation3 + $0x72] sm:$0xff] }
 0x475   :  { %2833 = vst.msk [vmem:[#allocation3 + $0x101] sm:$0xff] %vm358_vm7, %v2775_v18  ;;  %v2761_v27 = vadd.f32 %v9896_v22, %v11318_v9  ;;  %v11399_v30 = vld [vmem:[#allocation3 + $0xb1] sm:$0xff]  ;;  %v11480_v48 = vld [vmem:[#allocation3 + $0xc0] sm:$0xff] }
 0x476   :  { %2832 = vst.msk [vmem:[#allocation3 + $0xf1] sm:$0xff] %vm358_vm7, %v2774_v23  ;;  %v2760_v31 = vadd.f32 %v9897_v24, %v11318_v9  ;;  %9141 = vmatmul.mubr.msk.f32.gmra.mrb[44].mxu0 %vm358_vm7, %v11399_v30  ;;  %v11405_v2 = vpop.f32.mrb[20].mxu1  ;;  %v11476_v38 = vld [vmem:[#allocation3 + $0xb0] sm:$0xff]  ;;  %v11550_v12 = vld [vmem:[#allocation3 + $0xc2] sm:$0xff]  ;;  %v7988_v23 = vld [vmem:[%s12519_s15 + $0x58] sm:$0xff] }
 0x477   :  { %v2777_v33 = vmax.f32 %v2761_v27, 0.0  ;;  %9143 = vmatprep.mubr.msk.f32.mxu0 %vm358_vm7, %v11407_v32  ;;  %v9380_v3 = vpop.f32.mrb[21].mxu1  ;;  %v11546_v11 = vld [vmem:[#allocation3 + $0xb2] sm:$0xff]  ;;  %v11594_v27 = vld [vmem:[#allocation3 + $0x80] sm:$0xff] }
 0x478   :  { %v2776_v34 = vmax.f32 %v2760_v31, 0.0  ;;  %v11417_v9 = vld [vmem:[#allocation3 + $0xe1] sm:$0xff]  ;;  %v7987_v1 = vld [vmem:[%s12519_s15 + $0x50] sm:$0xff] }
 0x479   :  { %2835 = vst.msk [vmem:[#allocation3 + $0x121] sm:$0xff] %vm358_vm7, %v2777_v33  ;;  %v11412_v37 = vld [vmem:[#allocation3 + $0xd1] sm:$0xff]  ;;  %v11488_v20 = vld [vmem:[#allocation3 + $0xe0] sm:$0xff]  ;;  %v9766_v24 = vpack.c.bf16 %v7988_v23, %v7987_v1  ;;  %v8006_v3 = vld [vmem:[%s12519_s15 + $0x68] sm:$0xff] }
 0x47a   :  { %2834 = vst.msk [vmem:[#allocation3 + $0x111] sm:$0xff] %vm358_vm7, %v2776_v34  ;;  %9144 = vmatmul.mubr.msk.f32.gmra.mrb[46].mxu0 %vm358_vm7, %v11412_v37  ;;  %v11484_v54 = vld [vmem:[#allocation3 + $0xd0] sm:$0xff]  ;;  %v11558_v21 = vld [vmem:[#allocation3 + $0xe2] sm:$0xff] }
 0x47b   :  { %9146 = vmatprep.mubr.msk.f32.mxu0 %vm358_vm7, %v11417_v9  ;;  %v11554_v16 = vld [vmem:[#allocation3 + $0xd2] sm:$0xff]  ;;  %v8005_v33 = vld [vmem:[%s12519_s15 + $0x60] sm:$0xff] }
 0x47c   :  { %v11425_v41 = vld [vmem:[#allocation3 + $0x101] sm:$0xff]  ;;  %v9770_v34 = vpack.c.bf16 %v8006_v3, %v8005_v33 }
 0x47d   :  { %v11421_v40 = vld [vmem:[#allocation3 + $0xf1] sm:$0xff]  ;;  %v11496_v29 = vld [vmem:[#allocation3 + $0x100] sm:$0xff]  ;;  %v8113_v3 = vld [vmem:[%s12522_s18 + $0x28] sm:$0xff] }
 0x47e   :  { %9147 = vmatmul.mubr.msk.f32.gmra.mrb[48].mxu0 %vm358_vm7, %v11421_v40  ;;  %v11492_v26 = vld [vmem:[#allocation3 + $0xf0] sm:$0xff]  ;;  %v11566_v18 = vld [vmem:[#allocation3 + $0x102] sm:$0xff] }
 0x47f   :  { %9149 = vmatprep.mubr.msk.f32.mxu0 %vm358_vm7, %v11425_v41  ;;  %v11562_v55 = vld [vmem:[#allocation3 + $0xf2] sm:$0xff]  ;;  %v8112_v33 = vld [vmem:[%s12522_s18 + $0x20] sm:$0xff] }
 0x480   :  { %v11612_v31 = vld [vmem:[#allocation3 + $0x120] sm:$0xff] }
 0x481   :  { %v11431_v42 = vld [vmem:[#allocation3 + $0x111] sm:$0xff]  ;;  %v11654_v44 = vld [vmem:[#allocation3 + $0x121] sm:$0xff] }
 0x482   :  { %9150 = vmatmul.mubr.msk.f32.gmra.mrb[50].mxu0 %vm358_vm7, %v11431_v42  ;;  %v11502_v49 = vld [vmem:[#allocation3 + $0x110] sm:$0xff] }
 0x483   :  { %9156 = vmatprep.mubr.msk.f32.mxu0 %vm358_vm7, %v11429_v14  ;;  %v11570_v22 = vld [vmem:[#allocation3 + $0x112] sm:$0xff] }
 0x486   :  { %9157 = vmatmul.mubr.msk.f32.vlgmr.msra.gmra.mrb[36].mxu0 %vm358_vm7, %v11443_v46 }
 0x487   :  { %9757 = vmatpush3.bf16.msra.mxu0 %v11338_v52  ;;  %9159 = vmatprep.mubr.msk.f32.mxu0 %vm358_vm7, %v11447_v47  ;;  %v11464_v52 = vld [vmem:[#allocation3 + $0x60] sm:$0xff] }
 0x488   :  { %9759 = vmatprep.subr.bf16.mxu0 %v9758_v45 }
 0x48a   :  { %9160 = vmatmul.mubr.msk.f32.gmra.mrb[38].mxu0 %vm358_vm7, %v11452_v50 }
 0x48b   :  { %9162 = vmatprep.mubr.msk.f32.mxu0 %vm358_vm7, %v11456_v51 }
 0x48e   :  { %9163 = vmatmul.mubr.msk.f32.gmra.mrb[40].mxu0 %vm358_vm7, %v11460_v53 }
 0x48f   :  { %9165 = vmatprep.mubr.msk.f32.mxu0 %vm358_vm7, %v11464_v52 }
 0x492   :  { %9166 = vmatmul.mubr.msk.f32.gmra.mrb[42].mxu0 %vm358_vm7, %v11470_v28 }
 0x493   :  { %9168 = vmatprep.mubr.msk.f32.mxu0 %vm358_vm7, %v11468_v25 }
 0x496   :  { %9169 = vmatmul.mubr.msk.f32.gmra.mrb[44].mxu0 %vm358_vm7, %v11476_v38 }
 0x497   :  { %9171 = vmatprep.mubr.msk.f32.mxu0 %vm358_vm7, %v11480_v48 }
 0x49a   :  { %9172 = vmatmul.mubr.msk.f32.gmra.mrb[46].mxu0 %vm358_vm7, %v11484_v54 }
 0x49b   :  { %9174 = vmatprep.mubr.msk.f32.mxu0 %vm358_vm7, %v11488_v20 }
 0x49e   :  { %9175 = vmatmul.mubr.msk.f32.gmra.mrb[48].mxu0 %vm358_vm7, %v11492_v26 }
 0x49f   :  { %9177 = vmatprep.mubr.msk.f32.mxu0 %vm358_vm7, %v11496_v29 }
 0x4a2   :  { %9178 = vmatmul.mubr.msk.f32.gmra.mrb[50].mxu0 %vm358_vm7, %v11502_v49 }
 0x4a3   :  { %9184 = vmatprep.mubr.msk.f32.mxu0 %vm358_vm7, %v11500_v39 }
 0x4a6   :  { %9185 = vmatmul.mubr.msk.f32.vlgmr.msra.gmra.mrb[36].mxu0 %vm358_vm7, %v11514_v60 }
 0x4a7   :  { %9761 = vmatpush3.bf16.msra.mxu0 %v9758_v45  ;;  %9187 = vmatprep.mubr.msk.f32.mxu0 %vm358_vm7, %v11518_v61 }
 0x4a8   :  { %9763 = vmatprep.subr.bf16.mxu0 %v9762_v59 }
 0x4aa   :  { %9188 = vmatmul.mubr.msk.f32.gmra.mrb[38].mxu0 %vm358_vm7, %v11522_v4 }
 0x4ab   :  { %9190 = vmatprep.mubr.msk.f32.mxu0 %vm358_vm7, %v11526_v6 }
 0x4ae   :  { %9191 = vmatmul.mubr.msk.f32.gmra.mrb[40].mxu0 %vm358_vm7, %v11530_v7 }
 0x4af   :  { %9193 = vmatprep.mubr.msk.f32.mxu0 %vm358_vm7, %v11534_v8 }
 0x4b2   :  { %9194 = vmatmul.mubr.msk.f32.gmra.mrb[42].mxu0 %vm358_vm7, %v11540_v63 }
 0x4b3   :  { %9196 = vmatprep.mubr.msk.f32.mxu0 %vm358_vm7, %v11538_v10 }
 0x4b6   :  { %9197 = vmatmul.mubr.msk.f32.gmra.mrb[44].mxu0 %vm358_vm7, %v11546_v11 }
 0x4b7   :  { %9199 = vmatprep.mubr.msk.f32.mxu0 %vm358_vm7, %v11550_v12 }
 0x4ba   :  { %9200 = vmatmul.mubr.msk.f32.gmra.mrb[46].mxu0 %vm358_vm7, %v11554_v16 }
 0x4bb   :  { %9202 = vmatprep.mubr.msk.f32.mxu0 %vm358_vm7, %v11558_v21 }
 0x4be   :  { %9203 = vmatmul.mubr.msk.f32.gmra.mrb[48].mxu0 %vm358_vm7, %v11562_v55 }
 0x4bf   :  { %9205 = vmatprep.mubr.msk.f32.mxu0 %vm358_vm7, %v11566_v18 }
 0x4c2   :  { %9206 = vmatmul.mubr.msk.f32.gmra.mrb[50].mxu0 %vm358_vm7, %v11570_v22 }
 0x4c3   :  { %9212 = vmatprep.mubr.msk.f32.mxu0 %vm358_vm7, %v11443_v46  ;;  %v3950_v46 = vld [vmem:[#allocation3 + $0x82] sm:$0xff] }
 0x4c6   :  { %9213 = vmatmul.mubr.msk.f32.vlgmr.msra.gmra.mrb[36].mxu0 %vm358_vm7, %v11447_v47 }
 0x4c7   :  { %9765 = vmatpush3.bf16.msra.mxu0 %v9762_v59  ;;  %9215 = vmatprep.mubr.msk.f32.mxu0 %vm358_vm7, %v11452_v50  ;;  %v9778_v59 = vpack.c.bf16 %v8042_v58, %v8041_v57 }
 0x4c8   :  { %9767 = vmatprep.subr.bf16.mxu0 %v9766_v24 }
 0x4ca   :  { %9216 = vmatmul.mubr.msk.f32.gmra.mrb[38].mxu0 %vm358_vm7, %v11456_v51 }
 0x4cb   :  { %9218 = vmatprep.mubr.msk.f32.mxu0 %vm358_vm7, %v11460_v53 }
 0x4ce   :  { %9219 = vmatmul.mubr.msk.f32.gmra.mrb[40].mxu0 %vm358_vm7, %v11464_v52 }
 0x4cf   :  { %9221 = vmatprep.mubr.msk.f32.mxu0 %vm358_vm7, %v11470_v28 }
 0x4d2   :  { %9222 = vmatmul.mubr.msk.f32.gmra.mrb[42].mxu0 %vm358_vm7, %v11594_v27 }
 0x4d3   :  { %9224 = vmatprep.mubr.msk.f32.mxu0 %vm358_vm7, %v11476_v38  ;;  %v3958_v38 = vld [vmem:[#allocation3 + $0x122] sm:$0xff] }
 0x4d6   :  { %9225 = vmatmul.mubr.msk.f32.gmra.mrb[44].mxu0 %vm358_vm7, %v11480_v48 }
 0x4d7   :  { %9227 = vmatprep.mubr.msk.f32.mxu0 %vm358_vm7, %v11484_v54 }
 0x4da   :  { %9228 = vmatmul.mubr.msk.f32.gmra.mrb[46].mxu0 %vm358_vm7, %v11488_v20 }
 0x4db   :  { %9230 = vmatprep.mubr.msk.f32.mxu0 %vm358_vm7, %v11492_v26 }
 0x4de   :  { %9231 = vmatmul.mubr.msk.f32.gmra.mrb[48].mxu0 %vm358_vm7, %v11496_v29 }
 0x4df   :  { %9233 = vmatprep.mubr.msk.f32.mxu0 %vm358_vm7, %v11502_v49 }
 0x4e2   :  { %9234 = vmatmul.mubr.msk.f32.gmra.mrb[50].mxu0 %vm358_vm7, %v11612_v31 }
 0x4e3   :  { %9240 = vmatprep.mubr.msk.f32.mxu0 %vm358_vm7, %v11342_v17  ;;  %v11636_v17 = vld [vmem:[#allocation3 + $0x81] sm:$0xff] }
 0x4e6   :  { %9241 = vmatmul.mubr.msk.f32.vlgmr.msra.gmra.mrb[36].mxu0 %vm358_vm7, %v11348_v35 }
 0x4e7   :  { %9769 = vmatpush3.bf16.msra.mxu0 %v9766_v24  ;;  %9243 = vmatprep.mubr.msk.f32.mxu0 %vm358_vm7, %v11357_v36 }
 0x4e8   :  { %9771 = vmatprep.subr.bf16.mxu0 %v9770_v34 }
 0x4ea   :  { %9244 = vmatmul.mubr.msk.f32.gmra.mrb[38].mxu0 %vm358_vm7, %v11363_v56 }
 0x4eb   :  { %9246 = vmatprep.mubr.msk.f32.mxu0 %vm358_vm7, %v11371_v5 }
 0x4ee   :  { %9247 = vmatmul.mubr.msk.f32.gmra.mrb[40].mxu0 %vm358_vm7, %v11377_v62 }
 0x4ef   :  { %9249 = vmatprep.mubr.msk.f32.mxu0 %vm358_vm7, %v11387_v19 }
 0x4f2   :  { %9250 = vmatmul.mubr.msk.f32.gmra.mrb[42].mxu0 %vm358_vm7, %v11636_v17 }
 0x4f3   :  { %9252 = vmatprep.mubr.msk.f32.mxu0 %vm358_vm7, %v11399_v30  ;;  %v8023_v30 = vld [vmem:[%s12519_s15 + $0x70] sm:$0xff] }
 0x4f4   :  { %v9774_v45 = vpack.c.bf16 %v8024_v15, %v8023_v30  ;;  %v11926_v15 = vpack.c.bf16 %v8113_v3, %v8112_v33 }
 0x4f6   :  { %9253 = vmatmul.mubr.msk.f32.gmra.mrb[44].mxu0 %vm358_vm7, %v11407_v32 }
 0x4f7   :  { %9255 = vmatprep.mubr.msk.f32.mxu0 %vm358_vm7, %v11412_v37 }
 0x4fa   :  { %9256 = vmatmul.mubr.msk.f32.gmra.mrb[46].mxu0 %vm358_vm7, %v11417_v9 }
 0x4fb   :  { %9258 = vmatprep.mubr.msk.f32.mxu0 %vm358_vm7, %v11421_v40 }
 0x4fe   :  { %9259 = vmatmul.mubr.msk.f32.gmra.mrb[48].mxu0 %vm358_vm7, %v11425_v41 }
 0x4ff   :  { %9261 = vmatprep.mubr.msk.f32.mxu0 %vm358_vm7, %v11431_v42 }
 0x502   :  { %9262 = vmatmul.mubr.msk.f32.gmra.mrb[50].mxu0 %vm358_vm7, %v11654_v44 }
 0x503   :  { %9268 = vmatprep.mubr.msk.f32.mxu0 %vm358_vm7, %v11514_v60  ;;  %v5245_v60 = vld [vmem:[%s12522_s18] sm:$0xff] }
 0x506   :  { %9269 = vmatmul.mubr.msk.f32.vlgmr.msra.gmra.mrb[36].mxu0 %vm358_vm7, %v11518_v61 }
 0x507   :  { %9773 = vmatpush3.bf16.msra.mxu0 %v9770_v34  ;;  %9271 = vmatprep.mubr.msk.f32.mxu0 %vm358_vm7, %v11522_v4 }
 0x508   :  { %9775 = vmatprep.subr.bf16.mxu0 %v9774_v45 }
 0x50a   :  { %9272 = vmatmul.mubr.msk.f32.gmra.mrb[38].mxu0 %vm358_vm7, %v11526_v6 }
 0x50b   :  { %9274 = vmatprep.mubr.msk.f32.mxu0 %vm358_vm7, %v11530_v7 }
 0x50e   :  { %9275 = vmatmul.mubr.msk.f32.gmra.mrb[40].mxu0 %vm358_vm7, %v11534_v8 }
 0x50f   :  { %9277 = vmatprep.mubr.msk.f32.mxu0 %vm358_vm7, %v11540_v63 }
 0x512   :  { %9278 = vmatmul.mubr.msk.f32.gmra.mrb[42].mxu0 %vm358_vm7, %v3950_v46 }
 0x513   :  { %9280 = vmatprep.mubr.msk.f32.mxu0 %vm358_vm7, %v11546_v11 }
 0x516   :  { %9281 = vmatmul.mubr.msk.f32.gmra.mrb[44].mxu0 %vm358_vm7, %v11550_v12 }
 0x517   :  { %9283 = vmatprep.mubr.msk.f32.mxu0 %vm358_vm7, %v11554_v16 }
 0x51a   :  { %9284 = vmatmul.mubr.msk.f32.gmra.mrb[46].mxu0 %vm358_vm7, %v11558_v21 }
 0x51b   :  { %9286 = vmatprep.mubr.msk.f32.mxu0 %vm358_vm7, %v11562_v55 }
 0x51e   :  { %9287 = vmatmul.mubr.msk.f32.gmra.mrb[48].mxu0 %vm358_vm7, %v11566_v18 }
 0x51f   :  { %9289 = vmatprep.mubr.msk.f32.mxu0 %vm358_vm7, %v11570_v22 }
 0x522   :  { %9290 = vmatmul.mubr.msk.f32.gmra.mrb[50].mxu0 %vm358_vm7, %v3958_v38 }
 0x523   :  { %9296 = vmatprep.mubr.msk.f32.mxu0 %vm358_vm7, %v11447_v47  ;;  %v11714_v47 = vld [vmem:[#allocation3 + $0x90] sm:$0xff] }
 0x526   :  { %9297 = vmatmul.mubr.msk.f32.vlgmr.msra.gmra.mrb[36].mxu0 %vm358_vm7, %v11452_v50  ;;  %v11732_v50 = vld [vmem:[#allocation3 + $0x130] sm:$0xff] }
 0x527   :  { %9777 = vmatpush3.bf16.msra.mxu0 %v9774_v45  ;;  %9299 = vmatprep.mubr.msk.f32.mxu0 %vm358_vm7, %v11456_v51  ;;  %v4939_v51 = vld [vmem:[%s12557_s2 + $0x48] sm:$0xff] }
 0x528   :  { %9779 = vmatprep.subr.bf16.mxu0 %v9778_v59 }
 0x52a   :  { %9300 = vmatmul.mubr.msk.f32.gmra.mrb[38].mxu0 %vm358_vm7, %v11460_v53  ;;  %v4940_v53 = vld [vmem:[%s12557_s2 + $0x50] sm:$0xff] }
 0x52b   :  { %9302 = vmatprep.mubr.msk.f32.mxu0 %vm358_vm7, %v11464_v52  ;;  %v4941_v52 = vld [vmem:[%s12557_s2 + $0x58] sm:$0xff] }
 0x52e   :  { %9303 = vmatmul.mubr.msk.f32.gmra.mrb[40].mxu0 %vm358_vm7, %v11470_v28  ;;  %v4942_v28 = vld [vmem:[%s12557_s2 + $0x60] sm:$0xff] }
 0x52f   :  { %9305 = vmatprep.mubr.msk.f32.mxu0 %vm358_vm7, %v11594_v27 }
 0x532   :  { %9306 = vmatmul.mubr.msk.f32.gmra.mrb[42].mxu0 %vm358_vm7, %v11714_v47 }
 0x533   :  { %9308 = vmatprep.mubr.msk.f32.mxu0 %vm358_vm7, %v11480_v48  ;;  %v4943_v48 = vld [vmem:[%s12557_s2 + $0x68] sm:$0xff] }
 0x536   :  { %9309 = vmatmul.mubr.msk.f32.gmra.mrb[44].mxu0 %vm358_vm7, %v11484_v54  ;;  %v4944_v54 = vld [vmem:[%s12557_s2 + $0x70] sm:$0xff] }
 0x537   :  { %9311 = vmatprep.mubr.msk.f32.mxu0 %vm358_vm7, %v11488_v20  ;;  %v4945_v20 = vld [vmem:[%s12557_s2 + $0x78] sm:$0xff] }
 0x53a   :  { %9312 = vmatmul.mubr.msk.f32.gmra.mrb[46].mxu0 %vm358_vm7, %v11492_v26  ;;  %v8078_v26 = vld [vmem:[%s12522_s18 + $0x10] sm:$0xff] }
 0x53b   :  { %9314 = vmatprep.mubr.msk.f32.mxu0 %vm358_vm7, %v11496_v29  ;;  %v8079_v29 = vld [vmem:[%s12522_s18 + $0x18] sm:$0xff] }
 0x53e   :  { %9315 = vmatmul.mubr.msk.f32.gmra.mrb[48].mxu0 %vm358_vm7, %v11502_v49  ;;  %v9782_v49 = vpack.c.bf16 %v8079_v29, %v8078_v26 }
 0x53f   :  { %9317 = vmatprep.mubr.msk.f32.mxu0 %vm358_vm7, %v11612_v31 }
 0x540   :  { %9783 = vmatprep.subr.bf16.mxu1 %v9782_v49 }
 0x541   :  { %9785 = vmatpush3.bf16.msra.mxu1 %v9782_v49 }
 0x542   :  { %9318 = vmatmul.mubr.msk.f32.gmra.mrb[50].mxu0 %vm358_vm7, %v11732_v50 }
 0x543   :  { %9324 = vmatprep.mubr.msk.f32.mxu0 %vm358_vm7, %v11348_v35  ;;  %v11752_v35 = vld [vmem:[#allocation3 + $0x91] sm:$0xff] }
 0x546   :  { %9325 = vmatmul.mubr.msk.f32.vlgmr.msra.gmra.mrb[36].mxu0 %vm358_vm7, %v11357_v36  ;;  %v11770_v36 = vld [vmem:[#allocation3 + $0x131] sm:$0xff] }
 0x547   :  { %9781 = vmatpush3.bf16.msra.mxu0 %v9778_v59  ;;  %9327 = vmatprep.mubr.msk.f32.mxu0 %vm358_vm7, %v11363_v56  ;;  %v11790_v56 = vld [vmem:[#allocation3 + $0x92] sm:$0xff] }
 0x548   :  { %9381 = vmatprep.subr.msk.mxu0 %vm107_vm1, %v11405_v2 }
 0x54a   :  { %9328 = vmatmul.mubr.msk.f32.gmra.mrb[38].mxu0 %vm358_vm7, %v11371_v5  ;;  %v11807_v5 = vld [vmem:[#allocation3 + $0x132] sm:$0xff] }
 0x54b   :  { %9330 = vmatprep.mubr.msk.f32.mxu0 %vm358_vm7, %v11377_v62  ;;  %v4930_v62 = vld [vmem:[%s12557_s2] sm:$0xff] }
 0x54e   :  { %9331 = vmatmul.mubr.msk.f32.gmra.mrb[40].mxu0 %vm358_vm7, %v11387_v19  ;;  %v4931_v19 = vld [vmem:[%s12557_s2 + $0x8] sm:$0xff] }
 0x54f   :  { %9333 = vmatprep.mubr.msk.f32.mxu0 %vm358_vm7, %v11636_v17 }
 0x552   :  { %9334 = vmatmul.mubr.msk.f32.gmra.mrb[42].mxu0 %vm358_vm7, %v11752_v35 }
 0x553   :  { %9336 = vmatprep.mubr.msk.f32.mxu0 %vm358_vm7, %v11407_v32  ;;  %v4933_v32 = vld [vmem:[%s12557_s2 + $0x18] sm:$0xff] }
 0x556   :  { %9337 = vmatmul.mubr.msk.f32.gmra.mrb[44].mxu0 %vm358_vm7, %v11412_v37  ;;  %v4934_v37 = vld [vmem:[%s12557_s2 + $0x20] sm:$0xff] }
 0x557   :  { %9339 = vmatprep.mubr.msk.f32.mxu0 %vm358_vm7, %v11417_v9  ;;  %v4935_v9 = vld [vmem:[%s12557_s2 + $0x28] sm:$0xff] }
 0x55a   :  { %9340 = vmatmul.mubr.msk.f32.gmra.mrb[46].mxu0 %vm358_vm7, %v11421_v40  ;;  %v4936_v40 = vld [vmem:[%s12557_s2 + $0x30] sm:$0xff] }
 0x55b   :  { %9342 = vmatprep.mubr.msk.f32.mxu0 %vm358_vm7, %v11425_v41  ;;  %v4937_v41 = vld [vmem:[%s12557_s2 + $0x38] sm:$0xff] }
 0x55e   :  { %9343 = vmatmul.mubr.msk.f32.gmra.mrb[48].mxu0 %vm358_vm7, %v11431_v42  ;;  %v4938_v42 = vld [vmem:[%s12557_s2 + $0x40] sm:$0xff] }
 0x55f   :  { %9345 = vmatprep.mubr.msk.f32.mxu0 %vm358_vm7, %v11654_v44 }
 0x562   :  { %9346 = vmatmul.mubr.msk.f32.gmra.mrb[50].mxu0 %vm358_vm7, %v11770_v36 }
 0x563   :  { %9352 = vmatprep.mubr.msk.f32.mxu0 %vm358_vm7, %v11518_v61  ;;  %v5246_v61 = vld [vmem:[%s12522_s18 + $0x8] sm:$0xff] }
 0x566   :  { %9353 = vmatmul.mubr.msk.f32.vlgmr.msra.gmra.mrb[36].mxu0 %vm358_vm7, %v11522_v4  ;;  %v9786_v4 = vpack.c.bf16 %v5246_v61, %v5245_v60 }
 0x567   :  { %9382 = vmatpush3.msk.msra.mxu0 %vm107_vm1, %v11405_v2  ;;  %9355 = vmatprep.mubr.msk.f32.mxu0 %vm358_vm7, %v11526_v6  ;;  %v4932_v2 = vld [vmem:[%s12557_s2 + $0x10] sm:$0xff]  ;;  %v11892_v6 = vld [vmem:[%s12521_s17] ss:$0 sm:$0xff] }
 0x568   :  { %9818 = vmatprep.subr.bf16.mxu0 %v10401_v43  ;;  %9787 = vmatprep.subr.bf16.mxu1 %v9786_v4 }
 0x56a   :  { %9356 = vmatmul.mubr.msk.f32.gmra.mrb[38].mxu0 %vm358_vm7, %v11530_v7 }
 0x56b   :  { %9358 = vmatprep.mubr.msk.f32.mxu0 %vm358_vm7, %v11534_v8 }
 0x56e   :  { %9359 = vmatmul.mubr.msk.f32.gmra.mrb[40].mxu0 %vm358_vm7, %v11540_v63 }
 0x56f   :  { %9361 = vmatprep.mubr.msk.f32.mxu0 %vm358_vm7, %v3950_v46 }
 0x572   :  { %9362 = vmatmul.mubr.msk.f32.gmra.mrb[42].mxu0 %vm358_vm7, %v11790_v56 }
 0x573   :  { %9364 = vmatprep.mubr.msk.f32.mxu0 %vm358_vm7, %v11550_v12 }
 0x576   :  { %9365 = vmatmul.mubr.msk.f32.gmra.mrb[44].mxu0 %vm358_vm7, %v11554_v16 }
 0x577   :  { %9367 = vmatprep.mubr.msk.f32.mxu0 %vm358_vm7, %v11558_v21 }
 0x57a   :  { %9368 = vmatmul.mubr.msk.f32.gmra.mrb[46].mxu0 %vm358_vm7, %v11562_v55 }
 0x57b   :  { %9370 = vmatprep.mubr.msk.f32.mxu0 %vm358_vm7, %v11566_v18 }
 0x57e   :  { %9371 = vmatmul.mubr.msk.f32.gmra.mrb[48].mxu0 %vm358_vm7, %v11570_v22 }
 0x57f   :  { %9373 = vmatprep.mubr.msk.f32.mxu0 %vm358_vm7, %v3958_v38 }
 0x582   :  { %9374 = vmatmul.mubr.msk.f32.gmra.mrb[50].mxu0 %vm358_vm7, %v11807_v5 }
 0x583   :  { %9383 = vmatprep.mubr.msk.f32.mxu0 %vm103_vm2, %v4930_v62 }
 0x586   :  { %9384 = vmatmul.mubr.msk.f32.vlgmr.msra.gmra.mrb[36].mxu0 %vm103_vm2, %v4931_v19 }
 0x587   :  { %9386 = vmatprep.mubr.msk.f32.mxu0 %vm103_vm2, %v4932_v2 }
 0x58a   :  { %9387 = vmatmul.mubr.msk.f32.gmra.mrb[38].mxu0 %vm103_vm2, %v4933_v32 }
 0x58b   :  { %9389 = vmatprep.mubr.msk.f32.mxu0 %vm103_vm2, %v4934_v37 }
 0x58e   :  { %9390 = vmatmul.mubr.msk.f32.gmra.mrb[40].mxu0 %vm103_vm2, %v4935_v9 }
 0x58f   :  { %9392 = vmatprep.mubr.msk.f32.mxu0 %vm103_vm2, %v4936_v40 }
 0x592   :  { %9393 = vmatmul.mubr.msk.f32.gmra.mrb[42].mxu0 %vm103_vm2, %v4937_v41 }
 0x593   :  { %9395 = vmatprep.mubr.msk.f32.mxu0 %vm103_vm2, %v4938_v42 }
 0x596   :  { %9396 = vmatmul.mubr.msk.f32.gmra.mrb[44].mxu0 %vm103_vm2, %v4939_v51 }
 0x597   :  { %9398 = vmatprep.mubr.msk.f32.mxu0 %vm103_vm2, %v4940_v53 }
 0x59a   :  { %9399 = vmatmul.mubr.msk.f32.gmra.mrb[46].mxu0 %vm103_vm2, %v4941_v52 }
 0x59b   :  { %9401 = vmatprep.mubr.msk.f32.mxu0 %vm103_vm2, %v4942_v28 }
 0x59e   :  { %9402 = vmatmul.mubr.msk.f32.gmra.mrb[48].mxu0 %vm103_vm2, %v4943_v48 }
 0x59f   :  { %9404 = vmatprep.mubr.msk.f32.mxu0 %vm103_vm2, %v4944_v54 }
 0x5a2   :  { %9405 = vmatmul.mubr.msk.f32.gmra.mrb[50].mxu0 %vm103_vm2, %v4945_v20 }
 0x5a3   :  { %9675 = vmatprep.mubr.msk.f32.mxu0 %vm10399_vm0, %v10398_v0 }
 0x659   :  { %v9385_v7 = vpop.f32.mrb[36].mxu0 }
 0x65a   :  { %v9898_v8 = vadd.f32 %v9385_v7, %v11892_v6  ;;  %v5063_v63 = vpop.f32.mrb[37].mxu0 }
 0x65b   :  { %v9899_v11 = vadd.f32 %v11892_v6, %v5063_v63 }
 0x65c   :  { %v5182_v12 = vmax.f32 %v9898_v8, 0.0 }
 0x65d   :  { %v5181_v16 = vmax.f32 %v9899_v11, 0.0  ;;  %v9388_v21 = vpop.f32.mrb[38].mxu0 }
 0x65e   :  { %5198 = vst.msk [vmem:[%s12529_s25 + $0x8] sm:$0xff] %vm358_vm7, %v5182_v12  ;;  %5214 = vst.msk [vmem:[#allocation3 + $0x21] sm:$0xff] %vm358_vm7, %v5182_v12  ;;  %v9900_v55 = vadd.f32 %v9388_v21, %v11892_v6  ;;  %v5073_v18 = vpop.f32.mrb[39].mxu0 }
 0x65f   :  { %5197 = vst.msk [vmem:[%s12529_s25] sm:$0xff] %vm358_vm7, %v5181_v16  ;;  %5213 = vst.msk [vmem:[#allocation3 + $0x11] sm:$0xff] %vm358_vm7, %v5181_v16  ;;  %v9901_v22 = vadd.f32 %v11892_v6, %v5073_v18 }
 0x660   :  { %v5184_v1 = vmax.f32 %v9900_v55, 0.0 }
 0x661   :  { %v5183_v23 = vmax.f32 %v9901_v22, 0.0  ;;  %v9391_v24 = vpop.f32.mrb[40].mxu0 }
 0x662   :  { %5200 = vst.msk [vmem:[%s12529_s25 + $0x18] sm:$0xff] %vm358_vm7, %v5184_v1  ;;  %5216 = vst.msk [vmem:[#allocation3 + $0x41] sm:$0xff] %vm358_vm7, %v5184_v1  ;;  %v9902_v27 = vadd.f32 %v9391_v24, %v11892_v6  ;;  %v5083_v31 = vpop.f32.mrb[41].mxu0 }
 0x663   :  { %5199 = vst.msk [vmem:[%s12529_s25 + $0x10] sm:$0xff] %vm358_vm7, %v5183_v23  ;;  %5215 = vst.msk [vmem:[#allocation3 + $0x31] sm:$0xff] %vm358_vm7, %v5183_v23  ;;  %v9903_v34 = vadd.f32 %v11892_v6, %v5083_v31  ;;  %v8131_v31 = vld [vmem:[%s12522_s18 + $0x38] sm:$0xff] }
 0x664   :  { %v5186_v17 = vmax.f32 %v9902_v27, 0.0  ;;  %v8130_v27 = vld [vmem:[%s12522_s18 + $0x30] sm:$0xff] }
 0x665   :  { %v5185_v44 = vmax.f32 %v9903_v34, 0.0  ;;  %v9394_v30 = vpop.f32.mrb[42].mxu0  ;;  %v11944_v58 = vld [vmem:[#allocation3 + $0x21] sm:$0xff]  ;;  %v9794_v33 = vpack.c.bf16 %v8131_v31, %v8130_v27  ;;  %v8203_v31 = vld [vmem:[%s12522_s18 + $0x78] sm:$0xff] }
 0x666   :  { %5202 = vst.msk [vmem:[%s12529_s25 + $0x28] sm:$0xff] %vm358_vm7, %v5186_v17  ;;  %5218 = vst.msk [vmem:[#allocation3 + $0x61] sm:$0xff] %vm358_vm7, %v5186_v17  ;;  %v9904_v45 = vadd.f32 %v9394_v30, %v11892_v6  ;;  %v5093_v46 = vpop.f32.mrb[43].mxu0  ;;  %v11934_v38 = vld [vmem:[#allocation3 + $0x11] sm:$0xff]  ;;  %v12069_v34 = vld [vmem:[#allocation3 + $0x20] sm:$0xff] }
 0x667   :  { %5201 = vst.msk [vmem:[%s12529_s25 + $0x20] sm:$0xff] %vm358_vm7, %v5185_v44  ;;  %5217 = vst.msk [vmem:[#allocation3 + $0x51] sm:$0xff] %vm358_vm7, %v5185_v44  ;;  %v9905_v57 = vadd.f32 %v11892_v6, %v5093_v46  ;;  %9412 = vmatmul.mubr.msk.f32.vlgmr.msra.gmra.mrb[22].mxu1 %vm358_vm7, %v11934_v38  ;;  %v12065_v3 = vld [vmem:[#allocation3 + $0x10] sm:$0xff] }
 0x668   :  { %v5188_v59 = vmax.f32 %v9904_v45, 0.0  ;;  %9789 = vmatpush3.bf16.msra.mxu1 %v9786_v4  ;;  %9414 = vmatprep.mubr.msk.f32.mxu1 %vm358_vm7, %v11944_v58 }
 0x669   :  { %v5187_v62 = vmax.f32 %v9905_v57, 0.0  ;;  %v9397_v19 = vpop.f32.mrb[44].mxu0  ;;  %9791 = vmatprep.subr.bf16.mxu1 %v11926_v15  ;;  %v11965_v40 = vld [vmem:[#allocation3 + $0x41] sm:$0xff] }
 0x66a   :  { %5204 = vst.msk [vmem:[%s12529_s25 + $0x38] sm:$0xff] %vm358_vm7, %v5188_v59  ;;  %5220 = vst.msk [vmem:[#allocation3 + $0x81] sm:$0xff] %vm358_vm7, %v5188_v59  ;;  %v9906_v2 = vadd.f32 %v9397_v19, %v11892_v6  ;;  %v5103_v32 = vpop.f32.mrb[45].mxu0  ;;  %v11955_v37 = vld [vmem:[#allocation3 + $0x31] sm:$0xff] }
 0x66b   :  { %5203 = vst.msk [vmem:[%s12529_s25 + $0x30] sm:$0xff] %vm358_vm7, %v5187_v62  ;;  %5219 = vst.msk [vmem:[#allocation3 + $0x71] sm:$0xff] %vm358_vm7, %v5187_v62  ;;  %v9907_v9 = vadd.f32 %v11892_v6, %v5103_v32  ;;  %9415 = vmatmul.mubr.msk.f32.gmra.mrb[24].mxu1 %vm358_vm7, %v11955_v37  ;;  %v12074_v17 = vld [vmem:[#allocation3 + $0x30] sm:$0xff]  ;;  %v8149_v32 = vld [vmem:[%s12522_s18 + $0x48] sm:$0xff] }
 0x66c   :  { %v5190_v41 = vmax.f32 %v9906_v2, 0.0  ;;  %9417 = vmatprep.mubr.msk.f32.mxu1 %vm358_vm7, %v11965_v40  ;;  %v8148_v2 = vld [vmem:[%s12522_s18 + $0x40] sm:$0xff] }
 0x66d   :  { %v5189_v42 = vmax.f32 %v9907_v9, 0.0  ;;  %v9400_v51 = vpop.f32.mrb[46].mxu0  ;;  %v11985_v54 = vld [vmem:[#allocation3 + $0x61] sm:$0xff]  ;;  %v9798_v9 = vpack.c.bf16 %v8149_v32, %v8148_v2 }
 0x66e   :  { %5206 = vst.msk [vmem:[%s12529_s25 + $0x48] sm:$0xff] %vm358_vm7, %v5190_v41  ;;  %5222 = vst.msk [vmem:[#allocation3 + $0xc1] sm:$0xff] %vm358_vm7, %v5190_v41  ;;  %v9908_v53 = vadd.f32 %v9400_v51, %v11892_v6  ;;  %v5113_v52 = vpop.f32.mrb[47].mxu0  ;;  %v11975_v28 = vld [vmem:[#allocation3 + $0x51] sm:$0xff]  ;;  %v12086_v30 = vld [vmem:[#allocation3 + $0x60] sm:$0xff] }
 0x66f   :  { %5205 = vst.msk [vmem:[%s12529_s25 + $0x40] sm:$0xff] %vm358_vm7, %v5189_v42  ;;  %5221 = vst.msk [vmem:[#allocation3 + $0xb1] sm:$0xff] %vm358_vm7, %v5189_v42  ;;  %v9909_v48 = vadd.f32 %v11892_v6, %v5113_v52  ;;  %9418 = vmatmul.mubr.msk.f32.gmra.mrb[26].mxu1 %vm358_vm7, %v11975_v28  ;;  %v12082_v44 = vld [vmem:[#allocation3 + $0x50] sm:$0xff]  ;;  %v12136_v42 = vld [vmem:[#allocation3 + $0x22] sm:$0xff] }
 0x670   :  { %v5192_v20 = vmax.f32 %v9908_v53, 0.0  ;;  %9420 = vmatprep.mubr.msk.f32.mxu1 %vm358_vm7, %v11985_v54  ;;  %v12132_v41 = vld [vmem:[#allocation3 + $0x12] sm:$0xff]  ;;  %v12144_v53 = vld [vmem:[#allocation3 + $0x42] sm:$0xff] }
 0x671   :  { %v5191_v26 = vmax.f32 %v9909_v48, 0.0  ;;  %v9403_v29 = vpop.f32.mrb[48].mxu0  ;;  %v12140_v51 = vld [vmem:[#allocation3 + $0x32] sm:$0xff]  ;;  %v12152_v52 = vld [vmem:[#allocation3 + $0x62] sm:$0xff] }
 0x672   :  { %5208 = vst.msk [vmem:[%s12529_s25 + $0x58] sm:$0xff] %vm358_vm7, %v5192_v20  ;;  %5224 = vst.msk [vmem:[#allocation3 + $0xe1] sm:$0xff] %vm358_vm7, %v5192_v20  ;;  %v9910_v49 = vadd.f32 %v9403_v29, %v11892_v6  ;;  %v5123_v60 = vpop.f32.mrb[49].mxu0  ;;  %v11995_v61 = vld [vmem:[#allocation3 + $0x71] sm:$0xff]  ;;  %v8220_v2 = vld [vmem:[%s12522_s18 + $0x80] sm:$0xff] }
 0x673   :  { %5207 = vst.msk [vmem:[%s12529_s25 + $0x50] sm:$0xff] %vm358_vm7, %v5191_v26  ;;  %5223 = vst.msk [vmem:[#allocation3 + $0xd1] sm:$0xff] %vm358_vm7, %v5191_v26  ;;  %v9911_v4 = vadd.f32 %v11892_v6, %v5123_v60  ;;  %9421 = vmatmul.mubr.msk.f32.gmra.mrb[28].mxu1 %vm358_vm7, %v11995_v61  ;;  %v12156_v48 = vld [vmem:[#allocation3 + $0x72] sm:$0xff]  ;;  %v8221_v32 = vld [vmem:[%s12522_s18 + $0x88] sm:$0xff] }
 0x674   :  { %v5194_v7 = vmax.f32 %v9910_v49, 0.0  ;;  %9423 = vmatprep.mubr.msk.f32.mxu1 %vm358_vm7, %v11383_v13 }
 0x675   :  { %v5193_v8 = vmax.f32 %v9911_v4, 0.0  ;;  %v9406_v63 = vpop.f32.mrb[50].mxu0  ;;  %v12023_v21 = vld [vmem:[#allocation3 + $0xc1] sm:$0xff] }
 0x676   :  { %5210 = vst.msk [vmem:[%s12529_s25 + $0x68] sm:$0xff] %vm358_vm7, %v5194_v7  ;;  %5226 = vst.msk [vmem:[#allocation3 + $0x101] sm:$0xff] %vm358_vm7, %v5194_v7  ;;  %v9912_v11 = vadd.f32 %v9406_v63, %v11892_v6  ;;  %v5133_v12 = vpop.f32.mrb[51].mxu0  ;;  %v12013_v16 = vld [vmem:[#allocation3 + $0xb1] sm:$0xff]  ;;  %v12100_v46 = vld [vmem:[#allocation3 + $0xc0] sm:$0xff] }
 0x677   :  { %5209 = vst.msk [vmem:[%s12529_s25 + $0x60] sm:$0xff] %vm358_vm7, %v5193_v8  ;;  %5225 = vst.msk [vmem:[#allocation3 + $0xf1] sm:$0xff] %vm358_vm7, %v5193_v8  ;;  %v9913_v13 = vadd.f32 %v11892_v6, %v5133_v12  ;;  %9424 = vmatmul.mubr.msk.f32.gmra.mrb[30].mxu1 %vm358_vm7, %v12013_v16  ;;  %v12096_v45 = vld [vmem:[#allocation3 + $0xb0] sm:$0xff]  ;;  %v12166_v26 = vld [vmem:[#allocation3 + $0xc2] sm:$0xff] }
 0x678   :  { %v5196_v55 = vmax.f32 %v9912_v11, 0.0  ;;  %9426 = vmatprep.mubr.msk.f32.mxu1 %vm358_vm7, %v12023_v21  ;;  %v12162_v20 = vld [vmem:[#allocation3 + $0xb2] sm:$0xff]  ;;  %v12210_v11 = vld [vmem:[#allocation3 + $0x80] sm:$0xff] }
 0x679   :  { %v5195_v18 = vmax.f32 %v9913_v13, 0.0  ;;  %v12041_v6 = vld [vmem:[#allocation3 + $0xe1] sm:$0xff]  ;;  %v8166_v7 = vld [vmem:[%s12522_s18 + $0x50] sm:$0xff]  ;;  %v8167_v8 = vld [vmem:[%s12522_s18 + $0x58] sm:$0xff] }
 0x67a   :  { %5212 = vst.msk [vmem:[%s12529_s25 + $0x78] sm:$0xff] %vm358_vm7, %v5196_v55  ;;  %5228 = vst.msk [vmem:[#allocation3 + $0x121] sm:$0xff] %vm358_vm7, %v5196_v55  ;;  %v12032_v22 = vld [vmem:[#allocation3 + $0xd1] sm:$0xff]  ;;  %v12108_v59 = vld [vmem:[#allocation3 + $0xe0] sm:$0xff]  ;;  %v9802_v63 = vpack.c.bf16 %v8167_v8, %v8166_v7 }
 0x67b   :  { %5211 = vst.msk [vmem:[%s12529_s25 + $0x70] sm:$0xff] %vm358_vm7, %v5195_v18  ;;  %5227 = vst.msk [vmem:[#allocation3 + $0x111] sm:$0xff] %vm358_vm7, %v5195_v18  ;;  %9427 = vmatmul.mubr.msk.f32.gmra.mrb[32].mxu1 %vm358_vm7, %v12032_v22  ;;  %v12104_v57 = vld [vmem:[#allocation3 + $0xd0] sm:$0xff]  ;;  %v12174_v49 = vld [vmem:[#allocation3 + $0xe2] sm:$0xff] }
 0x67c   :  { %9429 = vmatprep.mubr.msk.f32.mxu1 %vm358_vm7, %v12041_v6  ;;  %v12170_v29 = vld [vmem:[#allocation3 + $0xd2] sm:$0xff]  ;;  %v8184_v13 = vld [vmem:[%s12522_s18 + $0x60] sm:$0xff]  ;;  %v8185_v55 = vld [vmem:[%s12522_s18 + $0x68] sm:$0xff] }
 0x67d   :  { %v12049_v23 = vld [vmem:[#allocation3 + $0x101] sm:$0xff]  ;;  %v9806_v18 = vpack.c.bf16 %v8185_v55, %v8184_v13 }
 0x67e   :  { %v12045_v1 = vld [vmem:[#allocation3 + $0xf1] sm:$0xff]  ;;  %v12116_v62 = vld [vmem:[#allocation3 + $0x100] sm:$0xff] }
 0x67f   :  { %9430 = vmatmul.mubr.msk.f32.gmra.mrb[34].mxu1 %vm358_vm7, %v12045_v1  ;;  %v12182_v60 = vld [vmem:[#allocation3 + $0x102] sm:$0xff] }
 0x680   :  { %9432 = vmatprep.mubr.msk.f32.mxu1 %vm358_vm7, %v12049_v23 }
 0x681   :  { %v12228_v12 = vld [vmem:[#allocation3 + $0x120] sm:$0xff] }
 0x682   :  { %v12053_v24 = vld [vmem:[#allocation3 + $0x111] sm:$0xff]  ;;  %v6123_v27 = vld [vmem:[#allocation3 + $0x121] sm:$0xff] }
 0x683   :  { %9433 = vmatmul.mubr.msk.f32.gmra.mrb[36].mxu1 %vm358_vm7, %v12053_v24  ;;  %v12120_v19 = vld [vmem:[#allocation3 + $0x110] sm:$0xff] }
 0x684   :  { %9439 = vmatprep.mubr.msk.f32.mxu1 %vm358_vm7, %v11429_v14  ;;  %v12078_v14 = vld [vmem:[#allocation3 + $0x40] sm:$0xff]  ;;  %v12186_v4 = vld [vmem:[#allocation3 + $0x112] sm:$0xff] }
 0x687   :  { %9440 = vmatmul.mubr.msk.f32.vlgmr.msra.gmra.mrb[22].mxu1 %vm358_vm7, %v12065_v3 }
 0x688   :  { %9793 = vmatpush3.bf16.msra.mxu1 %v11926_v15  ;;  %9442 = vmatprep.mubr.msk.f32.mxu1 %vm358_vm7, %v12069_v34  ;;  %v12090_v15 = vld [vmem:[#allocation3 + $0x70] sm:$0xff] }
 0x689   :  { %9795 = vmatprep.subr.bf16.mxu1 %v9794_v33 }
 0x68b   :  { %9443 = vmatmul.mubr.msk.f32.gmra.mrb[24].mxu1 %vm358_vm7, %v12074_v17 }
 0x68c   :  { %9445 = vmatprep.mubr.msk.f32.mxu1 %vm358_vm7, %v12078_v14 }
 0x68f   :  { %9446 = vmatmul.mubr.msk.f32.gmra.mrb[26].mxu1 %vm358_vm7, %v12082_v44 }
 0x690   :  { %9448 = vmatprep.mubr.msk.f32.mxu1 %vm358_vm7, %v12086_v30 }
 0x693   :  { %9449 = vmatmul.mubr.msk.f32.gmra.mrb[28].mxu1 %vm358_vm7, %v12090_v15 }
 0x694   :  { %9451 = vmatprep.mubr.msk.f32.mxu1 %vm358_vm7, %v11468_v25  ;;  %v12112_v25 = vld [vmem:[#allocation3 + $0xf0] sm:$0xff] }
 0x697   :  { %9452 = vmatmul.mubr.msk.f32.gmra.mrb[30].mxu1 %vm358_vm7, %v12096_v45 }
 0x698   :  { %9454 = vmatprep.mubr.msk.f32.mxu1 %vm358_vm7, %v12100_v46 }
 0x69b   :  { %9455 = vmatmul.mubr.msk.f32.gmra.mrb[32].mxu1 %vm358_vm7, %v12104_v57 }
 0x69c   :  { %9457 = vmatprep.mubr.msk.f32.mxu1 %vm358_vm7, %v12108_v59 }
 0x69f   :  { %9458 = vmatmul.mubr.msk.f32.gmra.mrb[34].mxu1 %vm358_vm7, %v12112_v25 }
 0x6a0   :  { %9460 = vmatprep.mubr.msk.f32.mxu1 %vm358_vm7, %v12116_v62 }
 0x6a3   :  { %9461 = vmatmul.mubr.msk.f32.gmra.mrb[36].mxu1 %vm358_vm7, %v12120_v19 }
 0x6a4   :  { %9467 = vmatprep.mubr.msk.f32.mxu1 %vm358_vm7, %v11500_v39  ;;  %v12148_v39 = vld [vmem:[#allocation3 + $0x52] sm:$0xff] }
 0x6a7   :  { %9468 = vmatmul.mubr.msk.f32.vlgmr.msra.gmra.mrb[22].mxu1 %vm358_vm7, %v12132_v41 }
 0x6a8   :  { %9797 = vmatpush3.bf16.msra.mxu1 %v9794_v33  ;;  %9470 = vmatprep.mubr.msk.f32.mxu1 %vm358_vm7, %v12136_v42 }
 0x6a9   :  { %9799 = vmatprep.subr.bf16.mxu1 %v9798_v9 }
 0x6ab   :  { %9471 = vmatmul.mubr.msk.f32.gmra.mrb[24].mxu1 %vm358_vm7, %v12140_v51 }
 0x6ac   :  { %9473 = vmatprep.mubr.msk.f32.mxu1 %vm358_vm7, %v12144_v53 }
 0x6af   :  { %9474 = vmatmul.mubr.msk.f32.gmra.mrb[26].mxu1 %vm358_vm7, %v12148_v39 }
 0x6b0   :  { %9476 = vmatprep.mubr.msk.f32.mxu1 %vm358_vm7, %v12152_v52 }
 0x6b3   :  { %9477 = vmatmul.mubr.msk.f32.gmra.mrb[28].mxu1 %vm358_vm7, %v12156_v48 }
 0x6b4   :  { %9479 = vmatprep.mubr.msk.f32.mxu1 %vm358_vm7, %v11538_v10  ;;  %v12178_v10 = vld [vmem:[#allocation3 + $0xf2] sm:$0xff] }
 0x6b7   :  { %9480 = vmatmul.mubr.msk.f32.gmra.mrb[30].mxu1 %vm358_vm7, %v12162_v20 }
 0x6b8   :  { %9482 = vmatprep.mubr.msk.f32.mxu1 %vm358_vm7, %v12166_v26 }
 0x6bb   :  { %9483 = vmatmul.mubr.msk.f32.gmra.mrb[32].mxu1 %vm358_vm7, %v12170_v29 }
 0x6bc   :  { %9485 = vmatprep.mubr.msk.f32.mxu1 %vm358_vm7, %v12174_v49 }
 0x6bf   :  { %9486 = vmatmul.mubr.msk.f32.gmra.mrb[34].mxu1 %vm358_vm7, %v12178_v10 }
 0x6c0   :  { %9488 = vmatprep.mubr.msk.f32.mxu1 %vm358_vm7, %v12182_v60 }
 0x6c3   :  { %9489 = vmatmul.mubr.msk.f32.gmra.mrb[36].mxu1 %vm358_vm7, %v12186_v4 }
 0x6c4   :  { %9495 = vmatprep.mubr.msk.f32.mxu1 %vm358_vm7, %v12065_v3  ;;  %v6343_v3 = vld [vmem:[#allocation3 + $0x82] sm:$0xff] }
 0x6c7   :  { %9496 = vmatmul.mubr.msk.f32.vlgmr.msra.gmra.mrb[22].mxu1 %vm358_vm7, %v12069_v34 }
 0x6c8   :  { %9801 = vmatpush3.bf16.msra.mxu1 %v9798_v9  ;;  %9498 = vmatprep.mubr.msk.f32.mxu1 %vm358_vm7, %v12074_v17  ;;  %v9814_v9 = vpack.c.bf16 %v8221_v32, %v8220_v2  ;;  %v7289_v2 = vld [vmem:[%s12526_s22] sm:$0x3f]  ;;  %v7294_v32 = vpop.permute.xlu0 %7293  ;;  %s10402_s22 = smov 64  }
 0x6c9   :  { %9803 = vmatprep.subr.bf16.mxu1 %v9802_v63 }
 0x6cb   :  { %9499 = vmatmul.mubr.msk.f32.gmra.mrb[24].mxu1 %vm358_vm7, %v12078_v14 }
 0x6cc   :  { %9501 = vmatprep.mubr.msk.f32.mxu1 %vm358_vm7, %v12082_v44 }
 0x6cf   :  { %9502 = vmatmul.mubr.msk.f32.gmra.mrb[26].mxu1 %vm358_vm7, %v12086_v30 }
 0x6d0   :  { %9504 = vmatprep.mubr.msk.f32.mxu1 %vm358_vm7, %v12090_v15 }
 0x6d3   :  { %9505 = vmatmul.mubr.msk.f32.gmra.mrb[28].mxu1 %vm358_vm7, %v12210_v11 }
 0x6d4   :  { %9507 = vmatprep.mubr.msk.f32.mxu1 %vm358_vm7, %v12096_v45  ;;  %v6351_v45 = vld [vmem:[#allocation3 + $0x122] sm:$0xff] }
 0x6d7   :  { %9508 = vmatmul.mubr.msk.f32.gmra.mrb[30].mxu1 %vm358_vm7, %v12100_v46 }
 0x6d8   :  { %9510 = vmatprep.mubr.msk.f32.mxu1 %vm358_vm7, %v12104_v57 }
 0x6db   :  { %9511 = vmatmul.mubr.msk.f32.gmra.mrb[32].mxu1 %vm358_vm7, %v12108_v59 }
 0x6dc   :  { %9513 = vmatprep.mubr.msk.f32.mxu1 %vm358_vm7, %v12112_v25 }
 0x6df   :  { %9514 = vmatmul.mubr.msk.f32.gmra.mrb[34].mxu1 %vm358_vm7, %v12116_v62 }
 0x6e0   :  { %9516 = vmatprep.mubr.msk.f32.mxu1 %vm358_vm7, %v12120_v19 }
 0x6e3   :  { %9517 = vmatmul.mubr.msk.f32.gmra.mrb[36].mxu1 %vm358_vm7, %v12228_v12 }
 0x6e4   :  { %9523 = vmatprep.mubr.msk.f32.mxu1 %vm358_vm7, %v11934_v38  ;;  %v6115_v38 = vld [vmem:[#allocation3 + $0x81] sm:$0xff] }
 0x6e7   :  { %9524 = vmatmul.mubr.msk.f32.vlgmr.msra.gmra.mrb[22].mxu1 %vm358_vm7, %v11944_v58 }
 0x6e8   :  { %9805 = vmatpush3.bf16.msra.mxu1 %v9802_v63  ;;  %9526 = vmatprep.mubr.msk.f32.mxu1 %vm358_vm7, %v11955_v37 }
 0x6e9   :  { %9807 = vmatprep.subr.bf16.mxu1 %v9806_v18 }
 0x6eb   :  { %9527 = vmatmul.mubr.msk.f32.gmra.mrb[24].mxu1 %vm358_vm7, %v11965_v40 }
 0x6ec   :  { %9529 = vmatprep.mubr.msk.f32.mxu1 %vm358_vm7, %v11975_v28 }
 0x6ef   :  { %9530 = vmatmul.mubr.msk.f32.gmra.mrb[26].mxu1 %vm358_vm7, %v11985_v54 }
 0x6f0   :  { %9532 = vmatprep.mubr.msk.f32.mxu1 %vm358_vm7, %v11995_v61 }
 0x6f3   :  { %9533 = vmatmul.mubr.msk.f32.gmra.mrb[28].mxu1 %vm358_vm7, %v6115_v38 }
 0x6f4   :  { %9535 = vmatprep.mubr.msk.f32.mxu1 %vm358_vm7, %v12013_v16  ;;  %v8202_v16 = vld [vmem:[%s12522_s18 + $0x70] sm:$0xff] }
 0x6f5   :  { %v9810_v33 = vpack.c.bf16 %v8203_v31, %v8202_v16 }
 0x6f7   :  { %9536 = vmatmul.mubr.msk.f32.gmra.mrb[30].mxu1 %vm358_vm7, %v12023_v21 }
 0x6f8   :  { %9538 = vmatprep.mubr.msk.f32.mxu1 %vm358_vm7, %v12032_v22 }
 0x6fb   :  { %9539 = vmatmul.mubr.msk.f32.gmra.mrb[32].mxu1 %vm358_vm7, %v12041_v6 }
 0x6fc   :  { %9541 = vmatprep.mubr.msk.f32.mxu1 %vm358_vm7, %v12045_v1 }
 0x6ff   :  { %9542 = vmatmul.mubr.msk.f32.gmra.mrb[34].mxu1 %vm358_vm7, %v12049_v23 }
 0x700   :  { %9544 = vmatprep.mubr.msk.f32.mxu1 %vm358_vm7, %v12053_v24 }
 0x703   :  { %9545 = vmatmul.mubr.msk.f32.gmra.mrb[36].mxu1 %vm358_vm7, %v6123_v27 }
 0x704   :  { %9551 = vmatprep.mubr.msk.f32.mxu1 %vm358_vm7, %v12132_v41 }
 0x707   :  { %9552 = vmatmul.mubr.msk.f32.vlgmr.msra.gmra.mrb[22].mxu1 %vm358_vm7, %v12136_v42 }
 0x708   :  { %9809 = vmatpush3.bf16.msra.mxu1 %v9806_v18  ;;  %9554 = vmatprep.mubr.msk.f32.mxu1 %vm358_vm7, %v12140_v51 }
 0x709   :  { %9811 = vmatprep.subr.bf16.mxu1 %v9810_v33 }
 0x70b   :  { %9555 = vmatmul.mubr.msk.f32.gmra.mrb[24].mxu1 %vm358_vm7, %v12144_v53 }
 0x70c   :  { %9557 = vmatprep.mubr.msk.f32.mxu1 %vm358_vm7, %v12148_v39 }
 0x70f   :  { %9558 = vmatmul.mubr.msk.f32.gmra.mrb[26].mxu1 %vm358_vm7, %v12152_v52 }
 0x710   :  { %9560 = vmatprep.mubr.msk.f32.mxu1 %vm358_vm7, %v12156_v48 }
 0x713   :  { %9561 = vmatmul.mubr.msk.f32.gmra.mrb[28].mxu1 %vm358_vm7, %v6343_v3 }
 0x714   :  { %9563 = vmatprep.mubr.msk.f32.mxu1 %vm358_vm7, %v12162_v20 }
 0x717   :  { %9564 = vmatmul.mubr.msk.f32.gmra.mrb[30].mxu1 %vm358_vm7, %v12166_v26 }
 0x718   :  { %9566 = vmatprep.mubr.msk.f32.mxu1 %vm358_vm7, %v12170_v29 }
 0x71b   :  { %9567 = vmatmul.mubr.msk.f32.gmra.mrb[32].mxu1 %vm358_vm7, %v12174_v49 }
 0x71c   :  { %9569 = vmatprep.mubr.msk.f32.mxu1 %vm358_vm7, %v12178_v10 }
 0x71f   :  { %9570 = vmatmul.mubr.msk.f32.gmra.mrb[34].mxu1 %vm358_vm7, %v12182_v60 }
 0x720   :  { %9572 = vmatprep.mubr.msk.f32.mxu1 %vm358_vm7, %v12186_v4 }
 0x723   :  { %9573 = vmatmul.mubr.msk.f32.gmra.mrb[36].mxu1 %vm358_vm7, %v6351_v45 }
 0x724   :  { %9579 = vmatprep.mubr.msk.f32.mxu1 %vm358_vm7, %v12069_v34 }
 0x727   :  { %9580 = vmatmul.mubr.msk.f32.vlgmr.msra.gmra.mrb[22].mxu1 %vm358_vm7, %v12074_v17 }
 0x728   :  { %9813 = vmatpush3.bf16.msra.mxu1 %v9810_v33  ;;  %9582 = vmatprep.mubr.msk.f32.mxu1 %vm358_vm7, %v12078_v14 }
 0x729   :  { %9815 = vmatprep.subr.bf16.mxu1 %v9814_v9 }
 0x72b   :  { %9583 = vmatmul.mubr.msk.f32.gmra.mrb[24].mxu1 %vm358_vm7, %v12082_v44 }
 0x72c   :  { %9585 = vmatprep.mubr.msk.f32.mxu1 %vm358_vm7, %v12086_v30 }
 0x72f   :  { %9586 = vmatmul.mubr.msk.f32.gmra.mrb[26].mxu1 %vm358_vm7, %v12090_v15 }
 0x730   :  { %9588 = vmatprep.mubr.msk.f32.mxu1 %vm358_vm7, %v12210_v11 }
 0x733   :  { %9589 = vmatmul.mubr.msk.f32.gmra.mrb[28].mxu1 %vm358_vm7, %v11714_v47  ;;  %v8238_v47 = vld [vmem:[%s12523_s19] ss:$0 sm:$0xff] }
 0x734   :  { %9591 = vmatprep.mubr.msk.f32.mxu1 %vm358_vm7, %v12100_v46 }
 0x737   :  { %9592 = vmatmul.mubr.msk.f32.gmra.mrb[30].mxu1 %vm358_vm7, %v12104_v57 }
 0x738   :  { %9594 = vmatprep.mubr.msk.f32.mxu1 %vm358_vm7, %v12108_v59 }
 0x73b   :  { %9595 = vmatmul.mubr.msk.f32.gmra.mrb[32].mxu1 %vm358_vm7, %v12112_v25 }
 0x73c   :  { %9597 = vmatprep.mubr.msk.f32.mxu1 %vm358_vm7, %v12116_v62 }
 0x73f   :  { %9598 = vmatmul.mubr.msk.f32.gmra.mrb[34].mxu1 %vm358_vm7, %v12120_v19 }
 0x740   :  { %9600 = vmatprep.mubr.msk.f32.mxu1 %vm358_vm7, %v12228_v12 }
 0x743   :  { %9601 = vmatmul.mubr.msk.f32.gmra.mrb[36].mxu1 %vm358_vm7, %v11732_v50 }
 0x744   :  { %9607 = vmatprep.mubr.msk.f32.mxu1 %vm358_vm7, %v11944_v58 }
 0x747   :  { %9608 = vmatmul.mubr.msk.f32.vlgmr.msra.gmra.mrb[22].mxu1 %vm358_vm7, %v11955_v37 }
 0x748   :  { %9817 = vmatpush3.bf16.msra.mxu1 %v9814_v9  ;;  %9610 = vmatprep.mubr.msk.f32.mxu1 %vm358_vm7, %v11965_v40 }
 0x74b   :  { %9611 = vmatmul.mubr.msk.f32.gmra.mrb[24].mxu1 %vm358_vm7, %v11975_v28 }
 0x74c   :  { %9613 = vmatprep.mubr.msk.f32.mxu1 %vm358_vm7, %v11985_v54 }
 0x74f   :  { %9614 = vmatmul.mubr.msk.f32.gmra.mrb[26].mxu1 %vm358_vm7, %v11995_v61 }
 0x750   :  { %9616 = vmatprep.mubr.msk.f32.mxu1 %vm358_vm7, %v6115_v38 }
 0x753   :  { %9617 = vmatmul.mubr.msk.f32.gmra.mrb[28].mxu1 %vm358_vm7, %v11752_v35 }
 0x754   :  { %9619 = vmatprep.mubr.msk.f32.mxu1 %vm358_vm7, %v12023_v21 }
 0x757   :  { %9620 = vmatmul.mubr.msk.f32.gmra.mrb[30].mxu1 %vm358_vm7, %v12032_v22 }
 0x758   :  { %9622 = vmatprep.mubr.msk.f32.mxu1 %vm358_vm7, %v12041_v6 }
 0x75b   :  { %9623 = vmatmul.mubr.msk.f32.gmra.mrb[32].mxu1 %vm358_vm7, %v12045_v1 }
 0x75c   :  { %9625 = vmatprep.mubr.msk.f32.mxu1 %vm358_vm7, %v12049_v23 }
 0x75f   :  { %9626 = vmatmul.mubr.msk.f32.gmra.mrb[34].mxu1 %vm358_vm7, %v12053_v24 }
 0x760   :  { %9628 = vmatprep.mubr.msk.f32.mxu1 %vm358_vm7, %v6123_v27 }
 0x763   :  { %9629 = vmatmul.mubr.msk.f32.gmra.mrb[36].mxu1 %vm358_vm7, %v11770_v36 }
 0x764   :  { %9635 = vmatprep.mubr.msk.f32.mxu1 %vm358_vm7, %v12136_v42 }
 0x767   :  { %9636 = vmatmul.mubr.msk.f32.vlgmr.msra.gmra.mrb[22].mxu1 %vm358_vm7, %v12140_v51 }
 0x768   :  { %9638 = vmatprep.mubr.msk.f32.mxu1 %vm358_vm7, %v12144_v53 }
 0x76b   :  { %9639 = vmatmul.mubr.msk.f32.gmra.mrb[24].mxu1 %vm358_vm7, %v12148_v39 }
 0x76c   :  { %9641 = vmatprep.mubr.msk.f32.mxu1 %vm358_vm7, %v12152_v52 }
 0x76f   :  { %9642 = vmatmul.mubr.msk.f32.gmra.mrb[26].mxu1 %vm358_vm7, %v12156_v48 }
 0x770   :  { %9644 = vmatprep.mubr.msk.f32.mxu1 %vm358_vm7, %v6343_v3 }
 0x773   :  { %9645 = vmatmul.mubr.msk.f32.gmra.mrb[28].mxu1 %vm358_vm7, %v11790_v56 }
 0x774   :  { %9647 = vmatprep.mubr.msk.f32.mxu1 %vm358_vm7, %v12166_v26 }
 0x777   :  { %9648 = vmatmul.mubr.msk.f32.gmra.mrb[30].mxu1 %vm358_vm7, %v12170_v29 }
 0x778   :  { %9650 = vmatprep.mubr.msk.f32.mxu1 %vm358_vm7, %v12174_v49 }
 0x77b   :  { %9651 = vmatmul.mubr.msk.f32.gmra.mrb[32].mxu1 %vm358_vm7, %v12178_v10 }
 0x77c   :  { %9653 = vmatprep.mubr.msk.f32.mxu1 %vm358_vm7, %v12182_v60 }
 0x77f   :  { %9654 = vmatmul.mubr.msk.f32.gmra.mrb[34].mxu1 %vm358_vm7, %v12186_v4 }
 0x780   :  { %9656 = vmatprep.mubr.msk.f32.mxu1 %vm358_vm7, %v6351_v45  ;;  %v7287_v45 = vld [vmem:[%s12524_s20] sm:$0x3f] }
 0x783   :  { %9657 = vmatmul.mubr.msk.f32.gmra.mrb[36].mxu1 %vm358_vm7, %v11807_v5 }
 0x83a   :  { %v9637_v50 = vpop.f32.mrb[22].mxu1 }
 0x83b   :  { %v7256_v35 = vadd.f32 %v9637_v50, %v8238_v47  ;;  %v7153_v36 = vpop.f32.mrb[23].mxu1 }
 0x83c   :  { %v7255_v56 = vadd.f32 %v8238_v47, %v7153_v36 }
 0x83d   :  { %v7272_v58 = vmax.f32 %v7256_v35, 0.0 }
 0x83e   :  { %v7271_v37 = vmax.f32 %v7255_v56, 0.0  ;;  %v9640_v40 = vpop.f32.mrb[24].mxu1 }
 0x83f   :  { %v7258_v28 = vadd.f32 %v9640_v40, %v8238_v47  ;;  %v7163_v54 = vpop.f32.mrb[25].mxu1 }
 0x840   :  { %v9819_v5 = vpack.c.bf16 %v7272_v58, %v7271_v37  ;;  %v7257_v21 = vadd.f32 %v8238_v47, %v7163_v54  ;;  %v7396_v54 = vpop.permute.xlu0 %7395 }
 0x841   :  { %v7274_v22 = vmax.f32 %v7258_v28, 0.0 }
 0x842   :  { %v7273_v6 = vmax.f32 %v7257_v21, 0.0  ;;  %v9643_v1 = vpop.f32.mrb[26].mxu1  ;;  %9821 = vmatpush3.bf16.xpose.msk.msra.mxu0 %vm12407_vm10, %v9819_v5 }
 0x843   :  { %v7260_v23 = vadd.f32 %v9643_v1, %v8238_v47  ;;  %v7173_v24 = vpop.f32.mrb[27].mxu1  ;;  %9822 = vmatprep.subr.bf16.mxu0 %v10401_v43 }
 0x844   :  { %v9823_v34 = vpack.c.bf16 %v7274_v22, %v7273_v6  ;;  %v7259_v17 = vadd.f32 %v8238_v47, %v7173_v24 }
 0x845   :  { %v7276_v14 = vmax.f32 %v7260_v23, 0.0 }
 0x846   :  { %v7275_v44 = vmax.f32 %v7259_v17, 0.0  ;;  %v9646_v30 = vpop.f32.mrb[28].mxu1 }
 0x847   :  { %v7262_v15 = vadd.f32 %v9646_v30, %v8238_v47  ;;  %v7183_v46 = vpop.f32.mrb[29].mxu1 }
 0x848   :  { %v9827_v57 = vpack.c.bf16 %v7276_v14, %v7275_v44  ;;  %v7261_v59 = vadd.f32 %v8238_v47, %v7183_v46 }
 0x849   :  { %v7278_v25 = vmax.f32 %v7262_v15, 0.0 }
 0x84a   :  { %v7277_v62 = vmax.f32 %v7261_v59, 0.0  ;;  %v9649_v19 = vpop.f32.mrb[30].mxu1  ;;  %9825 = vmatpush3.bf16.xpose.msk.msra.mxu0 %vm12407_vm10, %v9823_v34 }
 0x84b   :  { %v7264_v41 = vadd.f32 %v9649_v19, %v8238_v47  ;;  %v7193_v42 = vpop.f32.mrb[31].mxu1  ;;  %9826 = vmatprep.subr.bf16.mxu0 %v10401_v43 }
 0x84c   :  { %v9831_v51 = vpack.c.bf16 %v7278_v25, %v7277_v62  ;;  %v7263_v53 = vadd.f32 %v8238_v47, %v7193_v42 }
 0x84d   :  { %v7280_v39 = vmax.f32 %v7264_v41, 0.0 }
 0x84e   :  { %v7279_v52 = vmax.f32 %v7263_v53, 0.0  ;;  %v9652_v48 = vpop.f32.mrb[32].mxu1 }
 0x84f   :  { %v7266_v20 = vadd.f32 %v9652_v48, %v8238_v47  ;;  %v7203_v26 = vpop.f32.mrb[33].mxu1 }
 0x850   :  { %v9851_v29 = vpack.c.bf16 %v7280_v39, %v7279_v52  ;;  %v7265_v49 = vadd.f32 %v8238_v47, %v7203_v26 }
 0x851   :  { %v7282_v10 = vmax.f32 %v7266_v20, 0.0 }
 0x852   :  { %v7281_v60 = vmax.f32 %v7265_v49, 0.0  ;;  %v9655_v4 = vpop.f32.mrb[34].mxu1  ;;  %9829 = vmatpush3.bf16.xpose.msk.msra.mxu0 %vm12407_vm10, %v9827_v57 }
 0x853   :  { %v7268_v7 = vadd.f32 %v9655_v4, %v8238_v47  ;;  %v7213_v8 = vpop.f32.mrb[35].mxu1  ;;  %9830 = vmatprep.subr.bf16.mxu0 %v10401_v43 }
 0x854   :  { %v9855_v63 = vpack.c.bf16 %v7282_v10, %v7281_v60  ;;  %v7267_v11 = vadd.f32 %v8238_v47, %v7213_v8 }
 0x855   :  { %v7284_v12 = vmax.f32 %v7268_v7, 0.0 }
 0x856   :  { %v7283_v13 = vmax.f32 %v7267_v11, 0.0  ;;  %v9658_v55 = vpop.f32.mrb[36].mxu1 }
 0x857   :  { %v7270_v18 = vadd.f32 %v9658_v55, %v8238_v47  ;;  %v7223_v38 = vpop.f32.mrb[37].mxu1 }
 0x858   :  { %v9859_v27 = vpack.c.bf16 %v7284_v12, %v7283_v13  ;;  %v7269_v16 = vadd.f32 %v8238_v47, %v7223_v38 }
 0x859   :  { %v7286_v31 = vmax.f32 %v7270_v18, 0.0 }
 0x85a   :  { %v7285_v33 = vmax.f32 %v7269_v16, 0.0  ;;  %9833 = vmatpush3.bf16.xpose.msk.msra.mxu0 %vm12407_vm10, %v9831_v51 }
 0x85b   :  { %9834 = vmatprep.subr.bf16.mxu0 %v10401_v43 }
 0x85c   :  { %v9863_v3 = vpack.c.bf16 %v7286_v31, %v7285_v33 }
 0x861   :  { %9676 = vmatmul.mubr.msk.f32.vlgmr.msra.gmra.mrb[52].mxu0 %vm358_vm7, %v7287_v45 }
 0x862   :  { %9837 = vmatpush3.bf16.xpose.msk.msra.mxu0 %vm12407_vm10, %v9819_v5  ;;  %9694 = vmatprep.mubr.msk.f32.mxu0 %vm10399_vm0, %v10398_v0 }
 0x863   :  { %9838 = vmatprep.subr.bf16.mxu0 %v10401_v43 }
 0x86a   :  { %9841 = vmatpush3.bf16.xpose.msk.msra.mxu0 %vm12407_vm10, %v9823_v34 }
 0x86b   :  { %9842 = vmatprep.subr.bf16.mxu0 %v10401_v43 }
 0x872   :  { %9845 = vmatpush3.bf16.xpose.msk.msra.mxu0 %vm12407_vm10, %v9827_v57 }
 0x873   :  { %9846 = vmatprep.subr.bf16.mxu0 %v10401_v43 }
 0x87a   :  { %9849 = vmatpush3.bf16.xpose.msk.msra.mxu0 %vm12407_vm10, %v9831_v51 }
 0x87b   :  { %9850 = vmatprep.subr.bf16.mxu0 %v10401_v43 }
 0x881   :  { %9695 = vmatmul.mubr.msk.f32.vlgmr.msra.gmra.mrb[54].mxu0 %vm358_vm7, %v7289_v2 }
 0x882   :  { %9853 = vmatpush3.bf16.xpose.msk.msra.mxu0 %vm12407_vm10, %v9851_v29  ;;  %9713 = vmatprep.mubr.msk.f32.mxu0 %vm10399_vm0, %v10398_v0 }
 0x883   :  { %9854 = vmatprep.subr.bf16.mxu0 %v10401_v43 }
 0x88a   :  { %9857 = vmatpush3.bf16.xpose.msk.msra.mxu0 %vm12407_vm10, %v9855_v63 }
 0x88b   :  { %9858 = vmatprep.subr.bf16.mxu0 %v10401_v43 }
 0x892   :  { %9861 = vmatpush3.bf16.xpose.msk.msra.mxu0 %vm12407_vm10, %v9859_v27 }
 0x893   :  { %9862 = vmatprep.subr.bf16.mxu0 %v10401_v43 }
 0x89a   :  { %9865 = vmatpush3.bf16.xpose.msk.msra.mxu0 %vm12407_vm10, %v9863_v3 }
 0x89b   :  { %9866 = vmatprep.subr.bf16.mxu0 %v10401_v43 }
 0x8a1   :  { %9714 = vmatmul.mubr.msk.f32.vlgmr.msra.gmra.mrb[56].mxu0 %vm358_vm7, %v7287_v45 }
 0x8a2   :  { %9869 = vmatpush3.bf16.xpose.msk.msra.mxu0 %vm12407_vm10, %v9851_v29  ;;  %9732 = vmatprep.mubr.msk.f32.mxu0 %vm10399_vm0, %v10398_v0 }
 0x8a3   :  { %9870 = vmatprep.subr.bf16.mxu0 %v10401_v43 }
 0x8aa   :  { %9873 = vmatpush3.bf16.xpose.msk.msra.mxu0 %vm12407_vm10, %v9855_v63 }
 0x8ab   :  { %9874 = vmatprep.subr.bf16.mxu0 %v10401_v43 }
 0x8b2   :  { %9877 = vmatpush3.bf16.xpose.msk.msra.mxu0 %vm12407_vm10, %v9859_v27 }
 0x8b3   :  { %9878 = vmatprep.subr.bf16.mxu0 %v10401_v43 }
 0x8ba   :  { %9881 = vmatpush3.bf16.xpose.msk.msra.mxu0 %vm12407_vm10, %v9863_v3 }
 0x8c1   :  { %9733 = vmatmul.mubr.msk.f32.vlgmr.msra.gmra.mrb[58].mxu0 %vm358_vm7, %v7289_v2 }
 0x934   :  { %v7389_v9 = vpop.f32.mrb[52].mxu0 }
 0x935   :  { %v7390_v0 = vadd.f32 %v7389_v9, %v7294_v32  ;;  %v9677_v47 = vpop.f32.mrb[53].mxu0 }
 0x937   :  { %v7472_v50 = vsel %vm7471_vm11, %v7390_v0, -inf }
 0x938   :  { %7473 = vmax.xlane.f32.xlu1 %v7472_v50 }
 0x954   :  { %v7467_v35 = vpop.f32.mrb[54].mxu0 }
 0x955   :  { %v9696_v36 = vpop.f32.mrb[55].mxu0  ;;  %v7468_v61 = vadd.f32 %v7467_v35, %v7396_v54 }
 0x957   :  { %v7485_v5 = vsub.f32 0.0, %v7468_v61 }
 0x959   :  { %v7486_v1 = vmul.f32 1.442695, %v7485_v5 }
 0x974   :  { %v7587_v56 = vpop.f32.mrb[56].mxu0 }
 0x975   :  { %v7588_v58 = vadd.f32 %v7587_v56, %v7294_v32  ;;  %v9715_v37 = vpop.f32.mrb[57].mxu0 }
 0x977   :  { %v7661_v43 = vsel %vm7471_vm11, %v7588_v58, -inf }
 0x978   :  { %7662 = vmax.xlane.f32.xlu1 %v7661_v43 }
 0x994   :  { %v7657_v40 = vpop.f32.mrb[58].mxu0 }
 0x995   :  { %v9734_v28 = vpop.f32.mrb[59].mxu0  ;;  %v7658_v21 = vadd.f32 %v7657_v40, %v7396_v54 }
 0x997   :  { %v7674_v23 = vsub.f32 0.0, %v7658_v21 }
 0x999   :  { %v7675_v34 = vmul.f32 1.442695, %v7674_v23 }
 0x9c5   :  { %v7474_v22 = vpop.xlane.xlu1 %7473 }
 0x9c6   :  { %v7475_v6 = vsub.f32 %v7390_v0, %v7474_v22 }
 0x9c8   :  { %v7476_v24 = vmul.f32 1.442695, %v7475_v6 }
 0x9ca   :  { %10309 = vpow2.f32 %v7476_v24 }
 0x9cb   :  { %10311 = vpow2.f32 %v7486_v1 }
 0x9cc   :  { %10313 = vpow2.f32 %v7675_v34 }
 0x9d4   :  { %v10310_v17 = vpop.eup %10309 }
 0x9d5   :  { %v10312_v14 = vpop.eup %10311  ;;  %v7478_v44 = vsel %vm7471_vm11, %v10310_v17, 0.0 }
 0x9d6   :  { %7479 = vadd.xlane.f32.xlu1 %v7478_v44  ;;  %v7488_v30 = vadd.f32 1.0, %v10312_v14  ;;  %v10314_v15 = vpop.eup %10313 }
 0x9d7   :  { %v7677_v46 = vadd.f32 1.0, %v10314_v15 }
 0x9d8   :  { %10315 = vrcp.f32 %v7488_v30 }
 0x9d9   :  { %10317 = vrcp.f32 %v7677_v46 }
 0x9e2   :  { %v10316_v57 = vpop.eup %10315 }
 0x9e3   :  { %v10318_v59 = vpop.eup %10317 }
 0x9e7   :  { %7492 = vrot.lane.b32.xlu1 %v10316_v57, %s10402_s22 }
 0x9eb   :  { %7681 = vrot.lane.b32.xlu1 %v10318_v59, %s10402_s22 }
 0xa05   :  { %v7663_v25 = vpop.xlane.xlu1 %7662 }
 0xa06   :  { %v7664_v62 = vsub.f32 %v7588_v58, %v7663_v25 }
 0xa08   :  { %v7665_v19 = vmul.f32 1.442695, %v7664_v62 }
 0xa0a   :  { %10319 = vpow2.f32 %v7665_v19 }
 0xa14   :  { %v10320_v41 = vpop.eup %10319 }
 0xa15   :  { %v7667_v42 = vsel %vm7471_vm11, %v10320_v41, 0.0 }
 0xa16   :  { %7668 = vadd.xlane.f32.xlu0 %v7667_v42 }
 0xa17   :  { %10358 = shalt.err (!%p10355_p12)
}
 0xa18   :  { %s10359_s8 = scalar_lea.hbm %s12530_s26, 32 }
 0xa19   :  { %p10360_p13 = scmp.ne.s32.totalorder %s12530_s26, %s10359_s8  ;;  %p10363_p0 = scmp.lt.u32.totalorder %s10359_s8, %s12530_s26 }
 0xa1b   :  { %p10365_p1 = pnand %p10363_p0, %p10360_p13 }
 0xa1d   :  { %10368 = shalt.err (!%p10365_p1)
}
 0xa1e   :  { %7708 = dma.vmem_to_hbm [thread:$0]  %s7706_s16, 32, %s12530_s26, [#allocation9]   ;;  %vm7495_vm12 = vcmask 1046016  }
 0xa1f   :  { %s10404_s30 = smov [#allocation7]  }
 0xa20   :  { %s7690_s17 = sshll.u32 %s10404_s30, 4  ;;  %s7691_s17 = int_to_ptr.vmem [resolvable:$true] %s7690_s17 }
 0xa21   :  { %s10369_s26 = scalar_lea.vmem %s7691_s17, 256  ;;  %p10374_p3 = scmp.lt.s32.totalorder %s7691_s17, %s7691_s17 }
 0xa22   :  { %p10370_p2 = scmp.ne.s32.totalorder %s7691_s17, %s10369_s26  ;;  %p10375_p4 = scmp.lt.s32.totalorder %s10369_s26, %s10369_s26 }
 0xa24   :  { %p10376_p5 = por %p10375_p4, %p10374_p3 }
 0xa26   :  { %p10377_p6 = pnand %p10376_p5, %p10370_p2 }
 0xa63   :  { %v7480_v51 = vpop.xlane.xlu1 %7479 }
 0xa64   :  { %10321 = vlog2.f32 %v7480_v51 }
 0xa67   :  { %v7493_v48 = vpop.permute.xlu1 %7492 }
 0xa6b   :  { %v7682_v10 = vpop.permute.xlu1 %7681 }
 0xa6e   :  { %v10322_v53 = vpop.eup %10321 }
 0xa6f   :  { %v7482_v39 = vmul.f32 0.6931472, %v10322_v53 }
 0xa71   :  { %v7483_v52 = vsub.f32 %v7475_v6, %v7482_v39 }
 0xa73   :  { %7484 = vst.msk [vmem:[#allocation7] sm:$0x3f] %vm7471_vm11, %v7483_v52 }
 0xa74   :  { %7496 = vst.msk [vmem:[#allocation7] sm:$0x3f] %vm7495_vm12, %v7493_v48 }
 0xaa3   :  { %v7669_v20 = vpop.xlane.xlu0 %7668 }
 0xaa4   :  { %10323 = vlog2.f32 %v7669_v20 }
 0xaae   :  { %v10324_v26 = vpop.eup %10323 }
 0xaaf   :  { %v7671_v29 = vmul.f32 0.6931472, %v10324_v26 }
 0xab1   :  { %v7672_v49 = vsub.f32 %v7664_v62, %v7671_v29 }
 0xab3   :  { %7673 = vst.msk [vmem:[#allocation7 + $0x6] sm:$0x3f] %vm7471_vm11, %v7672_v49 }
 0xab4   :  { %7684 = vst.msk [vmem:[#allocation7 + $0x6] sm:$0x3f] %vm7495_vm12, %v7682_v10 }
 0xab5   :  { %10380 = shalt.err (!%p10377_p6)
}
 0xab6   :  { %s10381_s23 = scalar_lea.hbm %s12528_s24, 256 }
 0xab7   :  { %p10382_p7 = scmp.ne.s32.totalorder %s12528_s24, %s10381_s23  ;;  %p10385_p8 = scmp.lt.u32.totalorder %s10381_s23, %s12528_s24 }
 0xab9   :  { %p10387_p9 = pnand %p10385_p8, %p10382_p7 }
 0xabb   :  { %10390 = shalt.err (!%p10387_p9)
}
 0xabc   :  { %s10405_s1 = smov 128   ;;  %s10406_s18 = smov 8  }
 0xabd   :  { %7696 = dma.vmem_to_hbm [thread:$0]  %s7691_s17, 256, %s12528_s24, [#allocation6], %s10405_s1, %s10405_s1, %s10406_s18  }
 0xabe   :  { %10393 = dma.done.wait [#allocation6], 256  }
 0xabf   :  { %10394 = vsyncadd [#allocation6], 4294967040 }
 0xac0   :  { %10395 = dma.done.wait [#allocation9], 32  }
 0xac1   :  { %10396 = vsyncadd [#allocation9], 4294967264 }
 0xac2   :  { %7717 = vsyncpa [#allocation5], 1 }
 0xac3   :  { %7718 = vsyncpa [#allocation6], 1 }
 0xac4   :  { %7719 = vsyncpa [#allocation9], 1 }

</bundles_post_ra>
